<compile_context>
chip_gen: v7x
topology: tpu7x:2x2x1
jax: 0.10.0
libtpu: 0.0.40
codegen_flags: <defaults>
</compile_context>

<pallas_src>
from functools import partial

import jax
import jax.numpy as jnp
from jax.experimental import pallas as pl
from jax.experimental.pallas import tpu as pltpu

EPS = 1e-5  # torch.nn.LayerNorm default eps


# --------------------------------------------------------------------------
# Kernel 1: LayerNorm + merged (left/right proj | out-gate) matmul + GLU
# --------------------------------------------------------------------------
def _proj_kernel(x_ref, gamma_ref, beta_ref, w_ref,
                 left_ref, right_ref, gate_ref, *, dh):
    x = x_ref[...].astype(jnp.float32)                          # (tr, dim)
    mu = jnp.mean(x, axis=-1, keepdims=True)
    var = jnp.mean(jnp.square(x - mu), axis=-1, keepdims=True)
    xn = (x - mu) * jax.lax.rsqrt(var + EPS)
    xn = xn * gamma_ref[...] + beta_ref[...]                    # f32 LN math

    # single wide MXU pass: [proj_w (dim,4dh) | out_gate_w (dim,dh)]
    proj = jnp.dot(xn.astype(jnp.bfloat16), w_ref[...],
                   preferred_element_type=jnp.float32)          # (tr, 5*dh)

    value = proj[:, : 2 * dh]
    glu_g = proj[:, 2 * dh: 4 * dh]
    gate_pre = proj[:, 4 * dh:]

    glu = value * jax.nn.sigmoid(glu_g)                         # (tr, 2*dh)
    left_ref[...] = glu[:, :dh].astype(left_ref.dtype)
    right_ref[...] = glu[:, dh:].astype(right_ref.dtype)
    gate_ref[...] = jax.nn.sigmoid(gate_pre).astype(gate_ref.dtype)


# --------------------------------------------------------------------------
# Kernel 2: triangle mix, channel-blocked. grid = (b, dh // d_blk).
#   incoming: out[i,j] = sum_k right[k,i] * left[k,j]
#   outgoing: out[i,j] = sum_k left[i,k] * right[j,k]
# --------------------------------------------------------------------------
def _mix_kernel(left_ref, right_ref, o_ref, *, incoming, d_blk):
    for d in range(d_blk):            # static unroll over the channel block
        l = left_ref[0, d]            # (n, n) bf16
        r = right_ref[0, d]           # (n, n) bf16
        if incoming:
            out = jax.lax.dot_general(
                r, l, dimension_numbers=(((0,), (0,)), ((), ())),
                preferred_element_type=jnp.float32)
        else:
            out = jax.lax.dot_general(
                l, r, dimension_numbers=(((1,), (1,)), ((), ())),
                preferred_element_type=jnp.float32)
        o_ref[0, d] = out.astype(o_ref.dtype)


# --------------------------------------------------------------------------
# Kernel 3: to_out_norm (LayerNorm dh) * out_gate, then final projection
# --------------------------------------------------------------------------
def _out_kernel(mix_ref, gate_ref, gamma_ref, beta_ref, wo_ref, o_ref):
    m = mix_ref[...].astype(jnp.float32)                        # (tr, dh)
    mu = jnp.mean(m, axis=-1, keepdims=True)
    var = jnp.mean(jnp.square(m - mu), axis=-1, keepdims=True)
    mn = (m - mu) * jax.lax.rsqrt(var + EPS)
    mn = mn * gamma_ref[...] + beta_ref[...]
    gated = mn * gate_ref[...].astype(jnp.float32)              # (tr, dh)
    o_ref[...] = jnp.dot(gated.astype(jnp.bfloat16), wo_ref[...],
                         preferred_element_type=jnp.float32
                         ).astype(o_ref.dtype)                  # (tr, dim)


# --------------------------------------------------------------------------
# Helpers
# --------------------------------------------------------------------------
def _round_up(x, m):
    return (x + m - 1) // m * m


def _pick_d_blk(dh, n, max_blk=16, budget_bytes=10 * 1024 * 1024):
    # left + right + out blocks, bf16, double-buffered -> keep under budget so
    # it also fits v7x's smaller (64 MiB physical / 32 MiB scoped) VMEM.
    per_chan = 3 * 2 * 2 * n * n
    cap = max(1, budget_bytes // max(per_chan, 1))
    blk = int(min(max_blk, dh, cap))
    while dh % blk:
        blk -= 1
    return blk


# --------------------------------------------------------------------------
# Wrapper
# --------------------------------------------------------------------------
def triangle_multiplication(x, params, *, mix="incoming", tile_rows=512):
    b, n, n2, dim = x.shape
    assert n == n2, "pair representation must be square"
    dh = params["out_gate_w"].shape[1]

    R = b * n * n
    tile_rows = max(8, (tile_rows // 8) * 8)
    tr = min(tile_rows, R)
    Rpad = _round_up(R, tr)
    n_row_blocks = Rpad // tr

    x_flat = x.reshape(R, dim).astype(jnp.float32)
    if Rpad != R:
        x_flat = jnp.pad(x_flat, ((0, Rpad - R), (0, 0)))

    gamma = params["norm_g"].reshape(1, dim).astype(jnp.float32)
    beta = params["norm_b"].reshape(1, dim).astype(jnp.float32)
    # merged projection + out-gate weight, bf16 MXU operands
    w_cat = jnp.concatenate(
        [params["proj_w"], params["out_gate_w"]], axis=1).astype(jnp.bfloat16)
    wo = params["to_out_w"].astype(jnp.bfloat16)

    # ---- kernel 1: norm + merged projections -------------------------------
    cost1 = pl.CostEstimate(
        flops=2 * Rpad * dim * 5 * dh,
        transcendentals=Rpad * 3 * dh,
        bytes_accessed=Rpad * dim * 4 + 3 * Rpad * dh * 2 + dim * 5 * dh * 2)

    left, right, gate = pl.pallas_call(
        partial(_proj_kernel, dh=dh),
        out_shape=[jax.ShapeDtypeStruct((Rpad, dh), jnp.bfloat16)] * 3,
        grid_spec=pltpu.PrefetchScalarGridSpec(
            num_scalar_prefetch=0,
            grid=(n_row_blocks,),
            in_specs=[
                pl.BlockSpec((tr, dim), lambda r: (r, 0)),
                pl.BlockSpec((1, dim), lambda r: (0, 0)),
                pl.BlockSpec((1, dim), lambda r: (0, 0)),
                pl.BlockSpec((dim, 5 * dh), lambda r: (0, 0)),
            ],
            out_specs=[pl.BlockSpec((tr, dh), lambda r: (r, 0))] * 3,
        ),
        compiler_params=pltpu.CompilerParams(
            dimension_semantics=("parallel",)),
        cost_estimate=cost1,
    )(x_flat, gamma, beta, w_cat)

    # ---- kernel 2: triangle einsum (channel-blocked) ------------------------
    # glue: channel-second bf16 layout so each (b, d) slab is a 2-D MXU matmul
    left_t = jnp.transpose(left[:R].reshape(b, n, n, dh), (0, 3, 1, 2))
    right_t = jnp.transpose(right[:R].reshape(b, n, n, dh), (0, 3, 1, 2))
    d_blk = _pick_d_blk(dh, n)

    cost2 = pl.CostEstimate(
        flops=2 * b * dh * n * n * n,
        transcendentals=0,
        bytes_accessed=3 * b * dh * n * n * 2)

    mix_t = pl.pallas_call(
        partial(_mix_kernel, incoming=(mix == "incoming"), d_blk=d_blk),
        out_shape=jax.ShapeDtypeStruct((b, dh, n, n), jnp.bfloat16),
        grid_spec=pltpu.PrefetchScalarGridSpec(
            num_scalar_prefetch=0,
            grid=(b, dh // d_blk),
            in_specs=[
                pl.BlockSpec((1, d_blk, n, n), lambda bi, di: (bi, di, 0, 0)),
                pl.BlockSpec((1, d_blk, n, n), lambda bi, di: (bi, di, 0, 0)),
            ],
            out_specs=pl.BlockSpec((1, d_blk, n, n),
                                   lambda bi, di: (bi, di, 0, 0)),
        ),
        compiler_params=pltpu.CompilerParams(
            dimension_semantics=("parallel", "parallel"),
            vmem_limit_bytes=32 * 1024 * 1024),
        cost_estimate=cost2,
    )(left_t, right_t)

    mix_flat = jnp.transpose(mix_t, (0, 2, 3, 1)).reshape(R, dh)
    if Rpad != R:
        mix_flat = jnp.pad(mix_flat, ((0, Rpad - R), (0, 0)))

    # ---- kernel 3: out norm + gate + output projection ----------------------
    cost3 = pl.CostEstimate(
        flops=2 * Rpad * dh * dim,
        transcendentals=0,
        bytes_accessed=2 * Rpad * dh * 2 + Rpad * dim * 4 + dh * dim * 2)

    out = pl.pallas_call(
        _out_kernel,
        out_shape=jax.ShapeDtypeStruct((Rpad, dim), jnp.float32),
        grid_spec=pltpu.PrefetchScalarGridSpec(
            num_scalar_prefetch=0,
            grid=(n_row_blocks,),
            in_specs=[
                pl.BlockSpec((tr, dh), lambda r: (r, 0)),
                pl.BlockSpec((tr, dh), lambda r: (r, 0)),
                pl.BlockSpec((1, dh), lambda r: (0, 0)),
                pl.BlockSpec((1, dh), lambda r: (0, 0)),
                pl.BlockSpec((dh, dim), lambda r: (0, 0)),
            ],
            out_specs=pl.BlockSpec((tr, dim), lambda r: (r, 0)),
        ),
        compiler_params=pltpu.CompilerParams(
            dimension_semantics=("parallel",)),
        cost_estimate=cost3,
    )(mix_flat, gate,
      params["to_out_norm_g"].reshape(1, dh).astype(jnp.float32),
      params["to_out_norm_b"].reshape(1, dh).astype(jnp.float32),
      wo)

    # TODO(synk): dropout (p>0, row/col structured) and the optional boolean
    # mask path are not implemented; defaults (p=0.0, mask=None) are identity.
    return out[:R].reshape(b, n, n, dim)


# --------------------------------------------------------------------------
# Pure-JAX fp32 reference (for numerical validation)
# --------------------------------------------------------------------------
def reference(x, params, mix="incoming"):
    def ln(v, g, b_):
        mu = v.mean(-1, keepdims=True)
        var = ((v - mu) ** 2).mean(-1, keepdims=True)
        return (v - mu) / jnp.sqrt(var + EPS) * g + b_

    dh = params["out_gate_w"].shape[1]
    xn = ln(x, params["norm_g"], params["norm_b"])
    proj = xn @ params["proj_w"]
    a, g = proj[..., : 2 * dh], proj[..., 2 * dh:]
    glu = a * jax.nn.sigmoid(g)
    left, right = glu[..., :dh], glu[..., dh:]
    if mix == "incoming":
        out = jnp.einsum("bkjd,bkid->bijd", left, right)
    else:
        out = jnp.einsum("bikd,bjkd->bijd", left, right)
    out = ln(out, params["to_out_norm_g"], params["to_out_norm_b"])
    out = out * jax.nn.sigmoid(xn @ params["out_gate_w"])
    return out @ params["to_out_w"]


if __name__ == "__main__":
    b, n, dim = 2, 16, 128
    dh = dim  # dim_hidden defaults to dim

    key = jax.random.PRNGKey(0)
    k0, k1, k2, k3 = jax.random.split(key, 4)

    params = {
        "norm_g": jnp.ones((dim,), jnp.float32),
        "norm_b": jnp.zeros((dim,), jnp.float32),
        # stored as (in, out) == transpose of the torch Linear weight
        "proj_w": jax.random.normal(k0, (dim, 4 * dh), jnp.float32) / jnp.sqrt(dim),
        "out_gate_w": jax.random.normal(k1, (dim, dh), jnp.float32) / jnp.sqrt(dim),
        "to_out_norm_g": jnp.ones((dh,), jnp.float32),
        "to_out_norm_b": jnp.zeros((dh,), jnp.float32),
        "to_out_w": jax.random.normal(k2, (dh, dim), jnp.float32) / jnp.sqrt(dh),
    }

    x = jax.random.normal(k3, (b, n, n, dim), jnp.float32)

    y = triangle_multiplication(x, params, mix="incoming")
    y = jax.block_until_ready(y)

    y_ref = jax.block_until_ready(reference(x, params, mix="incoming"))

    assert y.shape == (b, n, n, dim)
    # tolerance accounts for bf16 matmul operands / intermediates vs fp32 ref
    assert jnp.allclose(y, y_ref, rtol=5e-2, atol=5e-2), (
        float(jnp.max(jnp.abs(y - y_ref))))

    print("KERNEL_OK")
</pallas_src>

<mosaic_0001>
module attributes {stable_mosaic.version = 11 : i64} {
  func.func @_proj_kernel(%arg0: i32, %arg1: memref<512x128xf32, #tpu.memory_space<vmem>>, %arg2: memref<1x128xf32, #tpu.memory_space<vmem>>, %arg3: memref<1x128xf32, #tpu.memory_space<vmem>>, %arg4: memref<128x640xbf16, #tpu.memory_space<vmem>>, %arg5: memref<512x128xbf16, #tpu.memory_space<vmem>>, %arg6: memref<512x128xbf16, #tpu.memory_space<vmem>>, %arg7: memref<512x128xbf16, #tpu.memory_space<vmem>>) attributes {dimension_semantics = [#tpu.dimension_semantics<parallel>], iteration_bounds = array<i64: 1>, scalar_prefetch = 0 : i64, scratch_operands = 0 : i64, tpu.core_type = #tpu.core_type<tc>, window_params = [{transform_indices = @transform_0, window_bounds = array<i64: 512, 128>}, {pipeline_mode = #tpu.pipeline_mode<synchronous>, transform_indices = @transform_1, window_bounds = array<i64: 1, 128>}, {pipeline_mode = #tpu.pipeline_mode<synchronous>, transform_indices = @transform_2, window_bounds = array<i64: 1, 128>}, {pipeline_mode = #tpu.pipeline_mode<synchronous>, transform_indices = @transform_3, window_bounds = array<i64: 128, 640>}, {transform_indices = @transform_4, window_bounds = array<i64: 512, 128>}, {transform_indices = @transform_5, window_bounds = array<i64: 512, 128>}, {transform_indices = @transform_6, window_bounds = array<i64: 512, 128>}]} {
    %c0 = arith.constant 0 : index
    %c0_0 = arith.constant 0 : index
    %0 = vector.load %arg1[%c0, %c0_0] : memref<512x128xf32, #tpu.memory_space<vmem>>, vector<512x128xf32>
    %cst = arith.constant dense<0.000000e+00> : vector<512xf32>
    %1 = vector.multi_reduction <add>, %0, %cst [1] : vector<512x128xf32> to vector<512xf32>
    %2 = vector.shape_cast %1 : vector<512xf32> to vector<512x1xf32>
    %cst_1 = arith.constant 1.280000e+02 : f32
    %3 = vector.broadcast %cst_1 : f32 to vector<512x1xf32>
    %4 = arith.divf %2, %3 : vector<512x1xf32>
    %5 = vector.broadcast %4 : vector<512x1xf32> to vector<512x128xf32>
    %6 = arith.subf %0, %5 : vector<512x128xf32>
    %7 = arith.mulf %6, %6 : vector<512x128xf32>
    %cst_2 = arith.constant dense<0.000000e+00> : vector<512xf32>
    %8 = vector.multi_reduction <add>, %7, %cst_2 [1] : vector<512x128xf32> to vector<512xf32>
    %9 = vector.shape_cast %8 : vector<512xf32> to vector<512x1xf32>
    %cst_3 = arith.constant 1.280000e+02 : f32
    %10 = vector.broadcast %cst_3 : f32 to vector<512x1xf32>
    %11 = arith.divf %9, %10 : vector<512x1xf32>
    %12 = vector.broadcast %4 : vector<512x1xf32> to vector<512x128xf32>
    %13 = arith.subf %0, %12 : vector<512x128xf32>
    %cst_4 = arith.constant 9.99999974E-6 : f32
    %14 = vector.broadcast %cst_4 : f32 to vector<512x1xf32>
    %15 = arith.addf %11, %14 : vector<512x1xf32>
    %16 = math.rsqrt %15 : vector<512x1xf32>
    %17 = vector.broadcast %16 : vector<512x1xf32> to vector<512x128xf32>
    %18 = arith.mulf %13, %17 : vector<512x128xf32>
    %c0_5 = arith.constant 0 : index
    %c0_6 = arith.constant 0 : index
    %19 = vector.load %arg2[%c0_5, %c0_6] : memref<1x128xf32, #tpu.memory_space<vmem>>, vector<1x128xf32>
    %20 = vector.broadcast %19 : vector<1x128xf32> to vector<512x128xf32>
    %21 = arith.mulf %18, %20 : vector<512x128xf32>
    %c0_7 = arith.constant 0 : index
    %c0_8 = arith.constant 0 : index
    %22 = vector.load %arg3[%c0_7, %c0_8] : memref<1x128xf32, #tpu.memory_space<vmem>>, vector<1x128xf32>
    %23 = vector.broadcast %22 : vector<1x128xf32> to vector<512x128xf32>
    %24 = arith.addf %21, %23 : vector<512x128xf32>
    %25 = arith.truncf %24 : vector<512x128xf32> to vector<512x128xbf16>
    %c0_9 = arith.constant 0 : index
    %c0_10 = arith.constant 0 : index
    %26 = vector.load %arg4[%c0_9, %c0_10] : memref<128x640xbf16, #tpu.memory_space<vmem>>, vector<128x640xbf16>
    %cst_11 = arith.constant dense<0.000000e+00> : vector<512x640xf32>
    %27 = tpu.matmul %25, %26, %cst_11 {dimension_numbers = #tpu.dot_dimension_numbers<[1], [0], [0], [1], [0, 0, 1, 1], [], []>} : vector<512x128xbf16>, vector<128x640xbf16>, vector<512x640xf32> -> vector<512x640xf32>
    %28 = vector.extract_strided_slice %27 {offsets = [0, 0], sizes = [512, 256], strides = [1, 1]} : vector<512x640xf32> to vector<512x256xf32>
    %29 = vector.extract_strided_slice %27 {offsets = [0, 256], sizes = [512, 256], strides = [1, 1]} : vector<512x640xf32> to vector<512x256xf32>
    %30 = vector.extract_strided_slice %27 {offsets = [0, 512], sizes = [512, 128], strides = [1, 1]} : vector<512x640xf32> to vector<512x128xf32>
    %31 = arith.negf %29 : vector<512x256xf32>
    %32 = math.exp %31 : vector<512x256xf32>
    %cst_12 = arith.constant 1.000000e+00 : f32
    %33 = vector.broadcast %cst_12 : f32 to vector<512x256xf32>
    %34 = arith.addf %33, %32 : vector<512x256xf32>
    %35 = arith.divf %33, %34 : vector<512x256xf32>
    %36 = arith.mulf %28, %35 : vector<512x256xf32>
    %37 = vector.extract_strided_slice %36 {offsets = [0, 0], sizes = [512, 128], strides = [1, 1]} : vector<512x256xf32> to vector<512x128xf32>
    %38 = arith.truncf %37 : vector<512x128xf32> to vector<512x128xbf16>
    %c0_13 = arith.constant 0 : index
    %c0_14 = arith.constant 0 : index
    %39 = vector.load %arg5[%c0_13, %c0_14] : memref<512x128xbf16, #tpu.memory_space<vmem>>, vector<512x128xbf16>
    tpu.vector_store %arg5[%c0_13, %c0_14], %38 {strides = array<i32>} : memref<512x128xbf16, #tpu.memory_space<vmem>>, vector<512x128xbf16>,
    %40 = vector.extract_strided_slice %36 {offsets = [0, 128], sizes = [512, 128], strides = [1, 1]} : vector<512x256xf32> to vector<512x128xf32>
    %41 = arith.truncf %40 : vector<512x128xf32> to vector<512x128xbf16>
    %c0_15 = arith.constant 0 : index
    %c0_16 = arith.constant 0 : index
    %42 = vector.load %arg6[%c0_15, %c0_16] : memref<512x128xbf16, #tpu.memory_space<vmem>>, vector<512x128xbf16>
    tpu.vector_store %arg6[%c0_15, %c0_16], %41 {strides = array<i32>} : memref<512x128xbf16, #tpu.memory_space<vmem>>, vector<512x128xbf16>,
    %43 = arith.negf %30 : vector<512x128xf32>
    %44 = math.exp %43 : vector<512x128xf32>
    %cst_17 = arith.constant 1.000000e+00 : f32
    %45 = vector.broadcast %cst_17 : f32 to vector<512x128xf32>
    %46 = arith.addf %45, %44 : vector<512x128xf32>
    %47 = arith.divf %45, %46 : vector<512x128xf32>
    %48 = arith.truncf %47 : vector<512x128xf32> to vector<512x128xbf16>
    %c0_18 = arith.constant 0 : index
    %c0_19 = arith.constant 0 : index
    %49 = vector.load %arg7[%c0_18, %c0_19] : memref<512x128xbf16, #tpu.memory_space<vmem>>, vector<512x128xbf16>
    tpu.vector_store %arg7[%c0_18, %c0_19], %48 {strides = array<i32>} : memref<512x128xbf16, #tpu.memory_space<vmem>>, vector<512x128xbf16>,
    return
  }
  func.func @transform_0(%arg0: i32) -> (i32, i32) {
    %c0_i32 = arith.constant 0 : i32
    %c0_i32_0 = arith.constant 0 : i32
    return %arg0, %c0_i32 : i32, i32
  }
  func.func @transform_1(%arg0: i32) -> (i32, i32) {
    %c0_i32 = arith.constant 0 : i32
    %c0_i32_0 = arith.constant 0 : i32
    %c0_i32_1 = arith.constant 0 : i32
    return %c0_i32, %c0_i32_0 : i32, i32
  }
  func.func @transform_2(%arg0: i32) -> (i32, i32) {
    %c0_i32 = arith.constant 0 : i32
    %c0_i32_0 = arith.constant 0 : i32
    %c0_i32_1 = arith.constant 0 : i32
    return %c0_i32, %c0_i32_0 : i32, i32
  }
  func.func @transform_3(%arg0: i32) -> (i32, i32) {
    %c0_i32 = arith.constant 0 : i32
    %c0_i32_0 = arith.constant 0 : i32
    %c0_i32_1 = arith.constant 0 : i32
    return %c0_i32, %c0_i32_0 : i32, i32
  }
  func.func @transform_4(%arg0: i32) -> (i32, i32) {
    %c0_i32 = arith.constant 0 : i32
    %c0_i32_0 = arith.constant 0 : i32
    return %arg0, %c0_i32 : i32, i32
  }
  func.func @transform_5(%arg0: i32) -> (i32, i32) {
    %c0_i32 = arith.constant 0 : i32
    %c0_i32_0 = arith.constant 0 : i32
    return %arg0, %c0_i32 : i32, i32
  }
  func.func @transform_6(%arg0: i32) -> (i32, i32) {
    %c0_i32 = arith.constant 0 : i32
    %c0_i32_0 = arith.constant 0 : i32
    return %arg0, %c0_i32 : i32, i32
  }
}

</mosaic_0001>

<bundles_post_ra>
// kernel: tpu_custom_call.1
= control target key start
LH: loop header
LB: loop body
LE: loop exit
PB: predicated region body
PF: predicated region fallthrough
CT: control target
= control target key end

     0   :  { %12 = vsyncpa [#allocation3], 0  ;;  %s8647_s0 = inlined_call_operand.hbm [shape: f32[512,128], index: 0, kind: input, shape index: {}]   ;;  %s8648_s1 = inlined_call_operand.vmem [shape: f32[1,128], index: 1, kind: input, shape index: {}]   ;;  %s8649_s2 = inlined_call_operand.vmem [shape: f32[1,128], index: 2, kind: input, shape index: {}]   ;;  %s8650_s3 = inlined_call_operand.hbm [shape: bf16[128,640], index: 3, kind: input, shape index: {}]   ;;  %s8651_s4 = inlined_call_operand.hbm [shape: bf16[512,128], index: 4, kind: output, shape index: {0}]   ;;  %s8652_s5 = inlined_call_operand.hbm [shape: bf16[512,128], index: 5, kind: output, shape index: {1}]   ;;  %s8653_s6 = inlined_call_operand.hbm [shape: bf16[512,128], index: 6, kind: output, shape index: {2}]  }
   0x1   :  { %13 = vsyncpa [#allocation6], 0 }
   0x2   :  { %14 = vsyncpa [#allocation4], 0 }
   0x3   :  { %15 = vsyncpa [#allocation9], 0  ;;  %s6950_s21 = smov [#allocation2]   ;;  %s6832_s25 = scalar_lea.hbm %s8647_s0, 8192 }
   0x4   :  { %s21_s22 = sshll.u32 %s6950_s21, 4  ;;  %p6833_p0 = scmp.ne.s32.totalorder %s8647_s0, %s6832_s25  ;;  %s22_s22 = int_to_ptr.vmem [resolvable:$true] %s21_s22 }
   0x5   :  { %p6836_p1 = scmp.lt.u32.totalorder %s6832_s25, %s8647_s0 }
   0x7   :  { %p6838_p2 = pnand %p6836_p1, %p6833_p0 }
   0x9   :  { %6841 = shalt.err (!%p6838_p2)
}
   0xa   :  { %s6842_s30 = scalar_lea.vmem %s22_s22, 8192  ;;  %p6847_p4 = scmp.lt.s32.totalorder %s22_s22, %s22_s22 }
   0xb   :  { %p6843_p3 = scmp.ne.s32.totalorder %s22_s22, %s6842_s30  ;;  %p6848_p5 = scmp.lt.s32.totalorder %s6842_s30, %s6842_s30 }
   0xd   :  { %p6849_p6 = por %p6848_p5, %p6847_p4 }
   0xf   :  { %p6850_p7 = pnand %p6849_p6, %p6843_p3 }
  0x11   :  { %6853 = shalt.err (!%p6850_p7)
}
  0x12   :  { %s6951_s7 = smov 128   ;;  %s6952_s8 = smov 8  }
  0x13   :  { %27 = dma.hbm_to_vmem [thread:$0]  %s8647_s0, 8192, %s22_s22, [#allocation3], %s6951_s7, %s6951_s7, %s6952_s8  }
  0x14   :  { %s6953_s11 = smov [#allocation5]   ;;  %s6854_s15 = scalar_lea.hbm %s8650_s3, 5120 }
  0x15   :  { %s37_s12 = sshll.u32 %s6953_s11, 4  ;;  %p6855_p8 = scmp.ne.s32.totalorder %s8650_s3, %s6854_s15  ;;  %s38_s12 = int_to_ptr.vmem [resolvable:$true] %s37_s12 }
  0x16   :  { %p6858_p9 = scmp.lt.u32.totalorder %s6854_s15, %s8650_s3 }
  0x18   :  { %p6860_p10 = pnand %p6858_p9, %p6855_p8 }
  0x1a   :  { %6863 = shalt.err (!%p6860_p10)
}
  0x1b   :  { %s6864_s20 = scalar_lea.vmem %s38_s12, 5120  ;;  %p6869_p12 = scmp.lt.s32.totalorder %s38_s12, %s38_s12 }
  0x1c   :  { %p6865_p11 = scmp.ne.s32.totalorder %s38_s12, %s6864_s20  ;;  %p6870_p13 = scmp.lt.s32.totalorder %s6864_s20, %s6864_s20 }
  0x1e   :  { %p6871_p0 = por %p6870_p13, %p6869_p12 }
  0x20   :  { %p6872_p1 = pnand %p6871_p0, %p6865_p11 }
  0x22   :  { %6875 = shalt.err (!%p6872_p1)
}
  0x23   :  { %s6954_s0 = smov 320   ;;  %s6955_s21 = smov 20  }
  0x24   :  { %43 = dma.hbm_to_vmem [thread:$0]  %s8650_s3, 5120, %s38_s12, [#allocation6], %s6954_s0, %s6954_s0, %s6955_s21  }
  0x25   :  { %6942 = dma.done.wait [#allocation3], 8192  }
  0x26   :  { %6943 = vsyncadd [#allocation3], 4294959104 }
  0x27   :  { %6944 = dma.done.wait [#allocation6], 5120  }
  0x28   :  { %6945 = vsyncadd [#allocation6], 4294962176  ;;  %v7021_v0 = vld [vmem:[#allocation2 + $0x180] sm:$0xff]  ;;  %v7027_v2 = vld [vmem:[#allocation2 + $0x188] sm:$0xff] }
  0x29   :  { %v7023_v1 = vld [vmem:[#allocation2] sm:$0xff]  ;;  %211 = vadd.xlane.f32.xlu0 %v7021_v0  ;;  %v7029_v3 = vld [vmem:[#allocation2 + $0x8] sm:$0xff]  ;;  %v7033_v4 = vld [vmem:[#allocation2 + $0x190] sm:$0xff] }
  0x2a   :  { %115 = vadd.xlane.f32.xlu1 %v7023_v1  ;;  %v7035_v5 = vld [vmem:[#allocation2 + $0x198] sm:$0xff]  ;;  %v7039_v6 = vld [vmem:[#allocation2 + $0x10] sm:$0xff]  ;;  %v7045_v8 = vld [vmem:[#allocation2 + $0x1a0] sm:$0xff] }
  0x2b   :  { %v7041_v7 = vld [vmem:[#allocation2 + $0x18] sm:$0xff]  ;;  %v7047_v9 = vld [vmem:[#allocation2 + $0x1a8] sm:$0xff]  ;;  %v7049_v10 = vld [vmem:[#allocation2 + $0x20] sm:$0xff] }
  0x2c   :  { %v7051_v11 = vld [vmem:[#allocation2 + $0x28] sm:$0xff]  ;;  %v7055_v12 = vld [vmem:[#allocation2 + $0x1b0] sm:$0xff]  ;;  %v7057_v13 = vld [vmem:[#allocation2 + $0x1b8] sm:$0xff] }
  0x2d   :  { %213 = vadd.xlane.f32.xlu0 %v7027_v2  ;;  %v7061_v14 = vld [vmem:[#allocation2 + $0x30] sm:$0xff]  ;;  %v7063_v15 = vld [vmem:[#allocation2 + $0x38] sm:$0xff]  ;;  %v7067_v16 = vld [vmem:[#allocation2 + $0x1c0] sm:$0xff] }
  0x2e   :  { %117 = vadd.xlane.f32.xlu1 %v7029_v3  ;;  %v7069_v17 = vld [vmem:[#allocation2 + $0x1c8] sm:$0xff]  ;;  %v7075_v18 = vld [vmem:[#allocation2 + $0x40] sm:$0xff]  ;;  %v7081_v20 = vld [vmem:[#allocation2 + $0x1d0] sm:$0xff] }
  0x2f   :  { %v7077_v19 = vld [vmem:[#allocation2 + $0x48] sm:$0xff]  ;;  %v7083_v21 = vld [vmem:[#allocation2 + $0x1d8] sm:$0xff]  ;;  %v7087_v22 = vld [vmem:[#allocation2 + $0x50] sm:$0xff] }
  0x30   :  { %v7089_v23 = vld [vmem:[#allocation2 + $0x58] sm:$0xff]  ;;  %v7093_v24 = vld [vmem:[#allocation2 + $0x1e0] sm:$0xff]  ;;  %v7095_v25 = vld [vmem:[#allocation2 + $0x1e8] sm:$0xff] }
  0x31   :  { %215 = vadd.xlane.f32.xlu0 %v7033_v4  ;;  %v7099_v26 = vld [vmem:[#allocation2 + $0x60] sm:$0xff]  ;;  %v7101_v27 = vld [vmem:[#allocation2 + $0x68] sm:$0xff]  ;;  %v7105_v28 = vld [vmem:[#allocation2 + $0x1f0] sm:$0xff] }
  0x32   :  { %217 = vadd.xlane.f32.xlu1 %v7035_v5  ;;  %v7107_v29 = vld [vmem:[#allocation2 + $0x1f8] sm:$0xff]  ;;  %v7111_v30 = vld [vmem:[#allocation2 + $0x70] sm:$0xff]  ;;  %v7117_v32 = vld [vmem:[#allocation2 + $0x80] sm:$0xff] }
  0x33   :  { %v7113_v31 = vld [vmem:[#allocation2 + $0x78] sm:$0xff]  ;;  %v7119_v33 = vld [vmem:[#allocation2 + $0x88] sm:$0xff]  ;;  %v7123_v34 = vld [vmem:[#allocation2 + $0x90] sm:$0xff] }
  0x34   :  { %v7125_v35 = vld [vmem:[#allocation2 + $0x98] sm:$0xff]  ;;  %v7129_v36 = vld [vmem:[#allocation2 + $0xa0] sm:$0xff]  ;;  %v7131_v37 = vld [vmem:[#allocation2 + $0xa8] sm:$0xff] }
  0x35   :  { %119 = vadd.xlane.f32.xlu0 %v7039_v6  ;;  %v7135_v38 = vld [vmem:[#allocation2 + $0xb0] sm:$0xff]  ;;  %v7137_v39 = vld [vmem:[#allocation2 + $0xb8] sm:$0xff]  ;;  %v7141_v40 = vld [vmem:[#allocation2 + $0xc0] sm:$0xff] }
  0x36   :  { %121 = vadd.xlane.f32.xlu1 %v7041_v7  ;;  %v7143_v41 = vld [vmem:[#allocation2 + $0xc8] sm:$0xff]  ;;  %v7147_v42 = vld [vmem:[#allocation2 + $0xd0] sm:$0xff]  ;;  %v7149_v43 = vld [vmem:[#allocation2 + $0xd8] sm:$0xff] }
  0x37   :  { %v7153_v44 = vld [vmem:[#allocation2 + $0xe0] sm:$0xff]  ;;  %v7155_v45 = vld [vmem:[#allocation2 + $0xe8] sm:$0xff]  ;;  %v7159_v46 = vld [vmem:[#allocation2 + $0xf0] sm:$0xff] }
  0x38   :  { %v7161_v47 = vld [vmem:[#allocation2 + $0xf8] sm:$0xff]  ;;  %v7165_v48 = vld [vmem:[#allocation2 + $0x100] sm:$0xff]  ;;  %v7167_v49 = vld [vmem:[#allocation2 + $0x108] sm:$0xff] }
  0x39   :  { %219 = vadd.xlane.f32.xlu0 %v7045_v8 }
  0x3a   :  { %221 = vadd.xlane.f32.xlu1 %v7047_v9 }
  0x3d   :  { %123 = vadd.xlane.f32.xlu0 %v7049_v10 }
  0x3e   :  { %125 = vadd.xlane.f32.xlu1 %v7051_v11 }
  0x41   :  { %223 = vadd.xlane.f32.xlu0 %v7055_v12 }
  0x42   :  { %225 = vadd.xlane.f32.xlu1 %v7057_v13 }
  0x45   :  { %127 = vadd.xlane.f32.xlu0 %v7061_v14 }
  0x46   :  { %129 = vadd.xlane.f32.xlu1 %v7063_v15 }
  0x49   :  { %227 = vadd.xlane.f32.xlu0 %v7067_v16 }
  0x4a   :  { %229 = vadd.xlane.f32.xlu1 %v7069_v17 }
  0x4d   :  { %131 = vadd.xlane.f32.xlu0 %v7075_v18 }
  0x4e   :  { %133 = vadd.xlane.f32.xlu1 %v7077_v19 }
  0x51   :  { %231 = vadd.xlane.f32.xlu0 %v7081_v20 }
  0x52   :  { %233 = vadd.xlane.f32.xlu1 %v7083_v21 }
  0x55   :  { %135 = vadd.xlane.f32.xlu0 %v7087_v22 }
  0x56   :  { %137 = vadd.xlane.f32.xlu1 %v7089_v23 }
  0x59   :  { %235 = vadd.xlane.f32.xlu0 %v7093_v24 }
  0x5a   :  { %237 = vadd.xlane.f32.xlu1 %v7095_v25 }
  0x5d   :  { %139 = vadd.xlane.f32.xlu0 %v7099_v26 }
  0x5e   :  { %141 = vadd.xlane.f32.xlu1 %v7101_v27 }
  0x61   :  { %239 = vadd.xlane.f32.xlu0 %v7105_v28 }
  0x62   :  { %241 = vadd.xlane.f32.xlu1 %v7107_v29 }
  0x65   :  { %143 = vadd.xlane.f32.xlu0 %v7111_v30 }
  0x66   :  { %145 = vadd.xlane.f32.xlu1 %v7113_v31 }
  0x69   :  { %147 = vadd.xlane.f32.xlu0 %v7117_v32 }
  0x6a   :  { %149 = vadd.xlane.f32.xlu1 %v7119_v33 }
  0x6d   :  { %151 = vadd.xlane.f32.xlu0 %v7123_v34 }
  0x6e   :  { %153 = vadd.xlane.f32.xlu1 %v7125_v35 }
  0x71   :  { %155 = vadd.xlane.f32.xlu0 %v7129_v36 }
  0x72   :  { %157 = vadd.xlane.f32.xlu1 %v7131_v37 }
  0x75   :  { %159 = vadd.xlane.f32.xlu0 %v7135_v38 }
  0x76   :  { %161 = vadd.xlane.f32.xlu1 %v7137_v39 }
  0x79   :  { %163 = vadd.xlane.f32.xlu0 %v7141_v40 }
  0x7a   :  { %165 = vadd.xlane.f32.xlu1 %v7143_v41 }
  0x7d   :  { %167 = vadd.xlane.f32.xlu0 %v7147_v42 }
  0x7e   :  { %169 = vadd.xlane.f32.xlu1 %v7149_v43 }
  0x81   :  { %171 = vadd.xlane.f32.xlu0 %v7153_v44 }
  0x82   :  { %173 = vadd.xlane.f32.xlu1 %v7155_v45 }
  0x85   :  { %175 = vadd.xlane.f32.xlu0 %v7159_v46 }
  0x86   :  { %177 = vadd.xlane.f32.xlu1 %v7161_v47 }
  0x89   :  { %179 = vadd.xlane.f32.xlu0 %v7165_v48 }
  0x8a   :  { %181 = vadd.xlane.f32.xlu1 %v7167_v49 }
  0xb6   :  { %v212_v50 = vpop.xlane.xlu0 %211 }
  0xb7   :  { %v116_v51 = vpop.xlane.xlu1 %115  ;;  %v292_v52 = vmul.f32 0.0078125, %v212_v50 }
  0xb8   :  { %v244_v53 = vmul.f32 0.0078125, %v116_v51 }
  0xb9   :  { %v7172_v54 = vsub.f32 %v7021_v0, %v292_v52  ;;  %v5873_v0 = vld [vmem:[#allocation5 + $0x4] ss:$20 sps:$4 sm:$0xff]   ;;  %v5876_v52 = vld [vmem:[#allocation5 + $0x2c] ss:$20 sps:$4 sm:$0xff]  }
  0xba   :  { %v7175_v55 = vsub.f32 %v7023_v1, %v244_v53  ;;  %v214_v56 = vpop.xlane.xlu0 %213  ;;  %v5875_v1 = vld [vmem:[#allocation5] ss:$20 sps:$4 sm:$0xff]   ;;  %5845 = vmatprep.subr.bf16.mxu1 %v5873_v0  ;;  %1250 = vmatprep.subr.bf16.mxu0 %v5873_v0 }
  0xbb   :  { %v118_v57 = vpop.xlane.xlu1 %117  ;;  %v293_v58 = vmul.f32 0.0078125, %v214_v56  ;;  %v420_v59 = vmul.f32 %v7172_v54, %v7172_v54  ;;  %5853 = vmatpush1.bf16.msra.mxu1 %v5875_v1  ;;  %1251 = vmatpush1.bf16.msra.mxu0 %v5875_v1 }
  0xbc   :  { %v245_v60 = vmul.f32 0.0078125, %v118_v57  ;;  %v372_v62 = vmul.f32 %v7175_v55, %v7175_v55  ;;  %5846 = vmatprep.subr.bf16.mxu1 %v5876_v52  ;;  %1252 = vmatprep.subr.bf16.mxu0 %v5876_v52 }
  0xbd   :  { %532 = vadd.xlane.f32.xlu0 %v420_v59  ;;  %v7180_v61 = vsub.f32 %v7027_v2, %v293_v58 }
  0xbe   :  { %v7185_v63 = vsub.f32 %v7029_v3, %v245_v60  ;;  %v216_v50 = vpop.xlane.xlu0 %215 }
  0xbf   :  { %v218_v51 = vpop.xlane.xlu1 %217  ;;  %v294_v53 = vmul.f32 0.0078125, %v216_v50  ;;  %v421_v56 = vmul.f32 %v7180_v61, %v7180_v61 }
  0xc0   :  { %v295_v57 = vmul.f32 0.0078125, %v218_v51  ;;  %v373_v3 = vmul.f32 %v7185_v63, %v7185_v63 }
  0xc1   :  { %534 = vadd.xlane.f32.xlu1 %v421_v56  ;;  %436 = vadd.xlane.f32.xlu0 %v372_v62  ;;  %v7190_v2 = vsub.f32 %v7033_v4, %v294_v53 }
  0xc2   :  { %v7195_v58 = vsub.f32 %v7035_v5, %v295_v57  ;;  %v120_v59 = vpop.xlane.xlu0 %119 }
  0xc3   :  { %v122_v60 = vpop.xlane.xlu1 %121  ;;  %v246_v50 = vmul.f32 0.0078125, %v120_v59  ;;  %v422_v0 = vmul.f32 %v7190_v2, %v7190_v2 }
  0xc4   :  { %v247_v1 = vmul.f32 0.0078125, %v122_v60  ;;  %v423_v62 = vmul.f32 %v7195_v58, %v7195_v58 }
  0xc5   :  { %536 = vadd.xlane.f32.xlu0 %v422_v0  ;;  %438 = vadd.xlane.f32.xlu1 %v373_v3  ;;  %v7200_v4 = vsub.f32 %v7039_v6, %v246_v50 }
  0xc6   :  { %v7205_v5 = vsub.f32 %v7041_v7, %v247_v1  ;;  %v220_v51 = vpop.xlane.xlu0 %219  ;;  %v5878_v7 = vld [vmem:[#allocation5 + $0x28] ss:$20 sps:$4 sm:$0xff]  }
  0xc7   :  { %v222_v53 = vpop.xlane.xlu1 %221  ;;  %v296_v56 = vmul.f32 0.0078125, %v220_v51  ;;  %v374_v52 = vmul.f32 %v7200_v4, %v7200_v4  ;;  %5854 = vmatpush1.bf16.msra.mxu1 %v5878_v7  ;;  %1253 = vmatpush1.bf16.msra.mxu0 %v5878_v7 }
  0xc8   :  { %v297_v57 = vmul.f32 0.0078125, %v222_v53  ;;  %v375_v6 = vmul.f32 %v7205_v5, %v7205_v5 }
  0xc9   :  { %440 = vadd.xlane.f32.xlu0 %v374_v52  ;;  %538 = vadd.xlane.f32.xlu1 %v423_v62  ;;  %v7210_v3 = vsub.f32 %v7045_v8, %v296_v56  ;;  %v5879_v62 = vld [vmem:[#allocation5 + $0x54] ss:$20 sps:$4 sm:$0xff]  }
  0xca   :  { %v7215_v59 = vsub.f32 %v7047_v9, %v297_v57  ;;  %v124_v60 = vpop.xlane.xlu0 %123  ;;  %5847 = vmatprep.subr.bf16.mxu1 %v5879_v62  ;;  %v5881_v57 = vld [vmem:[#allocation5 + $0x50] ss:$20 sps:$4 sm:$0xff]   ;;  %1254 = vmatprep.subr.bf16.mxu0 %v5879_v62  ;;  %v5884_v62 = vld [vmem:[#allocation5 + $0x78] ss:$20 sps:$4 sm:$0xff]  }
  0xcb   :  { %v126_v50 = vpop.xlane.xlu1 %125  ;;  %v248_v0 = vmul.f32 0.0078125, %v124_v60  ;;  %v424_v1 = vmul.f32 %v7210_v3, %v7210_v3  ;;  %5855 = vmatpush1.bf16.msra.mxu1 %v5881_v57  ;;  %1255 = vmatpush1.bf16.msra.mxu0 %v5881_v57 }
  0xcc   :  { %v249_v51 = vmul.f32 0.0078125, %v126_v50  ;;  %v425_v9 = vmul.f32 %v7215_v59, %v7215_v59 }
  0xcd   :  { %540 = vadd.xlane.f32.xlu0 %v424_v1  ;;  %442 = vadd.xlane.f32.xlu1 %v375_v6  ;;  %v7220_v8 = vsub.f32 %v7049_v10, %v248_v0  ;;  %v5882_v0 = vld [vmem:[#allocation5 + $0x7c] ss:$20 sps:$4 sm:$0xff]  }
  0xce   :  { %v7225_v53 = vsub.f32 %v7051_v11, %v249_v51  ;;  %v224_v56 = vpop.xlane.xlu0 %223  ;;  %5848 = vmatprep.subr.bf16.mxu1 %v5882_v0  ;;  %1256 = vmatprep.subr.bf16.mxu0 %v5882_v0 }
  0xcf   :  { %v226_v52 = vpop.xlane.xlu1 %225  ;;  %v298_v60 = vmul.f32 0.0078125, %v224_v56  ;;  %v376_v7 = vmul.f32 %v7220_v8, %v7220_v8  ;;  %5856 = vmatpush1.bf16.msra.mxu1 %v5884_v62  ;;  %1257 = vmatpush1.bf16.msra.mxu0 %v5884_v62 }
  0xd0   :  { %v299_v50 = vmul.f32 0.0078125, %v226_v52  ;;  %v377_v11 = vmul.f32 %v7225_v53, %v7225_v53 }
  0xd1   :  { %444 = vadd.xlane.f32.xlu0 %v376_v7  ;;  %542 = vadd.xlane.f32.xlu1 %v425_v9  ;;  %v7230_v10 = vsub.f32 %v7055_v12, %v298_v60  ;;  %v5885_v60 = vld [vmem:[#allocation5 + $0xa4] ss:$20 sps:$4 sm:$0xff]  }
  0xd2   :  { %v7235_v6 = vsub.f32 %v7057_v13, %v299_v50  ;;  %v128_v1 = vpop.xlane.xlu0 %127  ;;  %5849 = vmatprep.subr.bf16.mxu1 %v5885_v60  ;;  %1258 = vmatprep.subr.bf16.mxu0 %v5885_v60 }
  0xd3   :  { %v130_v51 = vpop.xlane.xlu1 %129  ;;  %v250_v56 = vmul.f32 0.0078125, %v128_v1  ;;  %v426_v52 = vmul.f32 %v7230_v10, %v7230_v10  ;;  %v5887_v1 = vld [vmem:[#allocation5 + $0xa0] ss:$20 sps:$4 sm:$0xff]  }
  0xd4   :  { %v251_v57 = vmul.f32 0.0078125, %v130_v51  ;;  %v427_v13 = vmul.f32 %v7235_v6, %v7235_v6  ;;  %5857 = vmatpush1.bf16.msra.mxu1 %v5887_v1  ;;  %1259 = vmatpush1.bf16.msra.mxu0 %v5887_v1 }
  0xd5   :  { %544 = vadd.xlane.f32.xlu0 %v426_v52  ;;  %446 = vadd.xlane.f32.xlu1 %v377_v11  ;;  %v7240_v12 = vsub.f32 %v7061_v14, %v250_v56  ;;  %v5888_v56 = vld [vmem:[#allocation5 + $0xcc] ss:$20 sps:$4 sm:$0xff]  }
  0xd6   :  { %v7245_v9 = vsub.f32 %v7063_v15, %v251_v57  ;;  %v228_v7 = vpop.xlane.xlu0 %227  ;;  %5850 = vmatprep.subr.bf16.mxu1 %v5888_v56  ;;  %1260 = vmatprep.subr.bf16.mxu0 %v5888_v56 }
  0xd7   :  { %v230_v50 = vpop.xlane.xlu1 %229  ;;  %v300_v51 = vmul.f32 0.0078125, %v228_v7  ;;  %v378_v0 = vmul.f32 %v7240_v12, %v7240_v12  ;;  %v5890_v7 = vld [vmem:[#allocation5 + $0xc8] ss:$20 sps:$4 sm:$0xff]  }
  0xd8   :  { %v301_v62 = vmul.f32 0.0078125, %v230_v50  ;;  %v379_v15 = vmul.f32 %v7245_v9, %v7245_v9  ;;  %5858 = vmatpush1.bf16.msra.mxu1 %v5890_v7  ;;  %1261 = vmatpush1.bf16.msra.mxu0 %v5890_v7 }
  0xd9   :  { %448 = vadd.xlane.f32.xlu0 %v378_v0  ;;  %546 = vadd.xlane.f32.xlu1 %v427_v13  ;;  %v7250_v14 = vsub.f32 %v7067_v16, %v300_v51  ;;  %v5891_v51 = vld [vmem:[#allocation5 + $0xf4] ss:$20 sps:$4 sm:$0xff]  }
  0xda   :  { %v7255_v11 = vsub.f32 %v7069_v17, %v301_v62  ;;  %v132_v52 = vpop.xlane.xlu0 %131  ;;  %5851 = vmatprep.subr.bf16.mxu1 %v5891_v51  ;;  %1262 = vmatprep.subr.bf16.mxu0 %v5891_v51 }
  0xdb   :  { %v134_v57 = vpop.xlane.xlu1 %133  ;;  %v252_v50 = vmul.f32 0.0078125, %v132_v52  ;;  %v428_v60 = vmul.f32 %v7250_v14, %v7250_v14  ;;  %v5893_v52 = vld [vmem:[#allocation5 + $0xf0] ss:$20 sps:$4 sm:$0xff]  }
  0xdc   :  { %v253_v1 = vmul.f32 0.0078125, %v134_v57  ;;  %v429_v17 = vmul.f32 %v7255_v11, %v7255_v11  ;;  %5859 = vmatpush1.bf16.msra.mxu1 %v5893_v52  ;;  %1263 = vmatpush1.bf16.msra.mxu0 %v5893_v52 }
  0xdd   :  { %548 = vadd.xlane.f32.xlu0 %v428_v60  ;;  %450 = vadd.xlane.f32.xlu1 %v379_v15  ;;  %v7260_v16 = vsub.f32 %v7075_v18, %v252_v50  ;;  %v5894_v50 = vld [vmem:[#allocation5 + $0x11c] ss:$20 sps:$4 sm:$0xff]  }
  0xde   :  { %v7265_v13 = vsub.f32 %v7077_v19, %v253_v1  ;;  %v232_v0 = vpop.xlane.xlu0 %231  ;;  %5852 = vmatprep.subr.bf16.mxu1 %v5894_v50  ;;  %1264 = vmatprep.subr.bf16.mxu0 %v5894_v50 }
  0xdf   :  { %v234_v62 = vpop.xlane.xlu1 %233  ;;  %v302_v57 = vmul.f32 0.0078125, %v232_v0  ;;  %v380_v56 = vmul.f32 %v7260_v16, %v7260_v16  ;;  %v5896_v0 = vld [vmem:[#allocation5 + $0x118] ss:$20 sps:$4 sm:$0xff]  }
  0xe0   :  { %v303_v7 = vmul.f32 0.0078125, %v234_v62  ;;  %v381_v19 = vmul.f32 %v7265_v13, %v7265_v13  ;;  %5860 = vmatpush1.bf16.msra.mxu1 %v5896_v0  ;;  %1265 = vmatpush1.bf16.msra.mxu0 %v5896_v0 }
  0xe1   :  { %452 = vadd.xlane.f32.xlu0 %v380_v56  ;;  %550 = vadd.xlane.f32.xlu1 %v429_v17  ;;  %v7270_v18 = vsub.f32 %v7081_v20, %v302_v57 }
  0xe2   :  { %v7275_v15 = vsub.f32 %v7083_v21, %v303_v7  ;;  %v136_v60 = vpop.xlane.xlu0 %135  ;;  %v8654_v7 = vmov 0  }
  0xe3   :  { %v138_v1 = vpop.xlane.xlu1 %137  ;;  %v254_v62 = vmul.f32 0.0078125, %v136_v60  ;;  %v430_v51 = vmul.f32 %v7270_v18, %v7270_v18  ;;  %1522 = vmatprep.mubr.bf16.mxu1 %v8654_v7  ;;  %1282 = vmatprep.mubr.bf16.mxu0 %v8654_v7 }
  0xe4   :  { %v255_v52 = vmul.f32 0.0078125, %v138_v1  ;;  %v431_v21 = vmul.f32 %v7275_v15, %v7275_v15 }
  0xe5   :  { %552 = vadd.xlane.f32.xlu0 %v430_v51  ;;  %454 = vadd.xlane.f32.xlu1 %v381_v19  ;;  %v7280_v20 = vsub.f32 %v7087_v22, %v254_v62 }
  0xe6   :  { %v7285_v17 = vsub.f32 %v7089_v23, %v255_v52  ;;  %v236_v57 = vpop.xlane.xlu0 %235 }
  0xe7   :  { %v238_v56 = vpop.xlane.xlu1 %237  ;;  %v304_v50 = vmul.f32 0.0078125, %v236_v57  ;;  %v382_v19 = vmul.f32 %v7280_v20, %v7280_v20 }
  0xe8   :  { %v305_v60 = vmul.f32 0.0078125, %v238_v56  ;;  %v383_v23 = vmul.f32 %v7285_v17, %v7285_v17 }
  0xe9   :  { %456 = vadd.xlane.f32.xlu0 %v382_v19  ;;  %554 = vadd.xlane.f32.xlu1 %v431_v21  ;;  %v7292_v22 = vsub.f32 %v7093_v24, %v304_v50 }
  0xea   :  { %v7297_v1 = vsub.f32 %v7095_v25, %v305_v60  ;;  %v140_v0 = vpop.xlane.xlu0 %139 }
  0xeb   :  { %v142_v62 = vpop.xlane.xlu1 %141  ;;  %v256_v51 = vmul.f32 0.0078125, %v140_v0  ;;  %v432_v52 = vmul.f32 %v7292_v22, %v7292_v22 }
  0xec   :  { %v257_v57 = vmul.f32 0.0078125, %v142_v62  ;;  %v433_v24 = vmul.f32 %v7297_v1, %v7297_v1 }
  0xed   :  { %556 = vadd.xlane.f32.xlu0 %v432_v52  ;;  %458 = vadd.xlane.f32.xlu1 %v383_v23  ;;  %v7302_v21 = vsub.f32 %v7099_v26, %v256_v51 }
  0xee   :  { %v7307_v56 = vsub.f32 %v7101_v27, %v257_v57  ;;  %v240_v25 = vpop.xlane.xlu0 %239 }
  0xef   :  { %v242_v50 = vpop.xlane.xlu1 %241  ;;  %v306_v19 = vmul.f32 0.0078125, %v240_v25  ;;  %v384_v60 = vmul.f32 %v7302_v21, %v7302_v21 }
  0xf0   :  { %v307_v0 = vmul.f32 0.0078125, %v242_v50  ;;  %v385_v26 = vmul.f32 %v7307_v56, %v7307_v56 }
  0xf1   :  { %460 = vadd.xlane.f32.xlu0 %v384_v60  ;;  %558 = vadd.xlane.f32.xlu1 %v433_v24  ;;  %v7312_v23 = vsub.f32 %v7105_v28, %v306_v19 }
  0xf2   :  { %v7317_v62 = vsub.f32 %v7107_v29, %v307_v0  ;;  %v144_v27 = vpop.xlane.xlu0 %143 }
  0xf3   :  { %v146_v51 = vpop.xlane.xlu1 %145  ;;  %v258_v52 = vmul.f32 0.0078125, %v144_v27  ;;  %v434_v57 = vmul.f32 %v7312_v23, %v7312_v23 }
  0xf4   :  { %v259_v25 = vmul.f32 0.0078125, %v146_v51  ;;  %v435_v24 = vmul.f32 %v7317_v62, %v7317_v62 }
  0xf5   :  { %v7322_v50 = vsub.f32 %v7111_v30, %v258_v52  ;;  %560 = vadd.xlane.f32.xlu0 %v434_v57  ;;  %462 = vadd.xlane.f32.xlu1 %v385_v26 }
  0xf6   :  { %v7325_v28 = vsub.f32 %v7113_v31, %v259_v25  ;;  %v148_v29 = vpop.xlane.xlu0 %147  ;;  %v7336_v31 = vld [vmem:[#allocation2 + $0x110] sm:$0xff] }
  0xf7   :  { %v150_v19 = vpop.xlane.xlu1 %149  ;;  %v386_v60 = vmul.f32 %v7322_v50, %v7322_v50  ;;  %v260_v0 = vmul.f32 0.0078125, %v148_v29 }
  0xf8   :  { %v387_v30 = vmul.f32 %v7325_v28, %v7325_v28  ;;  %v261_v26 = vmul.f32 0.0078125, %v150_v19 }
  0xf9   :  { %464 = vadd.xlane.f32.xlu0 %v386_v60  ;;  %562 = vadd.xlane.f32.xlu1 %v435_v24  ;;  %v7332_v27 = vsub.f32 %v7117_v32, %v260_v0  ;;  %v7344_v24 = vld [vmem:[#allocation2 + $0x118] sm:$0xff]  ;;  %v7352_v0 = vld [vmem:[#allocation2 + $0x120] sm:$0xff] }
  0xfa   :  { %v152_v51 = vpop.xlane.xlu0 %151  ;;  %v7340_v52 = vsub.f32 %v7119_v33, %v261_v26 }
  0xfb   :  { %v388_v57 = vmul.f32 %v7332_v27, %v7332_v27  ;;  %v262_v25 = vmul.f32 0.0078125, %v152_v51  ;;  %v154_v32 = vpop.xlane.xlu1 %153 }
  0xfc   :  { %v389_v19 = vmul.f32 %v7340_v52, %v7340_v52  ;;  %v263_v60 = vmul.f32 0.0078125, %v154_v32 }
  0xfd   :  { %183 = vadd.xlane.f32.xlu0 %v7336_v31  ;;  %466 = vadd.xlane.f32.xlu1 %v387_v30  ;;  %v7348_v29 = vsub.f32 %v7123_v34, %v262_v25  ;;  %v5899_v25 = vld [vmem:[#allocation5 + $0xc] ss:$20 sps:$4 sm:$0xff]  }
  0xfe   :  { %v156_v33 = vpop.xlane.xlu0 %155  ;;  %v7356_v30 = vsub.f32 %v7125_v35, %v263_v60  ;;  %1603 = vmatprep.subr.bf16.mxu1 %v5899_v25  ;;  %v7368_v60 = vld [vmem:[#allocation2 + $0x130] sm:$0xff] }
  0xff   :  { %8678 = vst [vmem:[#allocation15_spill] sm:$0xff] %v7348_v29  ;;  %v390_v26 = vmul.f32 %v7348_v29, %v7348_v29  ;;  %v264_v51 = vmul.f32 0.0078125, %v156_v33  ;;  %v158_v34 = vpop.xlane.xlu1 %157  ;;  %v7376_v29 = vld [vmem:[#allocation2 + $0x138] sm:$0xff] }
 0x100   :  { %8679 = vst [vmem:[#allocation16_spill] sm:$0xff] %v7356_v30  ;;  %v265_v35 = vmul.f32 0.0078125, %v158_v34 }
 0x101   :  { %468 = vadd.xlane.f32.xlu0 %v388_v57  ;;  %185 = vadd.xlane.f32.xlu1 %v7344_v24  ;;  %v7360_v57 = vld [vmem:[#allocation2 + $0x128] sm:$0xff]  ;;  %v7364_v32 = vsub.f32 %v7129_v36, %v264_v51 }
 0x102   :  { %v160_v7 = vpop.xlane.xlu0 %159  ;;  %v7372_v33 = vsub.f32 %v7131_v37, %v265_v35 }
 0x103   :  { %8680 = vst [vmem:[#allocation17_spill] sm:$0xff] %v7364_v32  ;;  %v266_v25 = vmul.f32 0.0078125, %v160_v7  ;;  %v162_v36 = vpop.xlane.xlu1 %161 }
 0x104   :  { %8681 = vst [vmem:[#allocation18_spill] sm:$0xff] %v7372_v33  ;;  %v393_v34 = vmul.f32 %v7372_v33, %v7372_v33  ;;  %v7400_v33 = vld [vmem:[#allocation2 + $0x150] sm:$0xff] }
 0x105   :  { %187 = vadd.xlane.f32.xlu0 %v7352_v0  ;;  %470 = vadd.xlane.f32.xlu1 %v389_v19  ;;  %v391_v19 = vmul.f32 %v7356_v30, %v7356_v30  ;;  %v7380_v51 = vsub.f32 %v7135_v38, %v266_v25  ;;  %v7384_v30 = vld [vmem:[#allocation2 + $0x140] sm:$0xff]  ;;  %8686 = vst [vmem:[#allocation23_spill] sm:$0xff] %v7400_v33 }
 0x106   :  { %v164_v37 = vpop.xlane.xlu0 %163 }
 0x107   :  { %8682 = vst [vmem:[#allocation19_spill] sm:$0xff] %v7380_v51  ;;  %v394_v35 = vmul.f32 %v7380_v51, %v7380_v51  ;;  %v166_v38 = vpop.xlane.xlu1 %165  ;;  %v94_v51 = vld [vmem:[#allocation2 + $0x158] sm:$0xff] }
 0x109   :  { %472 = vadd.xlane.f32.xlu0 %v390_v26  ;;  %189 = vadd.xlane.f32.xlu1 %v7360_v57  ;;  %v392_v26 = vmul.f32 %v7364_v32, %v7364_v32  ;;  %v7392_v32 = vld [vmem:[#allocation2 + $0x148] sm:$0xff] }
 0x10a   :  { %8684 = vst [vmem:[#allocation21_spill] sm:$0xff] %v7392_v32 }
 0x10d   :  { %191 = vadd.xlane.f32.xlu0 %v7368_v60  ;;  %474 = vadd.xlane.f32.xlu1 %v391_v19  ;;  %v267_v19 = vmul.f32 0.0078125, %v162_v36 }
 0x10f   :  { %v7388_v7 = vsub.f32 %v7137_v39, %v267_v19  ;;  %v168_v39 = vpop.xlane.xlu0 %167 }
 0x111   :  { %476 = vadd.xlane.f32.xlu0 %v392_v26  ;;  %193 = vadd.xlane.f32.xlu1 %v7376_v29  ;;  %8683 = vst [vmem:[#allocation20_spill] sm:$0xff] %v7388_v7  ;;  %v268_v26 = vmul.f32 0.0078125, %v164_v37  ;;  %v395_v36 = vmul.f32 %v7388_v7, %v7388_v7 }
 0x113   :  { %v7396_v25 = vsub.f32 %v7141_v40, %v268_v26  ;;  %v170_v40 = vpop.xlane.xlu1 %169  ;;  %v172_v26 = vpop.xlane.xlu0 %171 }
 0x115   :  { %195 = vadd.xlane.f32.xlu0 %v7384_v30  ;;  %478 = vadd.xlane.f32.xlu1 %v393_v34  ;;  %8685 = vst [vmem:[#allocation22_spill] sm:$0xff] %v7396_v25  ;;  %v269_v34 = vmul.f32 0.0078125, %v166_v38  ;;  %v396_v37 = vmul.f32 %v7396_v25, %v7396_v25 }
 0x117   :  { %v7404_v19 = vsub.f32 %v7143_v41, %v269_v34  ;;  %v176_v41 = vpop.xlane.xlu0 %175 }
 0x119   :  { %480 = vadd.xlane.f32.xlu0 %v394_v35  ;;  %197 = vadd.xlane.f32.xlu1 %v7392_v32  ;;  %8687 = vst [vmem:[#allocation24_spill] sm:$0xff] %v7404_v19  ;;  %v270_v35 = vmul.f32 0.0078125, %v168_v39  ;;  %v397_v7 = vmul.f32 %v7404_v19, %v7404_v19  ;;  %v174_v32 = vpop.xlane.xlu1 %173 }
 0x11a   :  { %v273_v25 = vmul.f32 0.0078125, %v174_v32 }
 0x11b   :  { %v7409_v38 = vsub.f32 %v7147_v42, %v270_v35  ;;  %v180_v19 = vpop.xlane.xlu0 %179 }
 0x11d   :  { %199 = vadd.xlane.f32.xlu0 %v7400_v33  ;;  %482 = vadd.xlane.f32.xlu1 %v395_v36  ;;  %8688 = vst [vmem:[#allocation25_spill] sm:$0xff] %v7409_v38  ;;  %v271_v33 = vmul.f32 0.0078125, %v170_v40  ;;  %v95_v36 = vld [vmem:[#allocation2 + $0x160] sm:$0xff]  ;;  %v398_v39 = vmul.f32 %v7409_v38, %v7409_v38  ;;  %v178_v42 = vpop.xlane.xlu1 %177 }
 0x11f   :  { %v7414_v34 = vsub.f32 %v7149_v43, %v271_v33  ;;  %v7424_v43 = vsub.f32 %v7155_v45, %v273_v25 }
 0x121   :  { %484 = vadd.xlane.f32.xlu0 %v396_v37  ;;  %201 = vadd.xlane.f32.xlu1 %v94_v51  ;;  %8689 = vst [vmem:[#allocation26_spill] sm:$0xff] %v7414_v34  ;;  %v272_v37 = vmul.f32 0.0078125, %v172_v26  ;;  %v96_v51 = vld [vmem:[#allocation2 + $0x168] sm:$0xff]  ;;  %v399_v40 = vmul.f32 %v7414_v34, %v7414_v34  ;;  %8691 = vst [vmem:[#allocation28_spill] sm:$0xff] %v7424_v43  ;;  %v276_v26 = vmul.f32 0.0078125, %v180_v19 }
 0x122   :  { %v5902_v34 = vld [vmem:[#allocation5 + $0x34] ss:$20 sps:$4 sm:$0xff]  }
 0x123   :  { %v7419_v35 = vsub.f32 %v7153_v44, %v272_v37  ;;  %v275_v44 = vmul.f32 0.0078125, %v178_v42  ;;  %v182_v37 = vpop.xlane.xlu1 %181  ;;  %v7434_v45 = vsub.f32 %v7165_v48, %v276_v26 }
 0x125   :  { %203 = vadd.xlane.f32.xlu0 %v95_v36  ;;  %486 = vadd.xlane.f32.xlu1 %v397_v7  ;;  %8690 = vst [vmem:[#allocation27_spill] sm:$0xff] %v7419_v35  ;;  %v274_v36 = vmul.f32 0.0078125, %v176_v41  ;;  %v97_v7 = vld [vmem:[#allocation2 + $0x170] sm:$0xff]  ;;  %v400_v32 = vmul.f32 %v7419_v35, %v7419_v35  ;;  %v401_v41 = vmul.f32 %v7424_v43, %v7424_v43  ;;  %8693 = vst [vmem:[#allocation30_spill] sm:$0xff] %v7434_v45 }
 0x126   :  { %v7437_v25 = vsub.f32 %v7161_v47, %v275_v44  ;;  %v404_v42 = vmul.f32 %v7434_v45, %v7434_v45 }
 0x127   :  { %v7427_v33 = vsub.f32 %v7159_v46, %v274_v36 }
 0x128   :  { %8694 = vst [vmem:[#allocation31_spill] sm:$0xff] %v7437_v25  ;;  %v403_v48 = vmul.f32 %v7437_v25, %v7437_v25 }
 0x129   :  { %488 = vadd.xlane.f32.xlu0 %v398_v39  ;;  %205 = vadd.xlane.f32.xlu1 %v96_v51  ;;  %8692 = vst [vmem:[#allocation29_spill] sm:$0xff] %v7427_v33  ;;  %v98_v39 = vld [vmem:[#allocation2 + $0x178] sm:$0xff]  ;;  %v402_v46 = vmul.f32 %v7427_v33, %v7427_v33  ;;  %v277_v51 = vmul.f32 0.0078125, %v182_v37 }
 0x12b   :  { %v7444_v19 = vsub.f32 %v7167_v49, %v277_v51 }
 0x12d   :  { %207 = vadd.xlane.f32.xlu0 %v97_v7  ;;  %490 = vadd.xlane.f32.xlu1 %v399_v40  ;;  %v7441_v40 = vld [vmem:[#allocation5 + $0x10] ss:$20 sps:$4 sm:$0xff]   ;;  %8695 = vst [vmem:[#allocation32_spill] sm:$0xff] %v7444_v19  ;;  %v405_v47 = vmul.f32 %v7444_v19, %v7444_v19 }
 0x12e   :  { %5765 = vmatprep.subr.bf16.mxu0 %v7441_v40 }
 0x131   :  { %492 = vadd.xlane.f32.xlu0 %v400_v32  ;;  %209 = vadd.xlane.f32.xlu1 %v98_v39 }
 0x135   :  { %496 = vadd.xlane.f32.xlu0 %v402_v46  ;;  %494 = vadd.xlane.f32.xlu1 %v401_v41 }
 0x139   :  { %500 = vadd.xlane.f32.xlu0 %v404_v42  ;;  %498 = vadd.xlane.f32.xlu1 %v403_v48 }
 0x13d   :  { %502 = vadd.xlane.f32.xlu1 %v405_v47 }
 0x14a   :  { %v533_v36 = vpop.xlane.xlu0 %532 }
 0x14b   :  { %v612_v7 = vmul.f32 0.0078125, %v533_v36 }
 0x14d   :  { %v676_v32 = vadd.f32 1e-05, %v612_v7 }
 0x14e   :  { %v437_v26 = vpop.xlane.xlu0 %436  ;;  %v535_v49 = vpop.xlane.xlu1 %534 }
 0x14f   :  { %5929 = vrsqrt.f32 %v676_v32  ;;  %v564_v44 = vmul.f32 0.0078125, %v437_v26  ;;  %v613_v39 = vmul.f32 0.0078125, %v535_v49 }
 0x151   :  { %v628_v37 = vadd.f32 1e-05, %v564_v44  ;;  %v677_v41 = vadd.f32 1e-05, %v613_v39 }
 0x152   :  { %v537_v46 = vpop.xlane.xlu0 %536  ;;  %v439_v51 = vpop.xlane.xlu1 %438 }
 0x153   :  { %5931 = vrsqrt.f32 %v628_v37  ;;  %v614_v45 = vmul.f32 0.0078125, %v537_v46  ;;  %v565_v42 = vmul.f32 0.0078125, %v439_v51 }
 0x154   :  { %5933 = vrsqrt.f32 %v677_v41 }
 0x155   :  { %v678_v48 = vadd.f32 1e-05, %v614_v45  ;;  %v629_v33 = vadd.f32 1e-05, %v565_v42  ;;  %v7457_v45 = vld [vmem:[%s8648_s1] ss:$0 sm:$0xff] }
 0x156   :  { %v441_v19 = vpop.xlane.xlu0 %440  ;;  %v539_v47 = vpop.xlane.xlu1 %538 }
 0x157   :  { %5935 = vrsqrt.f32 %v678_v48  ;;  %v566_v36 = vmul.f32 0.0078125, %v441_v19  ;;  %v615_v7 = vmul.f32 0.0078125, %v539_v47 }
 0x158   :  { %5937 = vrsqrt.f32 %v629_v33 }
 0x159   :  { %v5930_v25 = vpop.eup %5929  ;;  %v630_v32 = vadd.f32 1e-05, %v566_v36  ;;  %v679_v26 = vadd.f32 1e-05, %v615_v7  ;;  %v7464_v7 = vld [vmem:[%s8649_s2] ss:$0 sm:$0xff] }
 0x15a   :  { %v541_v49 = vpop.xlane.xlu0 %540  ;;  %v443_v44 = vpop.xlane.xlu1 %442  ;;  %v804_v39 = vmul.f32 %v5930_v25, %v7172_v54 }
 0x15b   :  { %5939 = vrsqrt.f32 %v630_v32  ;;  %v616_v37 = vmul.f32 0.0078125, %v541_v49  ;;  %v567_v46 = vmul.f32 0.0078125, %v443_v44 }
 0x15c   :  { %5941 = vrsqrt.f32 %v679_v26  ;;  %v875_v47 = vmul.f32 %v7457_v45, %v804_v39 }
 0x15d   :  { %v5932_v41 = vpop.eup %5931  ;;  %v680_v19 = vadd.f32 1e-05, %v616_v37  ;;  %v631_v51 = vadd.f32 1e-05, %v567_v46 }
 0x15e   :  { %v5934_v33 = vpop.eup %5933  ;;  %v445_v42 = vpop.xlane.xlu0 %444  ;;  %v756_v32 = vmul.f32 %v5932_v41, %v7175_v55 }
 0x15f   :  { %v543_v48 = vpop.xlane.xlu1 %542  ;;  %5943 = vrsqrt.f32 %v680_v19  ;;  %v568_v36 = vmul.f32 0.0078125, %v445_v42  ;;  %v805_v25 = vmul.f32 %v5934_v33, %v7180_v61  ;;  %v946_v42 = vadd.f32 %v7464_v7, %v875_v47 }
 0x160   :  { %v617_v54 = vmul.f32 0.0078125, %v543_v48  ;;  %5945 = vrsqrt.f32 %v631_v51  ;;  %v827_v41 = vmul.f32 %v7457_v45, %v756_v32  ;;  %v5897_v51 = vld [vmem:[#allocation5 + $0x8] ss:$20 sps:$4 sm:$0xff]  }
 0x161   :  { %v5936_v26 = vpop.eup %5935  ;;  %v632_v49 = vadd.f32 1e-05, %v568_v36  ;;  %v876_v37 = vmul.f32 %v7457_v45, %v805_v25 }
 0x162   :  { %v681_v44 = vadd.f32 1e-05, %v617_v54  ;;  %v5938_v46 = vpop.eup %5937  ;;  %v545_v39 = vpop.xlane.xlu0 %544  ;;  %v806_v61 = vmul.f32 %v5936_v26, %v7190_v2 }
 0x163   :  { %v447_v19 = vpop.xlane.xlu1 %446  ;;  %5947 = vrsqrt.f32 %v632_v49  ;;  %v618_v33 = vmul.f32 0.0078125, %v545_v39  ;;  %v947_v43 = vadd.f32 %v7464_v7, %v876_v37  ;;  %v757_v55 = vmul.f32 %v5938_v46, %v7185_v63 }
 0x164   :  { %v569_v48 = vmul.f32 0.0078125, %v447_v19  ;;  %5949 = vrsqrt.f32 %v681_v44  ;;  %v877_v49 = vmul.f32 %v7457_v45, %v806_v61  ;;  %v898_v37 = vadd.f32 %v7464_v7, %v827_v41  ;;  %v5900_v19 = vld [vmem:[#allocation5 + $0x30] ss:$20 sps:$4 sm:$0xff]  }
 0x165   :  { %v5940_v36 = vpop.eup %5939  ;;  %v682_v54 = vadd.f32 1e-05, %v618_v33  ;;  %v7473_v35 = vpack.c.bf16 %v947_v43, %v946_v42  ;;  %v828_v26 = vmul.f32 %v7457_v45, %v757_v55  ;;  %v8697_v46 = vmov 0  }
 0x166   :  { %v633_v25 = vadd.f32 1e-05, %v569_v48  ;;  %v5942_v47 = vpop.eup %5941  ;;  %v449_v38 = vpop.xlane.xlu0 %448  ;;  %v758_v39 = vmul.f32 %v5940_v36, %v7200_v4  ;;  %v5905_v48 = vld [vmem:[#allocation5 + $0x5c] ss:$20 sps:$4 sm:$0xff]  }
 0x167   :  { %8696 = vst [vmem:[#allocation33_spill] sm:$0xff] %v7473_v35  ;;  %v547_v2 = vpop.xlane.xlu1 %546  ;;  %5951 = vrsqrt.f32 %v682_v54  ;;  %v570_v44 = vmul.f32 0.0078125, %v449_v38  ;;  %1523 = vmatmul.mubr.bf16.vlgmr.msra.gmra.mrb[0].mxu1 %v7473_v35  ;;  %v807_v32 = vmul.f32 %v5942_v47, %v7195_v58  ;;  %v899_v43 = vadd.f32 %v7464_v7, %v828_v26 }
 0x168   :  { %v619_v63 = vmul.f32 0.0078125, %v547_v2  ;;  %5953 = vrsqrt.f32 %v633_v25  ;;  %1532 = vmatprep.mubr.bf16.mxu1 %v8697_v46  ;;  %1604 = vmatpush1.bf16.msra.mxu1 %v5897_v51  ;;  %v948_v25 = vadd.f32 %v7464_v7, %v877_v49  ;;  %v5922_v2 = vld [vmem:[#allocation5 + $0x38] ss:$20 sps:$4 sm:$0xff]   ;;  %v829_v26 = vmul.f32 %v7457_v45, %v758_v39 }
 0x169   :  { %v5944_v42 = vpop.eup %5943  ;;  %v634_v61 = vadd.f32 1e-05, %v570_v44  ;;  %v878_v38 = vmul.f32 %v7457_v45, %v807_v32  ;;  %1605 = vmatprep.subr.bf16.mxu1 %v5902_v34  ;;  %v7484_v54 = vpack.c.bf16 %v899_v43, %v898_v37  ;;  %v5903_v44 = vld [vmem:[#allocation5 + $0x58] ss:$20 sps:$4 sm:$0xff]  }
 0x16a   :  { %v683_v33 = vadd.f32 1e-05, %v619_v63  ;;  %v5946_v55 = vpop.eup %5945  ;;  %v549_v58 = vpop.xlane.xlu0 %548  ;;  %v808_v47 = vmul.f32 %v5944_v42, %v7210_v3  ;;  %v5908_v3 = vld [vmem:[#allocation5 + $0x84] ss:$20 sps:$4 sm:$0xff]  }
 0x16b   :  { %v451_v41 = vpop.xlane.xlu1 %450  ;;  %5955 = vrsqrt.f32 %v634_v61  ;;  %v620_v4 = vmul.f32 0.0078125, %v549_v58  ;;  %v949_v36 = vadd.f32 %v7464_v7, %v878_v38  ;;  %1283 = vmatmul.mubr.bf16.vlgmr.msra.gmra.mrb[0].mxu0 %v7484_v54  ;;  %v759_v34 = vmul.f32 %v5946_v55, %v7205_v5  ;;  %v5923_v55 = vld [vmem:[#allocation5 + $0x60] ss:$20 sps:$4 sm:$0xff]  }
 0x16c   :  { %v571_v51 = vmul.f32 0.0078125, %v451_v41  ;;  %5957 = vrsqrt.f32 %v683_v33  ;;  %1606 = vmatpush1.bf16.msra.mxu1 %v5900_v19  ;;  %1292 = vmatprep.mubr.bf16.mxu0 %v8697_v46  ;;  %v879_v5 = vmul.f32 %v7457_v45, %v808_v47 }
 0x16d   :  { %v5948_v63 = vpop.eup %5947  ;;  %v684_v32 = vadd.f32 1e-05, %v620_v4  ;;  %v7492_v37 = vpack.c.bf16 %v949_v36, %v948_v25  ;;  %1607 = vmatprep.subr.bf16.mxu1 %v5905_v48  ;;  %v830_v33 = vmul.f32 %v7457_v45, %v759_v34  ;;  %5766 = vmatpush3.bf16.msra.mxu0 %v7441_v40  ;;  %v900_v48 = vadd.f32 %v7464_v7, %v829_v26  ;;  %v5906_v40 = vld [vmem:[#allocation5 + $0x80] ss:$20 sps:$4 sm:$0xff]  }
 0x16e   :  { %v635_v49 = vadd.f32 1e-05, %v571_v51  ;;  %v5950_v43 = vpop.eup %5949  ;;  %v453_v42 = vpop.xlane.xlu0 %452  ;;  %5767 = vmatprep.subr.bf16.mxu0 %v5922_v2  ;;  %v760_v41 = vmul.f32 %v5948_v63, %v7220_v8 }
 0x16f   :  { %v551_v61 = vpop.xlane.xlu1 %550  ;;  %5959 = vrsqrt.f32 %v684_v32  ;;  %v572_v39 = vmul.f32 0.0078125, %v453_v42  ;;  %1533 = vmatmul.mubr.bf16.gmra.mrb[4].mxu1 %v7492_v37  ;;  %v809_v38 = vmul.f32 %v5950_v43, %v7215_v59  ;;  %v901_v58 = vadd.f32 %v7464_v7, %v830_v33  ;;  %v5911_v59 = vld [vmem:[#allocation5 + $0xac] ss:$20 sps:$4 sm:$0xff]  }
 0x170   :  { %v621_v19 = vmul.f32 0.0078125, %v551_v61  ;;  %5961 = vrsqrt.f32 %v635_v49  ;;  %1542 = vmatprep.mubr.bf16.mxu1 %v8697_v46  ;;  %1608 = vmatpush1.bf16.msra.mxu1 %v5903_v44  ;;  %v950_v49 = vadd.f32 %v7464_v7, %v879_v5  ;;  %v831_v42 = vmul.f32 %v7457_v45, %v760_v41  ;;  %v5909_v61 = vld [vmem:[#allocation5 + $0xa8] ss:$20 sps:$4 sm:$0xff]  }
 0x171   :  { %v5952_v25 = vpop.eup %5951  ;;  %v636_v47 = vadd.f32 1e-05, %v572_v39  ;;  %v880_v51 = vmul.f32 %v7457_v45, %v809_v38  ;;  %1609 = vmatprep.subr.bf16.mxu1 %v5908_v3  ;;  %v7505_v32 = vpack.c.bf16 %v901_v58, %v900_v48  ;;  %5768 = vmatpush3.bf16.msra.mxu0 %v5922_v2  ;;  %v5914_v2 = vld [vmem:[#allocation5 + $0xd4] ss:$20 sps:$4 sm:$0xff]  }
 0x172   :  { %v685_v4 = vadd.f32 1e-05, %v621_v19  ;;  %v5954_v36 = vpop.eup %5953  ;;  %v553_v34 = vpop.xlane.xlu0 %552  ;;  %v810_v43 = vmul.f32 %v5952_v25, %v7230_v10  ;;  %5769 = vmatprep.subr.bf16.mxu0 %v5923_v55 }
 0x173   :  { %v455_v26 = vpop.xlane.xlu1 %454  ;;  %5963 = vrsqrt.f32 %v636_v47  ;;  %v622_v8 = vmul.f32 0.0078125, %v553_v34  ;;  %v951_v63 = vadd.f32 %v7464_v7, %v880_v51  ;;  %1293 = vmatmul.mubr.bf16.gmra.mrb[4].mxu0 %v7505_v32  ;;  %v761_v3 = vmul.f32 %v5954_v36, %v7225_v53  ;;  %v5924_v36 = vld [vmem:[#allocation5 + $0x88] ss:$20 sps:$4 sm:$0xff]  }
 0x174   :  { %v573_v44 = vmul.f32 0.0078125, %v455_v26  ;;  %5965 = vrsqrt.f32 %v685_v4  ;;  %1610 = vmatpush1.bf16.msra.mxu1 %v5906_v40  ;;  %1302 = vmatprep.mubr.bf16.mxu0 %v8697_v46  ;;  %v881_v53 = vmul.f32 %v7457_v45, %v810_v43  ;;  %v902_v47 = vadd.f32 %v7464_v7, %v831_v42  ;;  %v5917_v43 = vld [vmem:[#allocation5 + $0xfc] ss:$20 sps:$4 sm:$0xff]  }
 0x175   :  { %v5956_v33 = vpop.eup %5955  ;;  %v686_v5 = vadd.f32 1e-05, %v622_v8  ;;  %v7513_v10 = vpack.c.bf16 %v951_v63, %v950_v49  ;;  %1611 = vmatprep.subr.bf16.mxu1 %v5911_v59  ;;  %v832_v58 = vmul.f32 %v7457_v45, %v761_v3  ;;  %5770 = vmatpush3.bf16.msra.mxu0 %v5923_v55  ;;  %v5912_v59 = vld [vmem:[#allocation5 + $0xd0] ss:$20 sps:$4 sm:$0xff]  }
 0x176   :  { %v637_v39 = vadd.f32 1e-05, %v573_v44  ;;  %v5958_v19 = vpop.eup %5957  ;;  %v457_v38 = vpop.xlane.xlu0 %456  ;;  %v762_v51 = vmul.f32 %v5956_v33, %v7240_v12  ;;  %v952_v3 = vadd.f32 %v7464_v7, %v881_v53  ;;  %5771 = vmatprep.subr.bf16.mxu0 %v5924_v36 }
 0x177   :  { %8698 = vst [vmem:[#allocation34_spill] sm:$0xff] %v7513_v10  ;;  %v555_v48 = vpop.xlane.xlu1 %554  ;;  %5967 = vrsqrt.f32 %v686_v5  ;;  %v574_v41 = vmul.f32 0.0078125, %v457_v38  ;;  %1543 = vmatmul.mubr.bf16.gmra.mrb[8].mxu1 %v7513_v10  ;;  %v811_v25 = vmul.f32 %v5958_v19, %v7235_v6  ;;  %v903_v4 = vadd.f32 %v7464_v7, %v832_v58  ;;  %v5920_v58 = vld [vmem:[#allocation5 + $0x124] ss:$20 sps:$4 sm:$0xff]  }
 0x178   :  { %v623_v40 = vmul.f32 0.0078125, %v555_v48  ;;  %5969 = vrsqrt.f32 %v637_v39  ;;  %1552 = vmatprep.mubr.bf16.mxu1 %v8697_v46  ;;  %1612 = vmatpush1.bf16.msra.mxu1 %v5909_v61  ;;  %v833_v39 = vmul.f32 %v7457_v45, %v762_v51 }
 0x179   :  { %v5960_v55 = vpop.eup %5959  ;;  %v638_v34 = vadd.f32 1e-05, %v574_v41  ;;  %v882_v49 = vmul.f32 %v7457_v45, %v811_v25  ;;  %1613 = vmatprep.subr.bf16.mxu1 %v5914_v2  ;;  %v7525_v44 = vpack.c.bf16 %v903_v4, %v902_v47  ;;  %5772 = vmatpush3.bf16.msra.mxu0 %v5924_v36  ;;  %v5915_v2 = vld [vmem:[#allocation5 + $0xf8] ss:$20 sps:$4 sm:$0xff]  }
 0x17a   :  { %v687_v26 = vadd.f32 1e-05, %v623_v40  ;;  %v5962_v6 = vpop.eup %5961  ;;  %v557_v8 = vpop.xlane.xlu0 %556  ;;  %v812_v42 = vmul.f32 %v5960_v55, %v7250_v14 }
 0x17b   :  { %v459_v63 = vpop.xlane.xlu1 %458  ;;  %5971 = vrsqrt.f32 %v638_v34  ;;  %v624_v12 = vmul.f32 0.0078125, %v557_v8  ;;  %v953_v33 = vadd.f32 %v7464_v7, %v882_v49  ;;  %1303 = vmatmul.mubr.bf16.gmra.mrb[8].mxu0 %v7525_v44  ;;  %v763_v5 = vmul.f32 %v5962_v6, %v7245_v9  ;;  %v5918_v34 = vld [vmem:[#allocation5 + $0x120] ss:$20 sps:$4 sm:$0xff]  }
 0x17c   :  { %v575_v61 = vmul.f32 0.0078125, %v459_v63  ;;  %5973 = vrsqrt.f32 %v687_v26  ;;  %1614 = vmatpush1.bf16.msra.mxu1 %v5912_v59  ;;  %1312 = vmatprep.mubr.bf16.mxu0 %v8697_v46  ;;  %v883_v9 = vmul.f32 %v7457_v45, %v812_v42  ;;  %v904_v59 = vadd.f32 %v7464_v7, %v833_v39 }
 0x17d   :  { %v5964_v19 = vpop.eup %5963  ;;  %v688_v38 = vadd.f32 1e-05, %v624_v12  ;;  %v7533_v14 = vpack.c.bf16 %v953_v33, %v952_v3  ;;  %1615 = vmatprep.subr.bf16.mxu1 %v5917_v43  ;;  %v834_v25 = vmul.f32 %v7457_v45, %v763_v5 }
 0x17e   :  { %v639_v48 = vadd.f32 1e-05, %v575_v61  ;;  %v5966_v53 = vpop.eup %5965  ;;  %v461_v41 = vpop.xlane.xlu0 %460  ;;  %v764_v55 = vmul.f32 %v5964_v19, %v7260_v16  ;;  %v954_v42 = vadd.f32 %v7464_v7, %v883_v9 }
 0x17f   :  { %v559_v40 = vpop.xlane.xlu1 %558  ;;  %5975 = vrsqrt.f32 %v688_v38  ;;  %v576_v47 = vmul.f32 0.0078125, %v461_v41  ;;  %1553 = vmatmul.mubr.bf16.gmra.mrb[12].mxu1 %v7533_v14  ;;  %v813_v51 = vmul.f32 %v5966_v53, %v7255_v11  ;;  %v905_v36 = vadd.f32 %v7464_v7, %v834_v25 }
 0x180   :  { %v625_v4 = vmul.f32 0.0078125, %v559_v40  ;;  %5977 = vrsqrt.f32 %v639_v48  ;;  %1562 = vmatprep.mubr.bf16.mxu1 %v8697_v46  ;;  %1616 = vmatpush1.bf16.msra.mxu1 %v5915_v2  ;;  %v835_v39 = vmul.f32 %v7457_v45, %v764_v55 }
 0x181   :  { %v5968_v26 = vpop.eup %5967  ;;  %v640_v49 = vadd.f32 1e-05, %v576_v47  ;;  %v884_v6 = vmul.f32 %v7457_v45, %v813_v51  ;;  %1617 = vmatprep.subr.bf16.mxu1 %v5920_v58  ;;  %v7545_v11 = vpack.c.bf16 %v905_v36, %v904_v59 }
 0x182   :  { %v689_v43 = vadd.f32 1e-05, %v625_v4  ;;  %v5970_v8 = vpop.eup %5969  ;;  %v561_v63 = vpop.xlane.xlu0 %560  ;;  %v814_v12 = vmul.f32 %v5968_v26, %v7270_v18  ;;  %v906_v47 = vadd.f32 %v7464_v7, %v835_v39 }
 0x183   :  { %v463_v3 = vpop.xlane.xlu1 %462  ;;  %5979 = vrsqrt.f32 %v640_v49  ;;  %v626_v61 = vmul.f32 0.0078125, %v561_v63  ;;  %v955_v33 = vadd.f32 %v7464_v7, %v884_v6  ;;  %1313 = vmatmul.mubr.bf16.gmra.mrb[12].mxu0 %v7545_v11  ;;  %v765_v5 = vmul.f32 %v5970_v8, %v7265_v13 }
 0x184   :  { %v577_v16 = vmul.f32 0.0078125, %v463_v3  ;;  %5981 = vrsqrt.f32 %v689_v43  ;;  %1618 = vmatpush1.bf16.msra.mxu1 %v5918_v34  ;;  %1322 = vmatprep.mubr.bf16.mxu0 %v8697_v46  ;;  %v885_v40 = vmul.f32 %v7457_v45, %v814_v12 }
 0x185   :  { %v5972_v2 = vpop.eup %5971  ;;  %v690_v19 = vadd.f32 1e-05, %v626_v61  ;;  %v7553_v48 = vpack.c.bf16 %v955_v33, %v954_v42  ;;  %v836_v41 = vmul.f32 %v7457_v45, %v765_v5 }
 0x186   :  { %v641_v38 = vadd.f32 1e-05, %v577_v16  ;;  %v5974_v18 = vpop.eup %5973  ;;  %v465_v58 = vpop.xlane.xlu0 %464  ;;  %v766_v51 = vmul.f32 %v5972_v2, %v7280_v20 }
 0x187   :  { %v563_v53 = vpop.xlane.xlu1 %562  ;;  %5983 = vrsqrt.f32 %v690_v19  ;;  %v578_v25 = vmul.f32 0.0078125, %v465_v58  ;;  %1563 = vmatmul.mubr.bf16.gmra.mrb[16].mxu1 %v7553_v48  ;;  %v815_v9 = vmul.f32 %v5974_v18, %v7275_v15  ;;  %v907_v4 = vadd.f32 %v7464_v7, %v836_v41 }
 0x188   :  { %v627_v13 = vmul.f32 0.0078125, %v563_v53  ;;  %5985 = vrsqrt.f32 %v641_v38  ;;  %1572 = vmatprep.mubr.bf16.mxu1 %v8697_v46  ;;  %v956_v15 = vadd.f32 %v7464_v7, %v885_v40  ;;  %v837_v12 = vmul.f32 %v7457_v45, %v766_v51 }
 0x189   :  { %v5976_v59 = vpop.eup %5975  ;;  %v642_v36 = vadd.f32 1e-05, %v578_v25  ;;  %v886_v34 = vmul.f32 %v7457_v45, %v815_v9  ;;  %v7565_v43 = vpack.c.bf16 %v907_v4, %v906_v47  ;;  %v5925_v25 = vld [vmem:[#allocation5 + $0xb0] ss:$20 sps:$4 sm:$0xff]  }
 0x18a   :  { %v691_v55 = vadd.f32 1e-05, %v627_v13  ;;  %v5978_v26 = vpop.eup %5977  ;;  %v184_v49 = vpop.xlane.xlu0 %183  ;;  %v816_v8 = vmul.f32 %v5976_v59, %v7292_v22  ;;  %v908_v58 = vadd.f32 %v7464_v7, %v837_v12  ;;  %5773 = vmatprep.subr.bf16.mxu0 %v5925_v25 }
 0x18b   :  { %v467_v6 = vpop.xlane.xlu1 %466  ;;  %5987 = vrsqrt.f32 %v642_v36  ;;  %v278_v63 = vmul.f32 0.0078125, %v184_v49  ;;  %v957_v42 = vadd.f32 %v7464_v7, %v886_v34  ;;  %1323 = vmatmul.mubr.bf16.gmra.mrb[16].mxu0 %v7565_v43  ;;  %v767_v20 = vmul.f32 %v5978_v26, %v7285_v17 }
 0x18c   :  { %v579_v3 = vmul.f32 0.0078125, %v467_v6  ;;  %5989 = vrsqrt.f32 %v691_v55  ;;  %1332 = vmatprep.mubr.bf16.mxu0 %v8697_v46  ;;  %v887_v38 = vmul.f32 %v7457_v45, %v816_v8  ;;  %5774 = vmatpush3.bf16.msra.mxu0 %v5925_v25 }
 0x18d   :  { %v5980_v61 = vpop.eup %5979  ;;  %v7574_v16 = vsub.f32 %v7336_v31, %v278_v63  ;;  %v7576_v5 = vpack.c.bf16 %v957_v42, %v956_v15  ;;  %v838_v19 = vmul.f32 %v7457_v45, %v767_v20 }
 0x18e   :  { %v643_v33 = vadd.f32 1e-05, %v579_v3  ;;  %v5982_v22 = vpop.eup %5981  ;;  %v469_v39 = vpop.xlane.xlu0 %468  ;;  %v768_v40 = vmul.f32 %v5980_v61, %v7302_v21  ;;  %v958_v34 = vadd.f32 %v7464_v7, %v887_v38 }
 0x18f   :  { %v186_v2 = vpop.xlane.xlu1 %185  ;;  %v580_v17 = vmul.f32 0.0078125, %v469_v39  ;;  %1573 = vmatmul.mubr.bf16.gmra.mrb[20].mxu1 %v7576_v5  ;;  %v406_v31 = vmul.f32 %v7574_v16, %v7574_v16  ;;  %v909_v53 = vadd.f32 %v7464_v7, %v838_v19  ;;  %v817_v41 = vmul.f32 %v5982_v22, %v7297_v1 }
 0x190   :  { %5991 = vrsqrt.f32 %v643_v33  ;;  %v279_v18 = vmul.f32 0.0078125, %v186_v2  ;;  %1582 = vmatprep.mubr.bf16.mxu1 %v8697_v46  ;;  %v839_v6 = vmul.f32 %v7457_v45, %v768_v40 }
 0x191   :  { %v5984_v13 = vpop.eup %5983  ;;  %v644_v9 = vadd.f32 1e-05, %v580_v17  ;;  %504 = vadd.xlane.f32.xlu0 %v406_v31  ;;  %v7592_v59 = vpack.c.bf16 %v909_v53, %v908_v58  ;;  %v888_v55 = vmul.f32 %v7457_v45, %v817_v41 }
 0x192   :  { %v7590_v47 = vsub.f32 %v7344_v24, %v279_v18  ;;  %v5986_v4 = vpop.eup %5985  ;;  %v188_v51 = vpop.xlane.xlu0 %187  ;;  %v818_v15 = vmul.f32 %v5984_v13, %v7312_v23  ;;  %v910_v39 = vadd.f32 %v7464_v7, %v839_v6 }
 0x193   :  { %v471_v36 = vpop.xlane.xlu1 %470  ;;  %5993 = vrsqrt.f32 %v644_v9  ;;  %v280_v1 = vmul.f32 0.0078125, %v188_v51  ;;  %1333 = vmatmul.mubr.bf16.gmra.mrb[20].mxu0 %v7592_v59  ;;  %v959_v24 = vadd.f32 %v7464_v7, %v888_v55  ;;  %v769_v49 = vmul.f32 %v5986_v4, %v7307_v56 }
 0x194   :  { %v581_v21 = vmul.f32 0.0078125, %v471_v36  ;;  %v407_v26 = vmul.f32 %v7590_v47, %v7590_v47  ;;  %1342 = vmatprep.mubr.bf16.mxu0 %v8697_v46  ;;  %v889_v38 = vmul.f32 %v7457_v45, %v818_v15 }
 0x195   :  { %v5988_v8 = vpop.eup %5987  ;;  %v7604_v63 = vsub.f32 %v7352_v0, %v280_v1  ;;  %v7607_v12 = vpack.c.bf16 %v959_v24, %v958_v34  ;;  %v840_v33 = vmul.f32 %v7457_v45, %v769_v49 }
 0x196   :  { %v645_v3 = vadd.f32 1e-05, %v581_v21  ;;  %506 = vadd.xlane.f32.xlu1 %v407_v26  ;;  %v5990_v42 = vpop.eup %5989  ;;  %v473_v20 = vpop.xlane.xlu0 %472  ;;  %v770_v56 = vmul.f32 %v5988_v8, %v7322_v50  ;;  %v960_v9 = vadd.f32 %v7464_v7, %v889_v38 }
 0x197   :  { %v190_v61 = vpop.xlane.xlu1 %189  ;;  %v582_v22 = vmul.f32 0.0078125, %v473_v20  ;;  %v408_v0 = vmul.f32 %v7604_v63, %v7604_v63  ;;  %1583 = vmatmul.mubr.bf16.gmra.mrb[24].mxu1 %v7607_v12  ;;  %v911_v2 = vadd.f32 %v7464_v7, %v840_v33  ;;  %v819_v19 = vmul.f32 %v5990_v42, %v7317_v62 }
 0x198   :  { %5995 = vrsqrt.f32 %v645_v3  ;;  %v281_v23 = vmul.f32 0.0078125, %v190_v61  ;;  %1592 = vmatprep.mubr.bf16.mxu1 %v8697_v46  ;;  %v841_v62 = vmul.f32 %v7457_v45, %v770_v56 }
 0x199   :  { %v646_v18 = vadd.f32 1e-05, %v582_v22  ;;  %508 = vadd.xlane.f32.xlu0 %v408_v0  ;;  %v7622_v58 = vpack.c.bf16 %v911_v2, %v910_v39  ;;  %v890_v41 = vmul.f32 %v7457_v45, %v819_v19 }
 0x19a   :  { %v5992_v17 = vpop.eup %5991  ;;  %v7619_v50 = vsub.f32 %v7360_v57, %v281_v23  ;;  %v192_v31 = vpop.xlane.xlu0 %191  ;;  %v912_v26 = vadd.f32 %v7464_v7, %v841_v62 }
 0x19b   :  { %v475_v53 = vpop.xlane.xlu1 %474  ;;  %v771_v40 = vmul.f32 %v5992_v17, %v7325_v28  ;;  %5997 = vrsqrt.f32 %v646_v18  ;;  %v282_v25 = vmul.f32 0.0078125, %v192_v31  ;;  %1343 = vmatmul.mubr.bf16.gmra.mrb[24].mxu0 %v7622_v58  ;;  %v961_v4 = vadd.f32 %v7464_v7, %v890_v41  ;;  %v8699_v31 = vld [vmem:[#allocation15_spill] sm:$0xff] }
 0x19c   :  { %v583_v13 = vmul.f32 0.0078125, %v475_v53  ;;  %v409_v57 = vmul.f32 %v7619_v50, %v7619_v50  ;;  %1352 = vmatprep.mubr.bf16.mxu0 %v8697_v46 }
 0x19d   :  { %v842_v51 = vmul.f32 %v7457_v45, %v771_v40  ;;  %v5994_v36 = vpop.eup %5993  ;;  %v7634_v55 = vsub.f32 %v7368_v60, %v282_v25  ;;  %v7637_v1 = vpack.c.bf16 %v961_v4, %v960_v9 }
 0x19e   :  { %v647_v28 = vadd.f32 1e-05, %v583_v13  ;;  %510 = vadd.xlane.f32.xlu1 %v409_v57  ;;  %v477_v34 = vpop.xlane.xlu0 %476  ;;  %v772_v49 = vmul.f32 %v5994_v36, %v7332_v27  ;;  %v8700_v57 = vld [vmem:[#allocation21_spill] sm:$0xff]  ;;  %v8701_v36 = vld [vmem:[#allocation16_spill] sm:$0xff] }
 0x19f   :  { %v194_v21 = vpop.xlane.xlu1 %193  ;;  %v913_v24 = vadd.f32 %v7464_v7, %v842_v51  ;;  %v584_v6 = vmul.f32 0.0078125, %v477_v34  ;;  %v410_v60 = vmul.f32 %v7634_v55, %v7634_v55  ;;  %1593 = vmatmul.mubr.bf16.gmra.mrb[28].mxu1 %v7637_v1 }
 0x1a0   :  { %5999 = vrsqrt.f32 %v647_v28  ;;  %v283_v15 = vmul.f32 0.0078125, %v194_v21  ;;  %1635 = vmatprep.mubr.bf16.mxu1 %v8697_v46  ;;  %v843_v56 = vmul.f32 %v7457_v45, %v772_v49  ;;  %v5926_v49 = vld [vmem:[#allocation5 + $0xd8] ss:$20 sps:$4 sm:$0xff]  }
 0x1a1   :  { %v7645_v8 = vpack.c.bf16 %v913_v24, %v912_v26  ;;  %v648_v42 = vadd.f32 1e-05, %v584_v6  ;;  %512 = vadd.xlane.f32.xlu0 %v410_v60  ;;  %v8702_v60 = vld [vmem:[#allocation23_spill] sm:$0xff]  ;;  %5775 = vmatprep.subr.bf16.mxu0 %v5926_v49 }
 0x1a2   :  { %v5996_v3 = vpop.eup %5995  ;;  %v7648_v20 = vsub.f32 %v7376_v29, %v283_v15  ;;  %v196_v61 = vpop.xlane.xlu0 %195  ;;  %v914_v17 = vadd.f32 %v7464_v7, %v843_v56  ;;  %5776 = vmatpush3.bf16.msra.mxu0 %v5926_v49 }
 0x1a3   :  { %v479_v27 = vpop.xlane.xlu1 %478  ;;  %v773_v33 = vmul.f32 %v5996_v3, %v7340_v52  ;;  %6001 = vrsqrt.f32 %v648_v42  ;;  %v284_v22 = vmul.f32 0.0078125, %v196_v61  ;;  %1353 = vmatmul.mubr.bf16.gmra.mrb[28].mxu0 %v7645_v8 }
 0x1a4   :  { %v585_v23 = vmul.f32 0.0078125, %v479_v27  ;;  %v411_v0 = vmul.f32 %v7648_v20, %v7648_v20  ;;  %1362 = vmatprep.mubr.bf16.mxu0 %v8697_v46 }
 0x1a5   :  { %v844_v29 = vmul.f32 %v7457_v45, %v773_v33  ;;  %v5998_v39 = vpop.eup %5997  ;;  %v7658_v2 = vsub.f32 %v7384_v30, %v284_v22  ;;  %v8703_v22 = vld [vmem:[#allocation17_spill] sm:$0xff] }
 0x1a6   :  { %v649_v19 = vadd.f32 1e-05, %v585_v23  ;;  %514 = vadd.xlane.f32.xlu1 %v411_v0  ;;  %v481_v52 = vpop.xlane.xlu0 %480  ;;  %v774_v53 = vmul.f32 %v5998_v39, %v8699_v31 }
 0x1a7   :  { %v198_v38 = vpop.xlane.xlu1 %197  ;;  %v915_v18 = vadd.f32 %v7464_v7, %v844_v29  ;;  %v586_v41 = vmul.f32 0.0078125, %v481_v52  ;;  %v412_v62 = vmul.f32 %v7658_v2, %v7658_v2  ;;  %1636 = vmatmul.mubr.bf16.vlgmr.msra.gmra.mrb[32].mxu1 %v7484_v54 }
 0x1a8   :  { %6003 = vrsqrt.f32 %v649_v19  ;;  %v285_v40 = vmul.f32 0.0078125, %v198_v38  ;;  %1645 = vmatprep.mubr.bf16.mxu1 %v8697_v46  ;;  %v845_v34 = vmul.f32 %v7457_v45, %v774_v53 }
 0x1a9   :  { %v7667_v30 = vpack.c.bf16 %v915_v18, %v914_v17  ;;  %v650_v13 = vadd.f32 1e-05, %v586_v41  ;;  %516 = vadd.xlane.f32.xlu0 %v412_v62  ;;  %v6825_v17 = vld [vmem:[#allocation2 + $0x158] sm:$0xff] }
 0x1aa   :  { %v6000_v25 = vpop.eup %5999  ;;  %v7670_v9 = vsub.f32 %v8700_v57, %v285_v40  ;;  %v200_v4 = vpop.xlane.xlu0 %199  ;;  %v916_v33 = vadd.f32 %v7464_v7, %v845_v34  ;;  %v8704_v41 = vld [vmem:[#allocation18_spill] sm:$0xff] }
 0x1ab   :  { %v483_v51 = vpop.xlane.xlu1 %482  ;;  %v775_v28 = vmul.f32 %v6000_v25, %v8701_v36  ;;  %6005 = vrsqrt.f32 %v650_v13  ;;  %v286_v21 = vmul.f32 0.0078125, %v200_v4  ;;  %1363 = vmatmul.mubr.bf16.gmra.mrb[32].mxu0 %v7667_v30  ;;  %v6826_v36 = vld [vmem:[#allocation2 + $0x160] sm:$0xff] }
 0x1ac   :  { %v587_v26 = vmul.f32 0.0078125, %v483_v51  ;;  %v413_v24 = vmul.f32 %v7670_v9, %v7670_v9  ;;  %1372 = vmatprep.mubr.bf16.mxu0 %v8697_v46 }
 0x1ad   :  { %v846_v6 = vmul.f32 %v7457_v45, %v775_v28  ;;  %v6002_v15 = vpop.eup %6001  ;;  %v7680_v3 = vsub.f32 %v8702_v60, %v286_v21 }
 0x1ae   :  { %v651_v42 = vadd.f32 1e-05, %v587_v26  ;;  %518 = vadd.xlane.f32.xlu1 %v413_v24  ;;  %v485_v61 = vpop.xlane.xlu0 %484  ;;  %v776_v23 = vmul.f32 %v6002_v15, %v8703_v22  ;;  %v6827_v22 = vld [vmem:[#allocation2 + $0x168] sm:$0xff] }
 0x1af   :  { %v202_v27 = vpop.xlane.xlu1 %201  ;;  %v917_v56 = vadd.f32 %v7464_v7, %v846_v6  ;;  %v588_v0 = vmul.f32 0.0078125, %v485_v61  ;;  %v414_v39 = vmul.f32 %v7680_v3, %v7680_v3  ;;  %1646 = vmatmul.mubr.bf16.gmra.mrb[36].mxu1 %v7505_v32  ;;  %v8705_v6 = vld [vmem:[#allocation19_spill] sm:$0xff] }
 0x1b0   :  { %6007 = vrsqrt.f32 %v651_v42  ;;  %v287_v29 = vmul.f32 0.0078125, %v202_v27  ;;  %1655 = vmatprep.mubr.bf16.mxu1 %v8697_v46  ;;  %v847_v62 = vmul.f32 %v7457_v45, %v776_v23 }
 0x1b1   :  { %v7689_v19 = vpack.c.bf16 %v917_v56, %v916_v33  ;;  %v652_v38 = vadd.f32 1e-05, %v588_v0  ;;  %520 = vadd.xlane.f32.xlu0 %v414_v39  ;;  %v8706_v39 = vld [vmem:[#allocation20_spill] sm:$0xff] }
 0x1b2   :  { %v6004_v52 = vpop.eup %6003  ;;  %v7691_v18 = vsub.f32 %v6825_v17, %v287_v29  ;;  %v204_v31 = vpop.xlane.xlu0 %203  ;;  %v918_v24 = vadd.f32 %v7464_v7, %v847_v62  ;;  %v6828_v62 = vld [vmem:[#allocation2 + $0x170] sm:$0xff] }
 0x1b3   :  { %v487_v53 = vpop.xlane.xlu1 %486  ;;  %v777_v40 = vmul.f32 %v6004_v52, %v8704_v41  ;;  %6009 = vrsqrt.f32 %v652_v38  ;;  %v288_v25 = vmul.f32 0.0078125, %v204_v31  ;;  %1373 = vmatmul.mubr.bf16.gmra.mrb[36].mxu0 %v7689_v19 }
 0x1b4   :  { %v589_v13 = vmul.f32 0.0078125, %v487_v53  ;;  %v415_v57 = vmul.f32 %v7691_v18, %v7691_v18  ;;  %1382 = vmatprep.mubr.bf16.mxu0 %v8697_v46 }
 0x1b5   :  { %v848_v4 = vmul.f32 %v7457_v45, %v777_v40  ;;  %v6006_v51 = vpop.eup %6005  ;;  %v7700_v28 = vsub.f32 %v6826_v36, %v288_v25 }
 0x1b6   :  { %v653_v34 = vadd.f32 1e-05, %v589_v13  ;;  %522 = vadd.xlane.f32.xlu1 %v415_v57  ;;  %v489_v21 = vpop.xlane.xlu0 %488  ;;  %v778_v15 = vmul.f32 %v6006_v51, %v8705_v6 }
 0x1b7   :  { %v206_v26 = vpop.xlane.xlu1 %205  ;;  %v919_v49 = vadd.f32 %v7464_v7, %v848_v4  ;;  %v590_v60 = vmul.f32 0.0078125, %v489_v21  ;;  %v416_v61 = vmul.f32 %v7700_v28, %v7700_v28  ;;  %1656 = vmatmul.mubr.bf16.gmra.mrb[40].mxu1 %v7525_v44 }
 0x1b8   :  { %6011 = vrsqrt.f32 %v653_v34  ;;  %v289_v42 = vmul.f32 0.0078125, %v206_v26  ;;  %1665 = vmatprep.mubr.bf16.mxu1 %v8697_v46  ;;  %v849_v38 = vmul.f32 %v7457_v45, %v778_v15  ;;  %v8707_v34 = vld [vmem:[#allocation22_spill] sm:$0xff] }
 0x1b9   :  { %v7709_v27 = vpack.c.bf16 %v919_v49, %v918_v24  ;;  %v654_v56 = vadd.f32 1e-05, %v590_v60  ;;  %524 = vadd.xlane.f32.xlu0 %v416_v61 }
 0x1ba   :  { %v6008_v33 = vpop.eup %6007  ;;  %v7711_v23 = vsub.f32 %v6827_v22, %v289_v42  ;;  %v208_v0 = vpop.xlane.xlu0 %207  ;;  %v920_v51 = vadd.f32 %v7464_v7, %v849_v38  ;;  %v6829_v42 = vld [vmem:[#allocation2 + $0x178] sm:$0xff]  ;;  %v8708_v22 = vld [vmem:[#allocation24_spill] sm:$0xff] }
 0x1bb   :  { %v491_v29 = vpop.xlane.xlu1 %490  ;;  %v779_v52 = vmul.f32 %v6008_v33, %v8706_v39  ;;  %6013 = vrsqrt.f32 %v654_v56  ;;  %v290_v17 = vmul.f32 0.0078125, %v208_v0  ;;  %1383 = vmatmul.mubr.bf16.gmra.mrb[40].mxu0 %v7709_v27 }
 0x1bc   :  { %v591_v31 = vmul.f32 0.0078125, %v491_v29  ;;  %v417_v53 = vmul.f32 %v7711_v23, %v7711_v23  ;;  %1392 = vmatprep.mubr.bf16.mxu0 %v8697_v46 }
 0x1bd   :  { %v850_v41 = vmul.f32 %v7457_v45, %v779_v52  ;;  %v6010_v40 = vpop.eup %6009  ;;  %v7720_v25 = vsub.f32 %v6828_v62, %v290_v17  ;;  %v5927_v17 = vld [vmem:[#allocation5 + $0x100] ss:$20 sps:$4 sm:$0xff]  }
 0x1be   :  { %v655_v13 = vadd.f32 1e-05, %v591_v31  ;;  %526 = vadd.xlane.f32.xlu1 %v417_v53  ;;  %v493_v57 = vpop.xlane.xlu0 %492  ;;  %v780_v21 = vmul.f32 %v6010_v40, %v8707_v34  ;;  %5777 = vmatprep.subr.bf16.mxu0 %v5927_v17 }
 0x1bf   :  { %v210_v4 = vpop.xlane.xlu1 %209  ;;  %v921_v36 = vadd.f32 %v7464_v7, %v850_v41  ;;  %v592_v26 = vmul.f32 0.0078125, %v493_v57  ;;  %v418_v49 = vmul.f32 %v7720_v25, %v7720_v25  ;;  %1666 = vmatmul.mubr.bf16.gmra.mrb[44].mxu1 %v7545_v11  ;;  %v8709_v57 = vld [vmem:[#allocation25_spill] sm:$0xff]  ;;  %5778 = vmatpush3.bf16.msra.mxu0 %v5927_v17  ;;  %v8711_v17 = vld [vmem:[#allocation27_spill] sm:$0xff] }
 0x1c0   :  { %6015 = vrsqrt.f32 %v655_v13  ;;  %v291_v24 = vmul.f32 0.0078125, %v210_v4  ;;  %1675 = vmatprep.mubr.bf16.mxu1 %v8697_v46  ;;  %v851_v29 = vmul.f32 %v7457_v45, %v780_v21 }
 0x1c1   :  { %v7729_v6 = vpack.c.bf16 %v921_v36, %v920_v51  ;;  %v656_v60 = vadd.f32 1e-05, %v592_v26  ;;  %528 = vadd.xlane.f32.xlu0 %v418_v49  ;;  %v8710_v49 = vld [vmem:[#allocation26_spill] sm:$0xff] }
 0x1c2   :  { %v6012_v15 = vpop.eup %6011  ;;  %v7731_v61 = vsub.f32 %v6829_v42, %v291_v24  ;;  %v497_v33 = vpop.xlane.xlu0 %496  ;;  %v922_v62 = vadd.f32 %v7464_v7, %v851_v29  ;;  %v7761_v29 = vld [vmem:[%s8649_s2] ss:$0 sm:$0xff] }
 0x1c3   :  { %v495_v56 = vpop.xlane.xlu1 %494  ;;  %v781_v0 = vmul.f32 %v6012_v15, %v8708_v22  ;;  %6017 = vrsqrt.f32 %v656_v60  ;;  %v594_v39 = vmul.f32 0.0078125, %v497_v33  ;;  %1393 = vmatmul.mubr.bf16.gmra.mrb[44].mxu0 %v7729_v6 }
 0x1c4   :  { %v593_v52 = vmul.f32 0.0078125, %v495_v56  ;;  %v419_v38 = vmul.f32 %v7731_v61, %v7731_v61  ;;  %1402 = vmatprep.mubr.bf16.mxu0 %v8697_v46 }
 0x1c5   :  { %v852_v31 = vmul.f32 %v7457_v45, %v781_v0  ;;  %v6014_v53 = vpop.eup %6013  ;;  %v658_v51 = vadd.f32 1e-05, %v594_v39 }
 0x1c6   :  { %v657_v41 = vadd.f32 1e-05, %v593_v52  ;;  %530 = vadd.xlane.f32.xlu1 %v419_v38  ;;  %v782_v4 = vmul.f32 %v6014_v53, %v8709_v57  ;;  %v501_v34 = vpop.xlane.xlu0 %500 }
 0x1c7   :  { %v499_v40 = vpop.xlane.xlu1 %498  ;;  %v923_v13 = vadd.f32 %v7464_v7, %v852_v31  ;;  %1676 = vmatmul.mubr.bf16.gmra.mrb[48].mxu1 %v7565_v43  ;;  %v7752_v7 = vld [vmem:[%s8648_s1] ss:$0 sm:$0xff]  ;;  %v596_v42 = vmul.f32 0.0078125, %v501_v34  ;;  %s6957_s1 = smov [#allocation7]  }
 0x1c8   :  { %v595_v36 = vmul.f32 0.0078125, %v499_v40  ;;  %6019 = vrsqrt.f32 %v657_v41  ;;  %1685 = vmatprep.mubr.bf16.mxu1 %v8697_v46  ;;  %v853_v60 = vmul.f32 %v7752_v7, %v782_v4  ;;  %v8712_v40 = vld [vmem:[#allocation28_spill] sm:$0xff]  ;;  %s4490_s2 = sshll.u32 %s6957_s1, 4  ;;  %s8569_s2 = int_to_ptr.vmem [resolvable:$true] %s4490_s2 }
 0x1c9   :  { %v7745_v45 = vpack.c.bf16 %v923_v13, %v922_v62  ;;  %6021 = vrsqrt.f32 %v658_v51  ;;  %v660_v38 = vadd.f32 1e-05, %v596_v42  ;;  %v5928_v42 = vld [vmem:[#allocation5 + $0x128] ss:$20 sps:$4 sm:$0xff]   ;;  %s6876_s7 = scalar_lea.vmem %s8569_s2, 4096  ;;  %p6881_p3 = scmp.lt.s32.totalorder %s8569_s2, %s8569_s2 }
 0x1ca   :  { %v6016_v21 = vpop.eup %6015  ;;  %v659_v26 = vadd.f32 1e-05, %v595_v36  ;;  %v924_v39 = vadd.f32 %v7761_v29, %v853_v60  ;;  %5779 = vmatprep.subr.bf16.mxu0 %v5928_v42  ;;  %p6877_p2 = scmp.ne.s32.totalorder %s8569_s2, %s6876_s7  ;;  %p6882_p4 = scmp.lt.s32.totalorder %s6876_s7, %s6876_s7 }
 0x1cb   :  { %v503_v24 = vpop.xlane.xlu1 %502  ;;  %v783_v15 = vmul.f32 %v6016_v21, %v8710_v49  ;;  %1403 = vmatmul.mubr.bf16.gmra.mrb[48].mxu0 %v7745_v45  ;;  %v8713_v21 = vld [vmem:[#allocation31_spill] sm:$0xff] }
 0x1cc   :  { %v597_v33 = vmul.f32 0.0078125, %v503_v24  ;;  %6023 = vrsqrt.f32 %v659_v26  ;;  %1412 = vmatprep.mubr.bf16.mxu0 %v8697_v46  ;;  %v8714_v24 = vld [vmem:[#allocation29_spill] sm:$0xff]  ;;  %5780 = vmatpush3.bf16.msra.mxu0 %v5928_v42  ;;  %p6883_p5 = por %p6882_p4, %p6881_p3 }
 0x1cd   :  { %v854_v56 = vmul.f32 %v7752_v7, %v783_v15  ;;  %v6018_v22 = vpop.eup %6017 }
 0x1ce   :  { %v661_v0 = vadd.f32 1e-05, %v597_v33  ;;  %v784_v31 = vmul.f32 %v6018_v22, %v8711_v17  ;;  %v8716_v17 = vld [vmem:[#allocation30_spill] sm:$0xff]  ;;  %p6884_p6 = pnand %p6883_p5, %p6877_p2 }
 0x1cf   :  { %v925_v52 = vadd.f32 %v7761_v29, %v854_v56  ;;  %1686 = vmatmul.mubr.bf16.gmra.mrb[52].mxu1 %v7592_v59 }
 0x1d0   :  { %6025 = vrsqrt.f32 %v661_v0  ;;  %1695 = vmatprep.mubr.bf16.mxu1 %v8697_v46  ;;  %v855_v13 = vmul.f32 %v7752_v7, %v784_v31 }
 0x1d1   :  { %v7767_v53 = vpack.c.bf16 %v925_v52, %v924_v39  ;;  %6027 = vrsqrt.f32 %v660_v38  ;;  %v8715_v39 = vld [vmem:[#allocation32_spill] sm:$0xff] }
 0x1d2   :  { %v6020_v41 = vpop.eup %6019  ;;  %v926_v36 = vadd.f32 %v7761_v29, %v855_v13 }
 0x1d3   :  { %v785_v62 = vmul.f32 %v6020_v41, %v8712_v40  ;;  %1413 = vmatmul.mubr.bf16.gmra.mrb[52].mxu0 %v7767_v53  ;;  %v6022_v57 = vpop.eup %6021 }
 0x1d4   :  { %1422 = vmatprep.mubr.bf16.mxu0 %v8697_v46  ;;  %v786_v49 = vmul.f32 %v6022_v57, %v8714_v24 }
 0x1d5   :  { %v856_v4 = vmul.f32 %v7752_v7, %v785_v62 }
 0x1d6   :  { %v6024_v51 = vpop.eup %6023  ;;  %v857_v56 = vmul.f32 %v7752_v7, %v786_v49 }
 0x1d7   :  { %v927_v34 = vadd.f32 %v7761_v29, %v856_v4  ;;  %v787_v26 = vmul.f32 %v6024_v51, %v8713_v21  ;;  %1696 = vmatmul.mubr.bf16.gmra.mrb[56].mxu1 %v7622_v58 }
 0x1d8   :  { %1705 = vmatprep.mubr.bf16.mxu1 %v8697_v46  ;;  %v928_v38 = vadd.f32 %v7761_v29, %v857_v56 }
 0x1d9   :  { %v7780_v15 = vpack.c.bf16 %v927_v34, %v926_v36  ;;  %v858_v60 = vmul.f32 %v7752_v7, %v787_v26 }
 0x1da   :  { %v6026_v33 = vpop.eup %6025 }
 0x1db   :  { %1423 = vmatmul.mubr.bf16.gmra.mrb[56].mxu0 %v7780_v15  ;;  %v6028_v22 = vpop.eup %6027  ;;  %v929_v0 = vadd.f32 %v7761_v29, %v858_v60  ;;  %v789_v52 = vmul.f32 %v6026_v33, %v8715_v39 }
 0x1dc   :  { %1432 = vmatprep.mubr.bf16.mxu0 %v8697_v46  ;;  %v788_v31 = vmul.f32 %v6028_v22, %v8716_v17 }
 0x1dd   :  { %v7793_v41 = vpack.c.bf16 %v929_v0, %v928_v38  ;;  %v860_v40 = vmul.f32 %v7752_v7, %v789_v52 }
 0x1de   :  { %v859_v62 = vmul.f32 %v7752_v7, %v788_v31 }
 0x1df   :  { %1706 = vmatmul.mubr.bf16.gmra.mrb[60].mxu1 %v7645_v8  ;;  %v931_v13 = vadd.f32 %v7761_v29, %v860_v40 }
 0x1e0   :  { %1715 = vmatprep.mubr.bf16.mxu1 %v8697_v46  ;;  %v930_v57 = vadd.f32 %v7761_v29, %v859_v62 }
 0x1e2   :  { %v7803_v4 = vpack.c.bf16 %v931_v13, %v930_v57 }
 0x1e3   :  { %1433 = vmatmul.mubr.bf16.gmra.mrb[60].mxu0 %v7793_v41 }
 0x1e4   :  { %1442 = vmatprep.mubr.bf16.mxu0 %v8697_v46 }
 0x1e7   :  { %1716 = vmatmul.mubr.bf16.gmra.mrb[64].mxu1 %v7667_v30 }
 0x1e8   :  { %1725 = vmatprep.mubr.bf16.mxu1 %v8697_v46 }
 0x1eb   :  { %1443 = vmatmul.mubr.bf16.gmra.mrb[64].mxu0 %v7803_v4 }
 0x1ec   :  { %1452 = vmatprep.mubr.bf16.mxu0 %v8697_v46 }
 0x1ef   :  { %1726 = vmatmul.mubr.bf16.gmra.mrb[68].mxu1 %v7689_v19 }
 0x1f0   :  { %1735 = vmatprep.mubr.bf16.mxu1 %v8697_v46 }
 0x1f7   :  { %1736 = vmatmul.mubr.bf16.gmra.mrb[72].mxu1 %v7709_v27 }
 0x1f8   :  { %1745 = vmatprep.mubr.bf16.mxu1 %v8697_v46 }
 0x1ff   :  { %1746 = vmatmul.mubr.bf16.gmra.mrb[76].mxu1 %v7729_v6 }
 0x200   :  { %1755 = vmatprep.mubr.bf16.mxu1 %v8697_v46 }
 0x207   :  { %1756 = vmatmul.mubr.bf16.gmra.mrb[80].mxu1 %v7745_v45 }
 0x208   :  { %1765 = vmatprep.mubr.bf16.mxu1 %v8697_v46 }
 0x20f   :  { %1766 = vmatmul.mubr.bf16.gmra.mrb[84].mxu1 %v7767_v53 }
 0x210   :  { %1775 = vmatprep.mubr.bf16.mxu1 %v8697_v46 }
 0x217   :  { %1776 = vmatmul.mubr.bf16.gmra.mrb[88].mxu1 %v7780_v15 }
 0x218   :  { %1785 = vmatprep.mubr.bf16.mxu1 %v8697_v46 }
 0x21e   :  { %v505_v51 = vpop.xlane.xlu0 %504 }
 0x21f   :  { %v598_v36 = vmul.f32 0.0078125, %v505_v51  ;;  %1786 = vmatmul.mubr.bf16.gmra.mrb[92].mxu1 %v7793_v41 }
 0x220   :  { %1795 = vmatprep.mubr.bf16.mxu1 %v8697_v46 }
 0x221   :  { %v662_v34 = vadd.f32 1e-05, %v598_v36 }
 0x223   :  { %v507_v21 = vpop.xlane.xlu1 %506  ;;  %6029 = vrsqrt.f32 %v662_v34 }
 0x224   :  { %v599_v26 = vmul.f32 0.0078125, %v507_v21 }
 0x226   :  { %v663_v24 = vadd.f32 1e-05, %v599_v26  ;;  %v509_v49 = vpop.xlane.xlu0 %508 }
 0x227   :  { %v600_v60 = vmul.f32 0.0078125, %v509_v49  ;;  %1796 = vmatmul.mubr.bf16.gmra.mrb[96].mxu1 %v7803_v4 }
 0x228   :  { %6031 = vrsqrt.f32 %v663_v24  ;;  %1805 = vmatprep.mubr.bf16.mxu1 %v8697_v46 }
 0x229   :  { %v664_v42 = vadd.f32 1e-05, %v600_v60 }
 0x22b   :  { %v511_v33 = vpop.xlane.xlu1 %510  ;;  %6033 = vrsqrt.f32 %v664_v42 }
 0x22c   :  { %v601_v56 = vmul.f32 0.0078125, %v511_v33 }
 0x22d   :  { %v6030_v22 = vpop.eup %6029 }
 0x22e   :  { %v665_v0 = vadd.f32 1e-05, %v601_v56  ;;  %v513_v39 = vpop.xlane.xlu0 %512  ;;  %v790_v52 = vmul.f32 %v6030_v22, %v7574_v16 }
 0x22f   :  { %v602_v38 = vmul.f32 0.0078125, %v513_v39 }
 0x230   :  { %6035 = vrsqrt.f32 %v665_v0  ;;  %v861_v13 = vmul.f32 %v7752_v7, %v790_v52 }
 0x231   :  { %v666_v31 = vadd.f32 1e-05, %v602_v38 }
 0x232   :  { %v6032_v17 = vpop.eup %6031  ;;  %v932_v26 = vadd.f32 %v7761_v29, %v861_v13 }
 0x233   :  { %v515_v40 = vpop.xlane.xlu1 %514  ;;  %v791_v62 = vmul.f32 %v6032_v17, %v7590_v47  ;;  %6037 = vrsqrt.f32 %v666_v31 }
 0x234   :  { %v603_v57 = vmul.f32 0.0078125, %v515_v40 }
 0x235   :  { %v862_v51 = vmul.f32 %v7752_v7, %v791_v62  ;;  %v6034_v36 = vpop.eup %6033 }
 0x236   :  { %v667_v34 = vadd.f32 1e-05, %v603_v57  ;;  %v517_v21 = vpop.xlane.xlu0 %516  ;;  %v792_v24 = vmul.f32 %v6034_v36, %v7604_v63 }
 0x237   :  { %v933_v16 = vadd.f32 %v7761_v29, %v862_v51  ;;  %v604_v49 = vmul.f32 0.0078125, %v517_v21 }
 0x238   :  { %6039 = vrsqrt.f32 %v667_v34  ;;  %v863_v0 = vmul.f32 %v7752_v7, %v792_v24 }
 0x239   :  { %v7830_v60 = vpack.c.bf16 %v933_v16, %v932_v26  ;;  %v668_v42 = vadd.f32 1e-05, %v604_v49 }
 0x23a   :  { %v6036_v47 = vpop.eup %6035  ;;  %v7832_v33 = vpop.f32.mrb[0].mxu1 }
 0x23b   :  { %8717 = vst [vmem:[#allocation15_spill] sm:$0xff] %v7832_v33  ;;  %1453 = vmatmul.mubr.bf16.gmra.mrb[68].mxu0 %v7830_v60  ;;  %1806 = vmatmul.mubr.bf16.gmra.mrb[100].mxu1 %v7830_v60  ;;  %v519_v56 = vpop.xlane.xlu1 %518  ;;  %v793_v22 = vmul.f32 %v6036_v47, %v7619_v50  ;;  %6041 = vrsqrt.f32 %v668_v42  ;;  %v7838_v39 = vpop.f32.mrb[1].mxu1  ;;  %v934_v50 = vadd.f32 %v7761_v29, %v863_v0 }
 0x23c   :  { %8718 = vst [vmem:[#allocation21_spill] sm:$0xff] %v7838_v39  ;;  %v605_v63 = vmul.f32 0.0078125, %v519_v56  ;;  %1462 = vmatprep.mubr.bf16.mxu0 %v8697_v46  ;;  %1815 = vmatprep.mubr.bf16.mxu1 %v8697_v46  ;;  %v7842_v52 = vpop.f32.mrb[2].mxu1 }
 0x23d   :  { %8719 = vst [vmem:[#allocation16_spill] sm:$0xff] %v7842_v52  ;;  %v864_v38 = vmul.f32 %v7752_v7, %v793_v22  ;;  %v6038_v17 = vpop.eup %6037  ;;  %v7845_v40 = vpop.f32.mrb[3].mxu1 }
 0x23e   :  { %v669_v31 = vadd.f32 1e-05, %v605_v63  ;;  %8720 = vst [vmem:[#allocation23_spill] sm:$0xff] %v7845_v40  ;;  %v521_v62 = vpop.xlane.xlu0 %520  ;;  %v794_v57 = vmul.f32 %v6038_v17, %v7634_v55  ;;  %v7850_v51 = vpop.f32.mrb[0].mxu0 }
 0x23f   :  { %v935_v13 = vadd.f32 %v7761_v29, %v864_v38  ;;  %v606_v36 = vmul.f32 0.0078125, %v521_v62  ;;  %v7852_v34 = vpop.f32.mrb[1].mxu0 }
 0x240   :  { %6043 = vrsqrt.f32 %v669_v31  ;;  %v7856_v24 = vpop.f32.mrb[2].mxu0  ;;  %v865_v42 = vmul.f32 %v7752_v7, %v794_v57 }
 0x241   :  { %v7854_v21 = vpack.c.bf16 %v935_v13, %v934_v50  ;;  %v670_v16 = vadd.f32 1e-05, %v606_v36  ;;  %v7858_v49 = vpop.f32.mrb[3].mxu0 }
 0x242   :  { %v6040_v26 = vpop.eup %6039  ;;  %v7860_v47 = vpop.f32.mrb[4].mxu1  ;;  %v936_v50 = vadd.f32 %v7761_v29, %v865_v42 }
 0x243   :  { %8721 = vst [vmem:[#allocation17_spill] sm:$0xff] %v7860_v47  ;;  %1463 = vmatmul.mubr.bf16.gmra.mrb[72].mxu0 %v7854_v21  ;;  %1816 = vmatmul.mubr.bf16.gmra.mrb[104].mxu1 %v7854_v21  ;;  %v795_v55 = vmul.f32 %v6040_v26, %v7648_v20  ;;  %6045 = vrsqrt.f32 %v670_v16  ;;  %v7866_v56 = vpop.f32.mrb[5].mxu1  ;;  %v523_v22 = vpop.xlane.xlu1 %522 }
 0x244   :  { %8722 = vst [vmem:[#allocation18_spill] sm:$0xff] %v7866_v56  ;;  %1472 = vmatprep.mubr.bf16.mxu0 %v8697_v46  ;;  %1825 = vmatprep.mubr.bf16.mxu1 %v8697_v46  ;;  %v607_v0 = vmul.f32 0.0078125, %v523_v22  ;;  %v7870_v63 = vpop.f32.mrb[6].mxu1 }
 0x245   :  { %8723 = vst [vmem:[#allocation19_spill] sm:$0xff] %v7870_v63  ;;  %v866_v38 = vmul.f32 %v7752_v7, %v795_v55  ;;  %v6042_v17 = vpop.eup %6041  ;;  %v7873_v31 = vpop.f32.mrb[7].mxu1 }
 0x246   :  { %8724 = vst [vmem:[#allocation20_spill] sm:$0xff] %v7873_v31  ;;  %v671_v62 = vadd.f32 1e-05, %v607_v0  ;;  %v525_v20 = vpop.xlane.xlu0 %524  ;;  %v796_v57 = vmul.f32 %v6042_v17, %v7658_v2  ;;  %v7878_v36 = vpop.f32.mrb[4].mxu0 }
 0x247   :  { %v937_v13 = vadd.f32 %v7761_v29, %v866_v38  ;;  %v608_v26 = vmul.f32 0.0078125, %v525_v20  ;;  %v7880_v16 = vpop.f32.mrb[5].mxu0 }
 0x248   :  { %6047 = vrsqrt.f32 %v671_v62  ;;  %v7884_v56 = vpop.f32.mrb[6].mxu0  ;;  %v867_v42 = vmul.f32 %v7752_v7, %v796_v57 }
 0x249   :  { %v7882_v22 = vpack.c.bf16 %v937_v13, %v936_v50  ;;  %v672_v63 = vadd.f32 1e-05, %v608_v26  ;;  %v7886_v0 = vpop.f32.mrb[7].mxu0 }
 0x24a   :  { %v6044_v55 = vpop.eup %6043  ;;  %v7888_v31 = vpop.f32.mrb[8].mxu1  ;;  %v938_v57 = vadd.f32 %v7761_v29, %v867_v42 }
 0x24b   :  { %8725 = vst [vmem:[#allocation22_spill] sm:$0xff] %v7888_v31  ;;  %1473 = vmatmul.mubr.bf16.gmra.mrb[76].mxu0 %v7882_v22  ;;  %1826 = vmatmul.mubr.bf16.gmra.mrb[108].mxu1 %v7882_v22  ;;  %v797_v2 = vmul.f32 %v6044_v55, %v7670_v9  ;;  %6049 = vrsqrt.f32 %v672_v63  ;;  %v7894_v38 = vpop.f32.mrb[9].mxu1  ;;  %v527_v17 = vpop.xlane.xlu1 %526 }
 0x24c   :  { %8726 = vst [vmem:[#allocation24_spill] sm:$0xff] %v7894_v38  ;;  %1482 = vmatprep.mubr.bf16.mxu0 %v8697_v46  ;;  %1835 = vmatprep.mubr.bf16.mxu1 %v8697_v46  ;;  %v609_v62 = vmul.f32 0.0078125, %v527_v17  ;;  %v7898_v20 = vpop.f32.mrb[10].mxu1 }
 0x24d   :  { %8727 = vst [vmem:[#allocation25_spill] sm:$0xff] %v7898_v20  ;;  %v868_v50 = vmul.f32 %v7752_v7, %v797_v2  ;;  %v6046_v13 = vpop.eup %6045  ;;  %v7901_v26 = vpop.f32.mrb[11].mxu1 }
 0x24e   :  { %8728 = vst [vmem:[#allocation26_spill] sm:$0xff] %v7901_v26  ;;  %v673_v31 = vadd.f32 1e-05, %v609_v62  ;;  %v529_v9 = vpop.xlane.xlu0 %528  ;;  %v7905_v55 = vpop.f32.mrb[8].mxu0  ;;  %v798_v47 = vmul.f32 %v6046_v13, %v7680_v3 }
 0x24f   :  { %v939_v63 = vadd.f32 %v7761_v29, %v868_v50  ;;  %v610_v38 = vmul.f32 0.0078125, %v529_v9  ;;  %v7908_v17 = vpop.f32.mrb[9].mxu0 }
 0x250   :  { %6051 = vrsqrt.f32 %v673_v31  ;;  %v7912_v40 = vpop.f32.mrb[10].mxu0 }
 0x251   :  { %v7910_v20 = vpack.c.bf16 %v939_v63, %v938_v57  ;;  %v674_v2 = vadd.f32 1e-05, %v610_v38  ;;  %v7914_v62 = vpop.f32.mrb[11].mxu0  ;;  %v869_v38 = vmul.f32 %v7752_v7, %v798_v47 }
 0x252   :  { %v6048_v26 = vpop.eup %6047  ;;  %v7916_v52 = vpop.f32.mrb[12].mxu1 }
 0x253   :  { %8729 = vst [vmem:[#allocation27_spill] sm:$0xff] %v7916_v52  ;;  %1483 = vmatmul.mubr.bf16.gmra.mrb[80].mxu0 %v7910_v20  ;;  %1836 = vmatmul.mubr.bf16.gmra.mrb[112].mxu1 %v7910_v20  ;;  %6053 = vrsqrt.f32 %v674_v2  ;;  %v7920_v42 = vpop.f32.mrb[13].mxu1  ;;  %v531_v3 = vpop.xlane.xlu1 %530  ;;  %v799_v31 = vmul.f32 %v6048_v26, %v7691_v18 }
 0x254   :  { %8730 = vst [vmem:[#allocation28_spill] sm:$0xff] %v7920_v42  ;;  %1492 = vmatprep.mubr.bf16.mxu0 %v8697_v46  ;;  %1845 = vmatprep.mubr.bf16.mxu1 %v8697_v46  ;;  %v611_v50 = vmul.f32 0.0078125, %v531_v3  ;;  %v7926_v13 = vpop.f32.mrb[14].mxu1  ;;  %v940_v42 = vadd.f32 %v7761_v29, %v869_v38 }
 0x255   :  { %8731 = vst [vmem:[#allocation31_spill] sm:$0xff] %v7926_v13  ;;  %v6050_v9 = vpop.eup %6049  ;;  %v7928_v57 = vpop.f32.mrb[15].mxu1  ;;  %v870_v63 = vmul.f32 %v7752_v7, %v799_v31 }
 0x256   :  { %8732 = vst [vmem:[#allocation29_spill] sm:$0xff] %v7928_v57  ;;  %v675_v2 = vadd.f32 1e-05, %v611_v50  ;;  %v7931_v52 = vpop.f32.mrb[12].mxu0  ;;  %v800_v33 = vmul.f32 %v6050_v9, %v7700_v28 }
 0x257   :  { %v941_v39 = vadd.f32 %v7761_v29, %v870_v63  ;;  %v7936_v18 = vpop.f32.mrb[13].mxu0 }
 0x258   :  { %6055 = vrsqrt.f32 %v675_v2  ;;  %v7938_v47 = vpop.f32.mrb[14].mxu0  ;;  %v871_v38 = vmul.f32 %v7752_v7, %v800_v33 }
 0x259   :  { %v7940_v26 = vpack.c.bf16 %v941_v39, %v940_v42  ;;  %v7942_v57 = vpop.f32.mrb[15].mxu0 }
 0x25a   :  { %v6052_v3 = vpop.eup %6051  ;;  %v7944_v31 = vpop.f32.mrb[16].mxu1 }
 0x25b   :  { %8733 = vst [vmem:[#allocation32_spill] sm:$0xff] %v7940_v26  ;;  %8734 = vst [vmem:[#allocation30_spill] sm:$0xff] %v7944_v31  ;;  %1493 = vmatmul.mubr.bf16.gmra.mrb[84].mxu0 %v7940_v26  ;;  %v7947_v50 = vpop.f32.mrb[17].mxu1  ;;  %1846 = vmatmul.mubr.bf16.gmra.mrb[116].mxu1 %v7940_v26  ;;  %v801_v28 = vmul.f32 %v6052_v3, %v7711_v23 }
 0x25c   :  { %8735 = vst [vmem:[#allocation35_spill] sm:$0xff] %v7947_v50  ;;  %v7952_v9 = vpop.f32.mrb[18].mxu1  ;;  %1502 = vmatprep.mubr.bf16.mxu0 %v8697_v46  ;;  %1855 = vmatprep.mubr.bf16.mxu1 %v8697_v46  ;;  %v942_v50 = vadd.f32 %v7761_v29, %v871_v38 }
 0x25d   :  { %8736 = vst [vmem:[#allocation36_spill] sm:$0xff] %v7952_v9  ;;  %v6054_v39 = vpop.eup %6053  ;;  %v7956_v42 = vpop.f32.mrb[19].mxu1  ;;  %v872_v63 = vmul.f32 %v7752_v7, %v801_v28 }
 0x25e   :  { %8737 = vst [vmem:[#allocation37_spill] sm:$0xff] %v7956_v42  ;;  %v7959_v2 = vpop.f32.mrb[16].mxu0  ;;  %v802_v23 = vmul.f32 %v6054_v39, %v7720_v25 }
 0x25f   :  { %v943_v31 = vadd.f32 %v7761_v29, %v872_v63  ;;  %v7964_v33 = vpop.f32.mrb[17].mxu0 }
 0x260   :  { %v7966_v3 = vpop.f32.mrb[18].mxu0  ;;  %v873_v25 = vmul.f32 %v7752_v7, %v802_v23 }
 0x261   :  { %v7968_v9 = vpack.c.bf16 %v943_v31, %v942_v50  ;;  %v7970_v26 = vpop.f32.mrb[19].mxu0 }
 0x262   :  { %v6056_v13 = vpop.eup %6055  ;;  %v7972_v42 = vpop.f32.mrb[20].mxu1 }
 0x263   :  { %8738 = vst [vmem:[#allocation38_spill] sm:$0xff] %v7968_v9  ;;  %8739 = vst [vmem:[#allocation39_spill] sm:$0xff] %v7972_v42  ;;  %1503 = vmatmul.mubr.bf16.gmra.mrb[88].mxu0 %v7968_v9  ;;  %v7975_v28 = vpop.f32.mrb[21].mxu1  ;;  %1856 = vmatmul.mubr.bf16.gmra.mrb[120].mxu1 %v7968_v9  ;;  %v803_v38 = vmul.f32 %v6056_v13, %v7731_v61 }
 0x264   :  { %8740 = vst [vmem:[#allocation40_spill] sm:$0xff] %v7975_v28  ;;  %v7980_v39 = vpop.f32.mrb[22].mxu1  ;;  %1512 = vmatprep.mubr.bf16.mxu0 %v8697_v46  ;;  %1865 = vmatprep.mubr.bf16.mxu1 %v8697_v46  ;;  %v944_v28 = vadd.f32 %v7761_v29, %v873_v25 }
 0x265   :  { %8741 = vst [vmem:[#allocation41_spill] sm:$0xff] %v7980_v39  ;;  %v7984_v31 = vpop.f32.mrb[23].mxu1  ;;  %v874_v50 = vmul.f32 %v7752_v7, %v803_v38 }
 0x266   :  { %8742 = vst [vmem:[#allocation42_spill] sm:$0xff] %v7984_v31  ;;  %v7987_v63 = vpop.f32.mrb[20].mxu0 }
 0x267   :  { %v945_v42 = vadd.f32 %v7761_v29, %v874_v50  ;;  %v7991_v9 = vpop.f32.mrb[21].mxu0 }
 0x268   :  { %v7993_v61 = vpop.f32.mrb[22].mxu0 }
 0x269   :  { %v7995_v13 = vpack.c.bf16 %v945_v42, %v944_v28  ;;  %v7997_v23 = vpop.f32.mrb[23].mxu0 }
 0x26a   :  { %v7999_v39 = vpop.f32.mrb[24].mxu1 }
 0x26b   :  { %8743 = vst [vmem:[#allocation43_spill] sm:$0xff] %v7999_v39  ;;  %1513 = vmatmul.mubr.bf16.gmra.mrb[92].mxu0 %v7995_v13  ;;  %1866 = vmatmul.mubr.bf16.gmra.mrb[124].mxu1 %v7995_v13  ;;  %v8003_v7 = vpop.f32.mrb[25].mxu1 }
 0x26c   :  { %8744 = vst [vmem:[#allocation44_spill] sm:$0xff] %v8003_v7  ;;  %5781 = vmatprep.mubr.bf16.mxu0 %v7484_v54  ;;  %1875 = vmatprep.mubr.bf16.mxu1 %v8697_v46  ;;  %v8007_v29 = vpop.f32.mrb[26].mxu1 }
 0x26d   :  { %8745 = vst [vmem:[#allocation45_spill] sm:$0xff] %v8007_v29  ;;  %v8009_v38 = vpop.f32.mrb[27].mxu1 }
 0x26e   :  { %8746 = vst [vmem:[#allocation46_spill] sm:$0xff] %v8009_v38  ;;  %v8011_v42 = vpop.f32.mrb[24].mxu0 }
 0x26f   :  { %v8013_v28 = vpop.f32.mrb[25].mxu0 }
 0x270   :  { %v8015_v25 = vpop.f32.mrb[26].mxu0 }
 0x271   :  { %v8017_v50 = vpop.f32.mrb[27].mxu0 }
 0x272   :  { %8747 = vst [vmem:[#allocation47_spill] sm:$0xff] %v8017_v50  ;;  %v8019_v39 = vpop.f32.mrb[28].mxu1 }
 0x273   :  { %8748 = vst [vmem:[#allocation48_spill] sm:$0xff] %v8019_v39  ;;  %1876 = vmatmul.mubr.bf16.gmra.mrb[128].mxu1 %v7473_v35  ;;  %5782 = vmatmul.mubr.bf16.vlgmr.msra.gmra.mrb[96].mxu0 %v7505_v32  ;;  %v8023_v54 = vpop.f32.mrb[29].mxu1 }
 0x274   :  { %8749 = vst [vmem:[#allocation49_spill] sm:$0xff] %v8023_v54  ;;  %5785 = vmatprep.mubr.bf16.mxu0 %v7525_v44  ;;  %1885 = vmatprep.mubr.bf16.mxu1 %v8697_v46  ;;  %v8027_v38 = vpop.f32.mrb[30].mxu1 }
 0x275   :  { %8750 = vst [vmem:[#allocation50_spill] sm:$0xff] %v8027_v38  ;;  %v8029_v29 = vpop.f32.mrb[31].mxu1 }
 0x276   :  { %8751 = vst [vmem:[#allocation51_spill] sm:$0xff] %v8029_v29  ;;  %v8031_v7 = vpop.f32.mrb[28].mxu0 }
 0x277   :  { %8752 = vst [vmem:[#allocation52_spill] sm:$0xff] %v8031_v7  ;;  %v8033_v31 = vpop.f32.mrb[29].mxu0 }
 0x278   :  { %8753 = vst [vmem:[#allocation53_spill] sm:$0xff] %v8033_v31  ;;  %v8035_v50 = vpop.f32.mrb[30].mxu0 }
 0x279   :  { %8754 = vst [vmem:[#allocation54_spill] sm:$0xff] %v8035_v50  ;;  %v8037_v39 = vpop.f32.mrb[31].mxu0 }
 0x27a   :  { %8755 = vst [vmem:[#allocation55_spill] sm:$0xff] %v8037_v39  ;;  %v1637_v35 = vpop.f32.mrb[32].mxu1 }
 0x27b   :  { %1886 = vmatmul.mubr.bf16.gmra.mrb[132].mxu1 %v7492_v37  ;;  %5786 = vmatmul.mubr.bf16.gmra.mrb[100].mxu0 %v7545_v11  ;;  %v4576_v32 = vmul.f32 -1.442695, %v1637_v35  ;;  %v1639_v44 = vpop.f32.mrb[33].mxu1 }
 0x27c   :  { %5789 = vmatprep.mubr.bf16.mxu0 %v7565_v43  ;;  %1895 = vmatprep.mubr.bf16.mxu1 %v8697_v46  ;;  %v4577_v29 = vmul.f32 -1.442695, %v1639_v44  ;;  %v1641_v38 = vpop.f32.mrb[34].mxu1 }
 0x27d   :  { %6057 = vpow2.f32 %v4576_v32  ;;  %v4578_v54 = vmul.f32 -1.442695, %v1641_v38  ;;  %v1643_v31 = vpop.f32.mrb[35].mxu1 }
 0x27e   :  { %6059 = vpow2.f32 %v4577_v29  ;;  %v4579_v50 = vmul.f32 -1.442695, %v1643_v31  ;;  %v8043_v7 = vpop.f32.mrb[32].mxu0 }
 0x27f   :  { %8756 = vst [vmem:[#allocation56_spill] sm:$0xff] %v8043_v7  ;;  %6061 = vpow2.f32 %v4578_v54  ;;  %v8045_v39 = vpop.f32.mrb[33].mxu0 }
 0x280   :  { %8757 = vst [vmem:[#allocation57_spill] sm:$0xff] %v8045_v39  ;;  %6063 = vpow2.f32 %v4579_v50  ;;  %v8047_v11 = vpop.f32.mrb[34].mxu0 }
 0x281   :  { %8758 = vst [vmem:[#allocation58_spill] sm:$0xff] %v8047_v11  ;;  %v8049_v35 = vpop.f32.mrb[35].mxu0 }
 0x282   :  { %8759 = vst [vmem:[#allocation59_spill] sm:$0xff] %v8049_v35  ;;  %v1647_v43 = vpop.f32.mrb[36].mxu1 }
 0x283   :  { %1896 = vmatmul.mubr.bf16.gmra.mrb[136].mxu1 %v7513_v10  ;;  %5790 = vmatmul.mubr.bf16.gmra.mrb[104].mxu0 %v7592_v59  ;;  %v4580_v32 = vmul.f32 -1.442695, %v1647_v43  ;;  %v1649_v38 = vpop.f32.mrb[37].mxu1 }
 0x284   :  { %5793 = vmatprep.mubr.bf16.mxu0 %v7622_v58  ;;  %1905 = vmatprep.mubr.bf16.mxu1 %v8697_v46  ;;  %v4581_v31 = vmul.f32 -1.442695, %v1649_v38  ;;  %v1651_v29 = vpop.f32.mrb[38].mxu1 }
 0x285   :  { %6065 = vpow2.f32 %v4580_v32  ;;  %v4582_v54 = vmul.f32 -1.442695, %v1651_v29  ;;  %v1653_v50 = vpop.f32.mrb[39].mxu1 }
 0x286   :  { %6067 = vpow2.f32 %v4581_v31  ;;  %v4583_v44 = vmul.f32 -1.442695, %v1653_v50  ;;  %v8055_v11 = vpop.f32.mrb[36].mxu0 }
 0x287   :  { %v6058_v35 = vpop.eup %6057  ;;  %6069 = vpow2.f32 %v4582_v54  ;;  %v8057_v39 = vpop.f32.mrb[37].mxu0 }
 0x288   :  { %8760 = vst [vmem:[#allocation60_spill] sm:$0xff] %v8057_v39  ;;  %v6060_v59 = vpop.eup %6059  ;;  %v2629_v43 = vadd.f32 1.0, %v6058_v35  ;;  %6071 = vpow2.f32 %v4583_v44  ;;  %v8059_v7 = vpop.f32.mrb[38].mxu0 }
 0x289   :  { %8761 = vst [vmem:[#allocation61_spill] sm:$0xff] %v8059_v7  ;;  %v6062_v58 = vpop.eup %6061  ;;  %v2630_v10 = vadd.f32 1.0, %v6060_v59  ;;  %v8061_v38 = vpop.f32.mrb[39].mxu0 }
 0x28a   :  { %8762 = vst [vmem:[#allocation62_spill] sm:$0xff] %v8061_v38  ;;  %v6064_v32 = vpop.eup %6063  ;;  %6073 = vrcp.f32 %v2629_v43  ;;  %v2631_v29 = vadd.f32 1.0, %v6062_v58  ;;  %v1657_v31 = vpop.f32.mrb[40].mxu1 }
 0x28b   :  { %1906 = vmatmul.mubr.bf16.gmra.mrb[140].mxu1 %v7533_v14  ;;  %5794 = vmatmul.mubr.bf16.gmra.mrb[108].mxu0 %v7645_v8  ;;  %6075 = vrcp.f32 %v2630_v10  ;;  %v2632_v54 = vadd.f32 1.0, %v6064_v32  ;;  %v4584_v50 = vmul.f32 -1.442695, %v1657_v31  ;;  %v1659_v39 = vpop.f32.mrb[41].mxu1 }
 0x28c   :  { %5797 = vmatprep.mubr.bf16.mxu0 %v7667_v30  ;;  %1915 = vmatprep.mubr.bf16.mxu1 %v8697_v46  ;;  %6077 = vrcp.f32 %v2631_v29  ;;  %v4585_v35 = vmul.f32 -1.442695, %v1659_v39  ;;  %v1661_v44 = vpop.f32.mrb[42].mxu1 }
 0x28d   :  { %6079 = vrcp.f32 %v2632_v54  ;;  %v4586_v59 = vmul.f32 -1.442695, %v1661_v44  ;;  %v1663_v43 = vpop.f32.mrb[43].mxu1 }
 0x28e   :  { %6081 = vpow2.f32 %v4584_v50  ;;  %v4587_v58 = vmul.f32 -1.442695, %v1663_v43  ;;  %v8067_v38 = vpop.f32.mrb[40].mxu0 }
 0x28f   :  { %8763 = vst [vmem:[#allocation63_spill] sm:$0xff] %v8067_v38  ;;  %v6066_v7 = vpop.eup %6065  ;;  %6083 = vpow2.f32 %v4585_v35  ;;  %v8069_v10 = vpop.f32.mrb[41].mxu0 }
 0x290   :  { %8764 = vst [vmem:[#allocation64_spill] sm:$0xff] %v8069_v10  ;;  %v6068_v8 = vpop.eup %6067  ;;  %v2633_v32 = vadd.f32 1.0, %v6066_v7  ;;  %6085 = vpow2.f32 %v4586_v59  ;;  %v8071_v30 = vpop.f32.mrb[42].mxu0 }
 0x291   :  { %8765 = vst [vmem:[#allocation65_spill] sm:$0xff] %v8071_v30  ;;  %v6070_v31 = vpop.eup %6069  ;;  %v2634_v29 = vadd.f32 1.0, %v6068_v8  ;;  %6087 = vpow2.f32 %v4587_v58  ;;  %v8073_v39 = vpop.f32.mrb[43].mxu0 }
 0x292   :  { %8766 = vst [vmem:[#allocation66_spill] sm:$0xff] %v8073_v39  ;;  %v6072_v54 = vpop.eup %6071  ;;  %6089 = vrcp.f32 %v2633_v32  ;;  %v2635_v50 = vadd.f32 1.0, %v6070_v31  ;;  %v1667_v44 = vpop.f32.mrb[44].mxu1 }
 0x293   :  { %1916 = vmatmul.mubr.bf16.gmra.mrb[144].mxu1 %v7553_v48  ;;  %5798 = vmatmul.mubr.bf16.gmra.mrb[112].mxu0 %v7689_v19  ;;  %6091 = vrcp.f32 %v2634_v29  ;;  %v2636_v35 = vadd.f32 1.0, %v6072_v54  ;;  %v4588_v43 = vmul.f32 -1.442695, %v1667_v44  ;;  %v1669_v7 = vpop.f32.mrb[45].mxu1 }
 0x294   :  { %5801 = vmatprep.mubr.bf16.mxu0 %v7709_v27  ;;  %1925 = vmatprep.mubr.bf16.mxu1 %v8697_v46  ;;  %v6074_v59 = vpop.eup %6073  ;;  %6093 = vrcp.f32 %v2635_v50  ;;  %v4589_v58 = vmul.f32 -1.442695, %v1669_v7  ;;  %v1671_v8 = vpop.f32.mrb[46].mxu1 }
 0x295   :  { %v6076_v39 = vpop.eup %6075  ;;  %v3013_v32 = vmul.f32 %v6074_v59, %v7850_v51  ;;  %6095 = vrcp.f32 %v2636_v35  ;;  %v4590_v31 = vmul.f32 -1.442695, %v1671_v8  ;;  %v1673_v30 = vpop.f32.mrb[47].mxu1 }
 0x296   :  { %v6078_v10 = vpop.eup %6077  ;;  %v3014_v19 = vmul.f32 %v6076_v39, %v7852_v34  ;;  %6097 = vpow2.f32 %v4588_v43  ;;  %v4591_v29 = vmul.f32 -1.442695, %v1673_v30  ;;  %v8081_v54 = vpop.f32.mrb[44].mxu0 }
 0x297   :  { %8767 = vst [vmem:[#allocation67_spill] sm:$0xff] %v8081_v54  ;;  %v6080_v27 = vpop.eup %6079  ;;  %v3015_v44 = vmul.f32 %v6078_v10, %v7856_v24  ;;  %6099 = vpow2.f32 %v4589_v58  ;;  %v8084_v50 = vpop.f32.mrb[45].mxu0 }
 0x298   :  { %v6082_v7 = vpop.eup %6081  ;;  %v3016_v38 = vmul.f32 %v6080_v27, %v7858_v49  ;;  %6101 = vpow2.f32 %v4590_v31  ;;  %v8087_v51 = vpop.f32.mrb[46].mxu0 }
 0x299   :  { %v6084_v35 = vpop.eup %6083  ;;  %v5155_v59 = vpack.c.bf16 %v3015_v44, %v3013_v32  ;;  %v2637_v8 = vadd.f32 1.0, %v6082_v7  ;;  %6103 = vpow2.f32 %v4591_v29  ;;  %v8089_v34 = vpop.f32.mrb[47].mxu0 }
 0x29a   :  { %v6086_v30 = vpop.eup %6085  ;;  %v5315_v39 = vpack.c.bf16 %v3016_v38, %v3014_v19  ;;  %v2638_v43 = vadd.f32 1.0, %v6084_v35  ;;  %v1677_v54 = vpop.f32.mrb[48].mxu1 }
 0x29b   :  { %1926 = vmatmul.mubr.bf16.gmra.mrb[148].mxu1 %v7576_v5  ;;  %5802 = vmatmul.mubr.bf16.gmra.mrb[116].mxu0 %v7729_v6  ;;  %v6088_v24 = vpop.eup %6087  ;;  %5156 = vst [vmem:[#allocation7] sm:$0xff] %v5155_v59   ;;  %6105 = vrcp.f32 %v2637_v8  ;;  %v2639_v49 = vadd.f32 1.0, %v6086_v30  ;;  %v4592_v10 = vmul.f32 -1.442695, %v1677_v54  ;;  %v1679_v58 = vpop.f32.mrb[49].mxu1 }
 0x29c   :  { %5805 = vmatprep.mubr.bf16.mxu0 %v7745_v45  ;;  %1935 = vmatprep.mubr.bf16.mxu1 %v8697_v46  ;;  %v6090_v32 = vpop.eup %6089  ;;  %5316 = vst [vmem:[#allocation8] sm:$0xff] %v5315_v39   ;;  %6107 = vrcp.f32 %v2638_v43  ;;  %v2640_v38 = vadd.f32 1.0, %v6088_v24  ;;  %v4593_v31 = vmul.f32 -1.442695, %v1679_v58  ;;  %v1681_v19 = vpop.f32.mrb[50].mxu1 }
 0x29d   :  { %v6092_v29 = vpop.eup %6091  ;;  %v3017_v27 = vmul.f32 %v6090_v32, %v7878_v36  ;;  %6109 = vrcp.f32 %v2639_v49  ;;  %v4594_v6 = vmul.f32 -1.442695, %v1681_v19  ;;  %v1683_v44 = vpop.f32.mrb[51].mxu1 }
 0x29e   :  { %v6094_v7 = vpop.eup %6093  ;;  %v3018_v54 = vmul.f32 %v6092_v29, %v7880_v16  ;;  %6111 = vrcp.f32 %v2640_v38  ;;  %v4595_v35 = vmul.f32 -1.442695, %v1683_v44  ;;  %v8097_v45 = vpop.f32.mrb[48].mxu0 }
 0x29f   :  { %v6096_v59 = vpop.eup %6095  ;;  %v3019_v8 = vmul.f32 %v6094_v7, %v7884_v56  ;;  %6113 = vpow2.f32 %v4592_v10  ;;  %v8100_v30 = vpop.f32.mrb[49].mxu0 }
 0x2a0   :  { %v6098_v39 = vpop.eup %6097  ;;  %v3020_v43 = vmul.f32 %v6096_v59, %v7886_v0  ;;  %6115 = vpow2.f32 %v4593_v31  ;;  %v8103_v36 = vpop.f32.mrb[50].mxu0 }
 0x2a1   :  { %v6100_v24 = vpop.eup %6099  ;;  %v5160_v49 = vpack.c.bf16 %v3019_v8, %v3017_v27  ;;  %v2641_v58 = vadd.f32 1.0, %v6098_v39  ;;  %6117 = vpow2.f32 %v4594_v6  ;;  %v8105_v16 = vpop.f32.mrb[51].mxu0 }
 0x2a2   :  { %v6102_v32 = vpop.eup %6101  ;;  %v5320_v38 = vpack.c.bf16 %v3020_v43, %v3018_v54  ;;  %v2642_v19 = vadd.f32 1.0, %v6100_v24  ;;  %6119 = vpow2.f32 %v4595_v35  ;;  %v1687_v56 = vpop.f32.mrb[52].mxu1 }
 0x2a3   :  { %1936 = vmatmul.mubr.bf16.gmra.mrb[152].mxu1 %v7607_v12  ;;  %5806 = vmatmul.mubr.bf16.gmra.mrb[120].mxu0 %v7767_v53  ;;  %v6104_v10 = vpop.eup %6103  ;;  %5632 = vst [vmem:[#allocation7 + $0x8] sm:$0xff] %v5160_v49   ;;  %6121 = vrcp.f32 %v2641_v58  ;;  %v2643_v0 = vadd.f32 1.0, %v6102_v32  ;;  %v4596_v31 = vmul.f32 -1.442695, %v1687_v56  ;;  %v1689_v29 = vpop.f32.mrb[53].mxu1 }
 0x2a4   :  { %5809 = vmatprep.mubr.bf16.mxu0 %v7780_v15  ;;  %1945 = vmatprep.mubr.bf16.mxu1 %v8697_v46  ;;  %5663 = vst [vmem:[#allocation8 + $0x8] sm:$0xff] %v5320_v38   ;;  %6123 = vrcp.f32 %v2642_v19  ;;  %v2644_v27 = vadd.f32 1.0, %v6104_v10  ;;  %v4597_v6 = vmul.f32 -1.442695, %v1689_v29  ;;  %v1691_v44 = vpop.f32.mrb[54].mxu1 }
 0x2a5   :  { %v6106_v7 = vpop.eup %6105  ;;  %6125 = vrcp.f32 %v2643_v0  ;;  %v4598_v54 = vmul.f32 -1.442695, %v1691_v44  ;;  %v1693_v35 = vpop.f32.mrb[55].mxu1 }
 0x2a6   :  { %v6108_v53 = vpop.eup %6107  ;;  %v3021_v59 = vmul.f32 %v6106_v7, %v7905_v55  ;;  %6127 = vrcp.f32 %v2644_v27  ;;  %v4599_v8 = vmul.f32 -1.442695, %v1693_v35  ;;  %v8112_v39 = vpop.f32.mrb[52].mxu0 }
 0x2a7   :  { %v6110_v43 = vpop.eup %6109  ;;  %v3022_v15 = vmul.f32 %v6108_v53, %v7908_v17  ;;  %6129 = vpow2.f32 %v4596_v31  ;;  %v8115_v46 = vpop.f32.mrb[53].mxu0 }
 0x2a8   :  { %v6112_v24 = vpop.eup %6111  ;;  %v3023_v49 = vmul.f32 %v6110_v43, %v7912_v40  ;;  %6131 = vpow2.f32 %v4597_v6  ;;  %v8118_v58 = vpop.f32.mrb[54].mxu0 }
 0x2a9   :  { %v6114_v32 = vpop.eup %6113  ;;  %v3024_v38 = vmul.f32 %v6112_v24, %v7914_v62  ;;  %6133 = vpow2.f32 %v4598_v54  ;;  %v8121_v55 = vpop.f32.mrb[55].mxu0 }
 0x2aa   :  { %v6116_v19 = vpop.eup %6115  ;;  %v5165_v56 = vpack.c.bf16 %v3023_v49, %v3021_v59  ;;  %v2645_v10 = vadd.f32 1.0, %v6114_v32  ;;  %6135 = vpow2.f32 %v4599_v8  ;;  %v1697_v17 = vpop.f32.mrb[56].mxu1 }
 0x2ab   :  { %1946 = vmatmul.mubr.bf16.gmra.mrb[156].mxu1 %v7637_v1  ;;  %5810 = vmatmul.mubr.bf16.gmra.mrb[124].mxu0 %v7793_v41  ;;  %v6118_v0 = vpop.eup %6117  ;;  %v5325_v40 = vpack.c.bf16 %v3024_v38, %v3022_v15  ;;  %v2646_v31 = vadd.f32 1.0, %v6116_v19  ;;  %v1699_v29 = vpop.f32.mrb[57].mxu1  ;;  %v4600_v6 = vmul.f32 -1.442695, %v1697_v17 }
 0x2ac   :  { %5813 = vmatprep.mubr.bf16.mxu0 %v7803_v4  ;;  %v6120_v27 = vpop.eup %6119  ;;  %5633 = vst [vmem:[#allocation7 + $0x10] sm:$0xff] %v5165_v56   ;;  %6137 = vrcp.f32 %v2645_v10  ;;  %v2647_v62 = vadd.f32 1.0, %v6118_v0  ;;  %v1701_v44 = vpop.f32.mrb[58].mxu1  ;;  %v4601_v35 = vmul.f32 -1.442695, %v1699_v29 }
 0x2ad   :  { %v6122_v7 = vpop.eup %6121  ;;  %5664 = vst [vmem:[#allocation8 + $0x10] sm:$0xff] %v5325_v40   ;;  %6139 = vrcp.f32 %v2646_v31  ;;  %v2648_v54 = vadd.f32 1.0, %v6120_v27  ;;  %v1703_v53 = vpop.f32.mrb[59].mxu1  ;;  %v4602_v8 = vmul.f32 -1.442695, %v1701_v44 }
 0x2ae   :  { %v6124_v59 = vpop.eup %6123  ;;  %v3025_v41 = vmul.f32 %v6122_v7, %v7931_v52  ;;  %6141 = vrcp.f32 %v2647_v62  ;;  %v8127_v43 = vpop.f32.mrb[56].mxu0  ;;  %v4603_v24 = vmul.f32 -1.442695, %v1703_v53 }
 0x2af   :  { %v6126_v4 = vpop.eup %6125  ;;  %v3026_v15 = vmul.f32 %v6124_v59, %v7936_v18  ;;  %6143 = vrcp.f32 %v2648_v54  ;;  %v8130_v49 = vpop.f32.mrb[57].mxu0 }
 0x2b0   :  { %v6128_v32 = vpop.eup %6127  ;;  %v3027_v38 = vmul.f32 %v6126_v4, %v7938_v47  ;;  %6145 = vpow2.f32 %v4600_v6  ;;  %v8133_v19 = vpop.f32.mrb[58].mxu0 }
 0x2b1   :  { %v6130_v56 = vpop.eup %6129  ;;  %v3028_v52 = vmul.f32 %v6128_v32, %v7942_v57  ;;  %6147 = vpow2.f32 %v4601_v35  ;;  %v8136_v10 = vpop.f32.mrb[59].mxu0 }
 0x2b2   :  { %v6132_v17 = vpop.eup %6131  ;;  %v5170_v0 = vpack.c.bf16 %v3027_v38, %v3025_v41  ;;  %v2649_v40 = vadd.f32 1.0, %v6130_v56  ;;  %6149 = vpow2.f32 %v4602_v8  ;;  %v1707_v18 = vpop.f32.mrb[60].mxu1 }
 0x2b3   :  { %5814 = vmatmul.mubr.bf16.gmra.mrb[128].mxu0 %v7830_v60  ;;  %v6134_v31 = vpop.eup %6133  ;;  %v5330_v29 = vpack.c.bf16 %v3028_v52, %v3026_v15  ;;  %v2650_v27 = vadd.f32 1.0, %v6132_v17  ;;  %6151 = vpow2.f32 %v4603_v24  ;;  %v1709_v47 = vpop.f32.mrb[61].mxu1  ;;  %v4604_v6 = vmul.f32 -1.442695, %v1707_v18 }
 0x2b4   :  { %5817 = vmatprep.mubr.bf16.mxu0 %v7854_v21  ;;  %v6136_v62 = vpop.eup %6135  ;;  %5634 = vst [vmem:[#allocation7 + $0x18] sm:$0xff] %v5170_v0   ;;  %6153 = vrcp.f32 %v2649_v40  ;;  %v2651_v57 = vadd.f32 1.0, %v6134_v31  ;;  %v1711_v44 = vpop.f32.mrb[62].mxu1  ;;  %v4605_v54 = vmul.f32 -1.442695, %v1709_v47 }
 0x2b5   :  { %5665 = vst [vmem:[#allocation8 + $0x18] sm:$0xff] %v5330_v29   ;;  %6155 = vrcp.f32 %v2650_v27  ;;  %v2652_v7 = vadd.f32 1.0, %v6136_v62  ;;  %v1713_v35 = vpop.f32.mrb[63].mxu1  ;;  %v4606_v60 = vmul.f32 -1.442695, %v1711_v44 }
 0x2b6   :  { %v6138_v53 = vpop.eup %6137  ;;  %6157 = vrcp.f32 %v2651_v57  ;;  %v8140_v59 = vpop.f32.mrb[60].mxu0  ;;  %v4607_v21 = vmul.f32 -1.442695, %v1713_v35 }
 0x2b7   :  { %v6140_v41 = vpop.eup %6139  ;;  %v3029_v8 = vmul.f32 %v6138_v53, %v7959_v2  ;;  %6159 = vrcp.f32 %v2652_v7  ;;  %v8143_v4 = vpop.f32.mrb[61].mxu0 }
 0x2b8   :  { %v6142_v15 = vpop.eup %6141  ;;  %v3030_v24 = vmul.f32 %v6140_v41, %v7964_v33  ;;  %6161 = vpow2.f32 %v4604_v6  ;;  %v8146_v32 = vpop.f32.mrb[62].mxu0 }
 0x2b9   :  { %v6144_v38 = vpop.eup %6143  ;;  %v3031_v56 = vmul.f32 %v6142_v15, %v7966_v3  ;;  %6163 = vpow2.f32 %v4605_v54  ;;  %v8149_v52 = vpop.f32.mrb[63].mxu0 }
 0x2ba   :  { %v6146_v17 = vpop.eup %6145  ;;  %v3032_v0 = vmul.f32 %v6144_v38, %v7970_v26  ;;  %6165 = vpow2.f32 %v4606_v60  ;;  %v1717_v2 = vpop.f32.mrb[64].mxu1 }
 0x2bb   :  { %5818 = vmatmul.mubr.bf16.gmra.mrb[132].mxu0 %v7882_v22  ;;  %v6148_v40 = vpop.eup %6147  ;;  %v5175_v18 = vpack.c.bf16 %v3031_v56, %v3029_v8  ;;  %v2653_v31 = vadd.f32 1.0, %v6146_v17  ;;  %6167 = vpow2.f32 %v4607_v21  ;;  %v1719_v33 = vpop.f32.mrb[65].mxu1  ;;  %v4608_v26 = vmul.f32 -1.442695, %v1717_v2  ;;  %v8768_v2 = vld [vmem:[#allocation32_spill] sm:$0xff] }
 0x2bc   :  { %5821 = vmatprep.mubr.bf16.mxu0 %v7910_v20  ;;  %v6150_v29 = vpop.eup %6149  ;;  %v5335_v27 = vpack.c.bf16 %v3032_v0, %v3030_v24  ;;  %v2654_v3 = vadd.f32 1.0, %v6148_v40  ;;  %v1721_v47 = vpop.f32.mrb[66].mxu1  ;;  %v4609_v7 = vmul.f32 -1.442695, %v1719_v33  ;;  %v8769_v33 = vld [vmem:[#allocation38_spill] sm:$0xff] }
 0x2bd   :  { %v6152_v62 = vpop.eup %6151  ;;  %5635 = vst [vmem:[#allocation7 + $0x20] sm:$0xff] %v5175_v18   ;;  %6169 = vrcp.f32 %v2653_v31  ;;  %v2655_v57 = vadd.f32 1.0, %v6150_v29  ;;  %v1723_v6 = vpop.f32.mrb[67].mxu1  ;;  %v4610_v53 = vmul.f32 -1.442695, %v1721_v47 }
 0x2be   :  { %v6154_v44 = vpop.eup %6153  ;;  %5666 = vst [vmem:[#allocation8 + $0x20] sm:$0xff] %v5335_v27   ;;  %6171 = vrcp.f32 %v2654_v3  ;;  %v2656_v22 = vadd.f32 1.0, %v6152_v62  ;;  %v8154_v54 = vpop.f32.mrb[64].mxu0  ;;  %v4611_v21 = vmul.f32 -1.442695, %v1723_v6 }
 0x2bf   :  { %v6156_v35 = vpop.eup %6155  ;;  %v3033_v20 = vmul.f32 %v6154_v44, %v7987_v63  ;;  %6173 = vrcp.f32 %v2655_v57  ;;  %v8157_v60 = vpop.f32.mrb[65].mxu0 }
 0x2c0   :  { %v6158_v41 = vpop.eup %6157  ;;  %v3034_v8 = vmul.f32 %v6156_v35, %v7991_v9  ;;  %6175 = vrcp.f32 %v2656_v22  ;;  %v8160_v15 = vpop.f32.mrb[66].mxu0 }
 0x2c1   :  { %v6160_v24 = vpop.eup %6159  ;;  %v3035_v38 = vmul.f32 %v6158_v41, %v7993_v61  ;;  %6177 = vpow2.f32 %v4608_v26  ;;  %v8163_v56 = vpop.f32.mrb[67].mxu0 }
 0x2c2   :  { %v6162_v17 = vpop.eup %6161  ;;  %v3036_v63 = vmul.f32 %v6160_v24, %v7997_v23  ;;  %6179 = vpow2.f32 %v4609_v7  ;;  %v1727_v0 = vpop.f32.mrb[68].mxu1 }
 0x2c3   :  { %5822 = vmatmul.mubr.bf16.gmra.mrb[136].mxu0 %v8768_v2  ;;  %v6164_v40 = vpop.eup %6163  ;;  %v5180_v18 = vpack.c.bf16 %v3035_v38, %v3033_v20  ;;  %v2657_v9 = vadd.f32 1.0, %v6162_v17  ;;  %6181 = vpow2.f32 %v4610_v53  ;;  %v1729_v31 = vpop.f32.mrb[69].mxu1  ;;  %v4612_v62 = vmul.f32 -1.442695, %v1727_v0  ;;  %v8770_v17 = vld [vmem:[#allocation47_spill] sm:$0xff] }
 0x2c4   :  { %5825 = vmatprep.mubr.bf16.mxu0 %v8769_v33  ;;  %v6166_v29 = vpop.eup %6165  ;;  %v5340_v27 = vpack.c.bf16 %v3036_v63, %v3034_v8  ;;  %v2658_v61 = vadd.f32 1.0, %v6164_v40  ;;  %6183 = vpow2.f32 %v4611_v21  ;;  %v1731_v3 = vpop.f32.mrb[70].mxu1  ;;  %v4613_v6 = vmul.f32 -1.442695, %v1729_v31 }
 0x2c5   :  { %v6168_v47 = vpop.eup %6167  ;;  %5636 = vst [vmem:[#allocation7 + $0x28] sm:$0xff] %v5180_v18   ;;  %6185 = vrcp.f32 %v2657_v9  ;;  %v2659_v23 = vadd.f32 1.0, %v6166_v29  ;;  %v1733_v57 = vpop.f32.mrb[71].mxu1  ;;  %v4614_v22 = vmul.f32 -1.442695, %v1731_v3 }
 0x2c6   :  { %5667 = vst [vmem:[#allocation8 + $0x28] sm:$0xff] %v5340_v27   ;;  %6187 = vrcp.f32 %v2658_v61  ;;  %v2660_v26 = vadd.f32 1.0, %v6168_v47  ;;  %v4615_v20 = vmul.f32 -1.442695, %v1733_v57  ;;  %v8772_v57 = vld [vmem:[#allocation52_spill] sm:$0xff] }
 0x2c7   :  { %v6170_v44 = vpop.eup %6169  ;;  %6189 = vrcp.f32 %v2659_v23 }
 0x2c8   :  { %v6172_v7 = vpop.eup %6171  ;;  %v3037_v35 = vmul.f32 %v6170_v44, %v8011_v42  ;;  %6191 = vrcp.f32 %v2660_v26  ;;  %v8771_v42 = vld [vmem:[#allocation33_spill] sm:$0xff] }
 0x2c9   :  { %v6174_v53 = vpop.eup %6173  ;;  %v3038_v41 = vmul.f32 %v6172_v7, %v8013_v28  ;;  %6193 = vpow2.f32 %v4612_v62 }
 0x2ca   :  { %v6176_v8 = vpop.eup %6175  ;;  %v3039_v21 = vmul.f32 %v6174_v53, %v8015_v25  ;;  %6195 = vpow2.f32 %v4613_v6  ;;  %v1737_v24 = vpop.f32.mrb[72].mxu1 }
 0x2cb   :  { %5826 = vmatmul.mubr.bf16.gmra.mrb[140].mxu0 %v7995_v13  ;;  %v6178_v38 = vpop.eup %6177  ;;  %v3040_v63 = vmul.f32 %v6176_v8, %v8770_v17  ;;  %6197 = vpow2.f32 %v4614_v22  ;;  %v4616_v0 = vmul.f32 -1.442695, %v1737_v24  ;;  %v1739_v2 = vpop.f32.mrb[73].mxu1  ;;  %v8773_v22 = vld [vmem:[#allocation53_spill] sm:$0xff] }
 0x2cc   :  { %5829 = vmatprep.mubr.bf16.mxu0 %v8771_v42  ;;  %v6180_v40 = vpop.eup %6179  ;;  %v5185_v18 = vpack.c.bf16 %v3039_v21, %v3037_v35  ;;  %v2661_v9 = vadd.f32 1.0, %v6178_v38  ;;  %6199 = vpow2.f32 %v4615_v20  ;;  %v1741_v28 = vpop.f32.mrb[74].mxu1  ;;  %v4617_v61 = vmul.f32 -1.442695, %v1739_v2  ;;  %v8774_v20 = vld [vmem:[#allocation54_spill] sm:$0xff]  ;;  %v8775_v21 = vld [vmem:[#allocation55_spill] sm:$0xff] }
 0x2cd   :  { %v6182_v31 = vpop.eup %6181  ;;  %v5345_v33 = vpack.c.bf16 %v3040_v63, %v3038_v41  ;;  %v2662_v25 = vadd.f32 1.0, %v6180_v40  ;;  %6201 = vpow2.f32 %v4616_v0  ;;  %v1743_v29 = vpop.f32.mrb[75].mxu1  ;;  %v4618_v23 = vmul.f32 -1.442695, %v1741_v28  ;;  %v8776_v63 = vld [vmem:[#allocation34_spill] sm:$0xff] }
 0x2ce   :  { %v6184_v27 = vpop.eup %6183  ;;  %5637 = vst [vmem:[#allocation7 + $0x30] sm:$0xff] %v5185_v18   ;;  %6203 = vrcp.f32 %v2661_v9  ;;  %v2663_v13 = vadd.f32 1.0, %v6182_v31  ;;  %v4619_v6 = vmul.f32 -1.442695, %v1743_v29 }
 0x2cf   :  { %v6186_v3 = vpop.eup %6185  ;;  %5668 = vst [vmem:[#allocation8 + $0x30] sm:$0xff] %v5345_v33   ;;  %6205 = vrcp.f32 %v2662_v25  ;;  %v2664_v47 = vadd.f32 1.0, %v6184_v27 }
 0x2d0   :  { %v6188_v62 = vpop.eup %6187  ;;  %v3041_v26 = vmul.f32 %v6186_v3, %v8772_v57  ;;  %6207 = vrcp.f32 %v2663_v13 }
 0x2d1   :  { %v6190_v44 = vpop.eup %6189  ;;  %v3042_v7 = vmul.f32 %v6188_v62, %v8773_v22  ;;  %6209 = vrcp.f32 %v2664_v47 }
 0x2d2   :  { %v6192_v35 = vpop.eup %6191  ;;  %v3043_v53 = vmul.f32 %v6190_v44, %v8774_v20  ;;  %6211 = vpow2.f32 %v4617_v61  ;;  %v1747_v41 = vpop.f32.mrb[76].mxu1 }
 0x2d3   :  { %5830 = vmatmul.mubr.bf16.gmra.mrb[144].mxu0 %v7492_v37  ;;  %v6194_v8 = vpop.eup %6193  ;;  %v3044_v24 = vmul.f32 %v6192_v35, %v8775_v21  ;;  %6213 = vpow2.f32 %v4618_v23  ;;  %v4620_v38 = vmul.f32 -1.442695, %v1747_v41  ;;  %v1749_v17 = vpop.f32.mrb[77].mxu1  ;;  %v8777_v23 = vld [vmem:[#allocation56_spill] sm:$0xff]  ;;  %v8779_v35 = vld [vmem:[#allocation58_spill] sm:$0xff]  ;;  %v8780_v21 = vld [vmem:[#allocation59_spill] sm:$0xff] }
 0x2d4   :  { %5833 = vmatprep.mubr.bf16.mxu0 %v8776_v63  ;;  %v6196_v0 = vpop.eup %6195  ;;  %v5190_v2 = vpack.c.bf16 %v3043_v53, %v3041_v26  ;;  %v2665_v42 = vadd.f32 1.0, %v6194_v8  ;;  %6215 = vpow2.f32 %v4619_v6  ;;  %v1751_v40 = vpop.f32.mrb[78].mxu1  ;;  %v4621_v27 = vmul.f32 -1.442695, %v1749_v17  ;;  %v8778_v6 = vld [vmem:[#allocation57_spill] sm:$0xff] }
 0x2d5   :  { %v6198_v18 = vpop.eup %6197  ;;  %v5350_v9 = vpack.c.bf16 %v3044_v24, %v3042_v7  ;;  %v2666_v28 = vadd.f32 1.0, %v6196_v0  ;;  %6217 = vpow2.f32 %v4620_v38  ;;  %v1753_v31 = vpop.f32.mrb[79].mxu1  ;;  %v4622_v3 = vmul.f32 -1.442695, %v1751_v40 }
 0x2d6   :  { %v6200_v33 = vpop.eup %6199  ;;  %5638 = vst [vmem:[#allocation7 + $0x38] sm:$0xff] %v5190_v2   ;;  %6219 = vrcp.f32 %v2665_v42  ;;  %v2667_v37 = vadd.f32 1.0, %v6198_v18  ;;  %v4623_v57 = vmul.f32 -1.442695, %v1753_v31 }
 0x2d7   :  { %v6202_v25 = vpop.eup %6201  ;;  %5669 = vst [vmem:[#allocation8 + $0x38] sm:$0xff] %v5350_v9   ;;  %6221 = vrcp.f32 %v2666_v28  ;;  %v2668_v29 = vadd.f32 1.0, %v6200_v33 }
 0x2d8   :  { %v6204_v13 = vpop.eup %6203  ;;  %6223 = vrcp.f32 %v2667_v37  ;;  %v2669_v61 = vadd.f32 1.0, %v6202_v25 }
 0x2d9   :  { %v6206_v47 = vpop.eup %6205  ;;  %v3045_v62 = vmul.f32 %v6204_v13, %v8777_v23  ;;  %6225 = vrcp.f32 %v2668_v29  ;;  %v8781_v13 = vld [vmem:[#allocation60_spill] sm:$0xff]  ;;  %v8782_v23 = vld [vmem:[#allocation61_spill] sm:$0xff] }
 0x2da   :  { %v6208_v26 = vpop.eup %6207  ;;  %v3046_v44 = vmul.f32 %v6206_v47, %v8778_v6  ;;  %6227 = vrcp.f32 %v2669_v61  ;;  %v1757_v22 = vpop.f32.mrb[80].mxu1 }
 0x2db   :  { %5834 = vmatmul.mubr.bf16.gmra.mrb[148].mxu0 %v7533_v14  ;;  %v6210_v7 = vpop.eup %6209  ;;  %v3047_v20 = vmul.f32 %v6208_v26, %v8779_v35  ;;  %6229 = vpow2.f32 %v4621_v27  ;;  %v4624_v53 = vmul.f32 -1.442695, %v1757_v22  ;;  %v1759_v41 = vpop.f32.mrb[81].mxu1 }
 0x2dc   :  { %5837 = vmatprep.mubr.bf16.mxu0 %v7553_v48  ;;  %v6212_v8 = vpop.eup %6211  ;;  %v3048_v24 = vmul.f32 %v6210_v7, %v8780_v21  ;;  %6231 = vpow2.f32 %v4622_v3  ;;  %v1761_v38 = vpop.f32.mrb[82].mxu1  ;;  %v4625_v28 = vmul.f32 -1.442695, %v1759_v41 }
 0x2dd   :  { %v6214_v17 = vpop.eup %6213  ;;  %v5195_v63 = vpack.c.bf16 %v3047_v20, %v3045_v62  ;;  %v2670_v0 = vadd.f32 1.0, %v6212_v8  ;;  %6233 = vpow2.f32 %v4623_v57  ;;  %v1763_v2 = vpop.f32.mrb[83].mxu1  ;;  %v4626_v33 = vmul.f32 -1.442695, %v1761_v38 }
 0x2de   :  { %v6216_v42 = vpop.eup %6215  ;;  %v5355_v14 = vpack.c.bf16 %v3048_v24, %v3046_v44  ;;  %v2671_v40 = vadd.f32 1.0, %v6214_v17  ;;  %6235 = vpow2.f32 %v4624_v53  ;;  %v4627_v29 = vmul.f32 -1.442695, %v1763_v2  ;;  %v8783_v44 = vld [vmem:[#allocation62_spill] sm:$0xff]  ;;  %v8784_v53 = vld [vmem:[#allocation63_spill] sm:$0xff] }
 0x2df   :  { %v6218_v18 = vpop.eup %6217  ;;  %5639 = vst [vmem:[#allocation7 + $0x40] sm:$0xff] %v5195_v63   ;;  %6237 = vrcp.f32 %v2670_v0  ;;  %v2672_v9 = vadd.f32 1.0, %v6216_v42 }
 0x2e0   :  { %v6220_v48 = vpop.eup %6219  ;;  %5670 = vst [vmem:[#allocation8 + $0x40] sm:$0xff] %v5355_v14   ;;  %6239 = vrcp.f32 %v2671_v40  ;;  %v2673_v31 = vadd.f32 1.0, %v6218_v18  ;;  %v8785_v18 = vld [vmem:[#allocation64_spill] sm:$0xff] }
 0x2e1   :  { %v6222_v37 = vpop.eup %6221  ;;  %v3049_v25 = vmul.f32 %v6220_v48, %v8055_v11  ;;  %6241 = vrcp.f32 %v2672_v9 }
 0x2e2   :  { %v6224_v27 = vpop.eup %6223  ;;  %v3050_v61 = vmul.f32 %v6222_v37, %v8781_v13  ;;  %6243 = vrcp.f32 %v2673_v31  ;;  %v1767_v3 = vpop.f32.mrb[84].mxu1  ;;  %v8786_v31 = vld [vmem:[#allocation65_spill] sm:$0xff] }
 0x2e3   :  { %5838 = vmatmul.mubr.bf16.gmra.mrb[152].mxu0 %v7576_v5  ;;  %v6226_v47 = vpop.eup %6225  ;;  %v3051_v62 = vmul.f32 %v6224_v27, %v8782_v23  ;;  %6245 = vpow2.f32 %v4625_v28  ;;  %v4628_v57 = vmul.f32 -1.442695, %v1767_v3  ;;  %v1769_v26 = vpop.f32.mrb[85].mxu1  ;;  %v8787_v27 = vld [vmem:[#allocation66_spill] sm:$0xff] }
 0x2e4   :  { %5841 = vmatprep.mubr.bf16.mxu0 %v7607_v12  ;;  %v6228_v6 = vpop.eup %6227  ;;  %v3052_v11 = vmul.f32 %v6226_v47, %v8783_v44  ;;  %6247 = vpow2.f32 %v4626_v33  ;;  %v4629_v22 = vmul.f32 -1.442695, %v1769_v26  ;;  %v1771_v7 = vpop.f32.mrb[86].mxu1 }
 0x2e5   :  { %v6230_v35 = vpop.eup %6229  ;;  %v5200_v20 = vpack.c.bf16 %v3051_v62, %v3049_v25  ;;  %v3053_v41 = vmul.f32 %v6228_v6, %v8784_v53  ;;  %6249 = vpow2.f32 %v4627_v29  ;;  %v1773_v5 = vpop.f32.mrb[87].mxu1  ;;  %v4630_v0 = vmul.f32 -1.442695, %v1771_v7  ;;  %v8788_v62 = vld [vmem:[#allocation67_spill] sm:$0xff] }
 0x2e6   :  { %v6232_v8 = vpop.eup %6231  ;;  %v5360_v21 = vpack.c.bf16 %v3052_v11, %v3050_v61  ;;  %v2674_v24 = vadd.f32 1.0, %v6230_v35  ;;  %6251 = vpow2.f32 %v4628_v57  ;;  %v4631_v14 = vmul.f32 -1.442695, %v1773_v5 }
 0x2e7   :  { %v6234_v38 = vpop.eup %6233  ;;  %5640 = vst [vmem:[#allocation7 + $0x48] sm:$0xff] %v5200_v20   ;;  %v2675_v17 = vadd.f32 1.0, %v6232_v8  ;;  %6253 = vpow2.f32 %v4629_v22 }
 0x2e8   :  { %v6236_v12 = vpop.eup %6235  ;;  %5671 = vst [vmem:[#allocation8 + $0x48] sm:$0xff] %v5360_v21   ;;  %6255 = vrcp.f32 %v2674_v24  ;;  %v2676_v63 = vadd.f32 1.0, %v6234_v38 }
 0x2e9   :  { %v6238_v2 = vpop.eup %6237  ;;  %6257 = vrcp.f32 %v2675_v17  ;;  %v2677_v42 = vadd.f32 1.0, %v6236_v12 }
 0x2ea   :  { %v6240_v40 = vpop.eup %6239  ;;  %v3054_v9 = vmul.f32 %v6238_v2, %v8785_v18  ;;  %6259 = vrcp.f32 %v2676_v63  ;;  %v1777_v28 = vpop.f32.mrb[88].mxu1 }
 0x2eb   :  { %5842 = vmatmul.mubr.bf16.gmra.mrb[156].mxu0 %v7637_v1  ;;  %v6242_v48 = vpop.eup %6241  ;;  %v3055_v33 = vmul.f32 %v6240_v40, %v8786_v31  ;;  %6261 = vrcp.f32 %v2677_v42  ;;  %v4632_v37 = vmul.f32 -1.442695, %v1777_v28  ;;  %v1779_v25 = vpop.f32.mrb[89].mxu1 }
 0x2ec   :  { %v6244_v29 = vpop.eup %6243  ;;  %v3056_v13 = vmul.f32 %v6242_v48, %v8787_v27  ;;  %6263 = vpow2.f32 %v4630_v0  ;;  %v4633_v61 = vmul.f32 -1.442695, %v1779_v25  ;;  %v1781_v3 = vpop.f32.mrb[90].mxu1 }
 0x2ed   :  { %v6246_v47 = vpop.eup %6245  ;;  %v5205_v23 = vpack.c.bf16 %v3055_v33, %v3053_v41  ;;  %v3057_v57 = vmul.f32 %v6244_v29, %v8788_v62  ;;  %6265 = vpow2.f32 %v4631_v14  ;;  %v1783_v26 = vpop.f32.mrb[91].mxu1  ;;  %v4634_v41 = vmul.f32 -1.442695, %v1781_v3 }
 0x2ee   :  { %v6248_v6 = vpop.eup %6247  ;;  %v5365_v1 = vpack.c.bf16 %v3056_v13, %v3054_v9  ;;  %v2678_v44 = vadd.f32 1.0, %v6246_v47  ;;  %6267 = vpow2.f32 %v4632_v37  ;;  %v4635_v21 = vmul.f32 -1.442695, %v1783_v26 }
 0x2ef   :  { %v6250_v11 = vpop.eup %6249  ;;  %5641 = vst [vmem:[#allocation7 + $0x50] sm:$0xff] %v5205_v23   ;;  %v2679_v22 = vadd.f32 1.0, %v6248_v6  ;;  %6269 = vpow2.f32 %v4633_v61 }
 0x2f0   :  { %v6252_v7 = vpop.eup %6251  ;;  %5672 = vst [vmem:[#allocation8 + $0x50] sm:$0xff] %v5365_v1   ;;  %6271 = vrcp.f32 %v2678_v44  ;;  %v2680_v35 = vadd.f32 1.0, %v6250_v11 }
 0x2f1   :  { %v6254_v20 = vpop.eup %6253  ;;  %6273 = vrcp.f32 %v2679_v22  ;;  %v2681_v53 = vadd.f32 1.0, %v6252_v7 }
 0x2f2   :  { %v6256_v5 = vpop.eup %6255  ;;  %6275 = vrcp.f32 %v2680_v35  ;;  %v2682_v8 = vadd.f32 1.0, %v6254_v20  ;;  %v1787_v24 = vpop.f32.mrb[92].mxu1 }
 0x2f3   :  { %v6258_v38 = vpop.eup %6257  ;;  %v3058_v17 = vmul.f32 %v6256_v5, %v8084_v50  ;;  %6277 = vrcp.f32 %v2681_v53  ;;  %v4636_v12 = vmul.f32 -1.442695, %v1787_v24  ;;  %v1789_v63 = vpop.f32.mrb[93].mxu1 }
 0x2f4   :  { %v6260_v0 = vpop.eup %6259  ;;  %v3059_v2 = vmul.f32 %v6258_v38, %v8087_v51  ;;  %6279 = vrcp.f32 %v2682_v8  ;;  %v4637_v42 = vmul.f32 -1.442695, %v1789_v63  ;;  %v1791_v14 = vpop.f32.mrb[94].mxu1 }
 0x2f5   :  { %v6262_v40 = vpop.eup %6261  ;;  %v3060_v18 = vmul.f32 %v6260_v0, %v8089_v34  ;;  %6281 = vpow2.f32 %v4634_v41  ;;  %v1793_v9 = vpop.f32.mrb[95].mxu1  ;;  %v4638_v34 = vmul.f32 -1.442695, %v1791_v14 }
 0x2f6   :  { %v6264_v28 = vpop.eup %6263  ;;  %v5210_v48 = vpack.c.bf16 %v3059_v2, %v3057_v57  ;;  %v3061_v31 = vmul.f32 %v6262_v40, %v8097_v45  ;;  %6283 = vpow2.f32 %v4635_v21  ;;  %v4639_v3 = vmul.f32 -1.442695, %v1793_v9 }
 0x2f7   :  { %v6266_v50 = vpop.eup %6265  ;;  %v5370_v33 = vpack.c.bf16 %v3060_v18, %v3058_v17  ;;  %v2683_v37 = vadd.f32 1.0, %v6264_v28  ;;  %6285 = vpow2.f32 %v4636_v12 }
 0x2f8   :  { %v6268_v25 = vpop.eup %6267  ;;  %5642 = vst [vmem:[#allocation7 + $0x58] sm:$0xff] %v5210_v48   ;;  %v2684_v51 = vadd.f32 1.0, %v6266_v50  ;;  %6287 = vpow2.f32 %v4637_v42 }
 0x2f9   :  { %v6270_v29 = vpop.eup %6269  ;;  %5673 = vst [vmem:[#allocation8 + $0x58] sm:$0xff] %v5370_v33   ;;  %6289 = vrcp.f32 %v2683_v37  ;;  %v2685_v27 = vadd.f32 1.0, %v6268_v25 }
 0x2fa   :  { %v6272_v13 = vpop.eup %6271  ;;  %6291 = vrcp.f32 %v2684_v51  ;;  %v2686_v61 = vadd.f32 1.0, %v6270_v29  ;;  %v1797_v47 = vpop.f32.mrb[96].mxu1 }
 0x2fb   :  { %v6274_v45 = vpop.eup %6273  ;;  %v3062_v23 = vmul.f32 %v6272_v13, %v8100_v30  ;;  %6293 = vrcp.f32 %v2685_v27  ;;  %v4640_v62 = vmul.f32 -1.442695, %v1797_v47  ;;  %v1799_v57 = vpop.f32.mrb[97].mxu1 }
 0x2fc   :  { %v6276_v26 = vpop.eup %6275  ;;  %v3063_v6 = vmul.f32 %v6274_v45, %v8103_v36  ;;  %6295 = vrcp.f32 %v2686_v61  ;;  %v4641_v1 = vmul.f32 -1.442695, %v1799_v57  ;;  %v1801_v44 = vpop.f32.mrb[98].mxu1 }
 0x2fd   :  { %v6278_v11 = vpop.eup %6277  ;;  %v3064_v22 = vmul.f32 %v6276_v26, %v8105_v16  ;;  %6297 = vpow2.f32 %v4638_v34  ;;  %v4642_v7 = vmul.f32 -1.442695, %v1801_v44  ;;  %v1803_v35 = vpop.f32.mrb[99].mxu1 }
 0x2fe   :  { %v6280_v20 = vpop.eup %6279  ;;  %v5215_v53 = vpack.c.bf16 %v3063_v6, %v3061_v31  ;;  %v3065_v41 = vmul.f32 %v6278_v11, %v8112_v39  ;;  %6299 = vpow2.f32 %v4639_v3  ;;  %v4643_v12 = vmul.f32 -1.442695, %v1803_v35 }
 0x2ff   :  { %v6282_v30 = vpop.eup %6281  ;;  %v5375_v5 = vpack.c.bf16 %v3064_v22, %v3062_v23  ;;  %v3066_v8 = vmul.f32 %v6280_v20, %v8115_v46  ;;  %6301 = vpow2.f32 %v4640_v62 }
 0x300   :  { %v6284_v36 = vpop.eup %6283  ;;  %5643 = vst [vmem:[#allocation7 + $0x60] sm:$0xff] %v5215_v53   ;;  %v2687_v21 = vadd.f32 1.0, %v6282_v30  ;;  %6303 = vpow2.f32 %v4641_v1 }
 0x301   :  { %v6286_v24 = vpop.eup %6285  ;;  %5674 = vst [vmem:[#allocation8 + $0x60] sm:$0xff] %v5375_v5   ;;  %v2688_v16 = vadd.f32 1.0, %v6284_v36  ;;  %6305 = vpow2.f32 %v4642_v7 }
 0x302   :  { %v6288_v38 = vpop.eup %6287  ;;  %6307 = vrcp.f32 %v2687_v21  ;;  %v2689_v17 = vadd.f32 1.0, %v6286_v24 }
 0x303   :  { %v6290_v63 = vpop.eup %6289  ;;  %6309 = vrcp.f32 %v2688_v16  ;;  %v2690_v39 = vadd.f32 1.0, %v6288_v38 }
 0x304   :  { %v6292_v0 = vpop.eup %6291  ;;  %v3067_v2 = vmul.f32 %v6290_v63, %v8118_v58  ;;  %6311 = vrcp.f32 %v2689_v17 }
 0x305   :  { %v6294_v46 = vpop.eup %6293  ;;  %v3068_v42 = vmul.f32 %v6292_v0, %v8121_v55  ;;  %6313 = vrcp.f32 %v2690_v39 }
 0x306   :  { %v6296_v14 = vpop.eup %6295  ;;  %v5220_v40 = vpack.c.bf16 %v3067_v2, %v3065_v41  ;;  %v3069_v18 = vmul.f32 %v6294_v46, %v8127_v43  ;;  %6315 = vpow2.f32 %v4643_v12 }
 0x307   :  { %v6298_v9 = vpop.eup %6297  ;;  %v5380_v28 = vpack.c.bf16 %v3068_v42, %v3066_v8  ;;  %v3070_v48 = vmul.f32 %v6296_v14, %v8130_v49 }
 0x308   :  { %v6300_v31 = vpop.eup %6299  ;;  %5644 = vst [vmem:[#allocation7 + $0x68] sm:$0xff] %v5220_v40   ;;  %v2691_v50 = vadd.f32 1.0, %v6298_v9 }
 0x309   :  { %v6302_v33 = vpop.eup %6301  ;;  %5675 = vst [vmem:[#allocation8 + $0x68] sm:$0xff] %v5380_v28   ;;  %v2692_v58 = vadd.f32 1.0, %v6300_v31 }
 0x30a   :  { %v6304_v37 = vpop.eup %6303  ;;  %6317 = vrcp.f32 %v2691_v50  ;;  %v2693_v25 = vadd.f32 1.0, %v6302_v33 }
 0x30b   :  { %v6306_v55 = vpop.eup %6305  ;;  %6319 = vrcp.f32 %v2692_v58  ;;  %v2694_v51 = vadd.f32 1.0, %v6304_v37 }
 0x30c   :  { %v6308_v29 = vpop.eup %6307  ;;  %6321 = vrcp.f32 %v2693_v25  ;;  %v2695_v43 = vadd.f32 1.0, %v6306_v55 }
 0x30d   :  { %v6310_v13 = vpop.eup %6309  ;;  %v3071_v49 = vmul.f32 %v6308_v29, %v8133_v19  ;;  %6323 = vrcp.f32 %v2694_v51 }
 0x30e   :  { %v8211_v27 = vpop.f32.mrb[68].mxu0  ;;  %v1807_v34 = vpop.f32.mrb[100].mxu1  ;;  %v3072_v23 = vmul.f32 %v6310_v13, %v8136_v10  ;;  %6325 = vrcp.f32 %v2695_v43 }
 0x30f   :  { %v4644_v61 = vmul.f32 -1.442695, %v1807_v34  ;;  %v8214_v3 = vpop.f32.mrb[69].mxu0  ;;  %v1809_v47 = vpop.f32.mrb[101].mxu1  ;;  %v5225_v1 = vpack.c.bf16 %v3071_v49, %v3069_v18 }
 0x310   :  { %v6312_v45 = vpop.eup %6311  ;;  %v4645_v62 = vmul.f32 -1.442695, %v1809_v47  ;;  %v8217_v57 = vpop.f32.mrb[70].mxu0  ;;  %v5385_v35 = vpack.c.bf16 %v3072_v23, %v3070_v48 }
 0x311   :  { %v1811_v26 = vpop.f32.mrb[102].mxu1  ;;  %v6314_v6 = vpop.eup %6313  ;;  %v3073_v44 = vmul.f32 %v6312_v45, %v8140_v59  ;;  %6327 = vpow2.f32 %v4644_v61  ;;  %5645 = vst [vmem:[#allocation7 + $0x70] sm:$0xff] %v5225_v1  }
 0x312   :  { %v4646_v11 = vmul.f32 -1.442695, %v1811_v26  ;;  %v8220_v19 = vpop.f32.mrb[71].mxu0  ;;  %v1813_v22 = vpop.f32.mrb[103].mxu1  ;;  %v3074_v20 = vmul.f32 %v6314_v6, %v8143_v4  ;;  %6329 = vpow2.f32 %v4645_v62  ;;  %5676 = vst [vmem:[#allocation8 + $0x70] sm:$0xff] %v5385_v35  }
 0x313   :  { %v6316_v7 = vpop.eup %6315  ;;  %v4647_v10 = vmul.f32 -1.442695, %v1813_v22 }
 0x314   :  { %v2696_v53 = vadd.f32 1.0, %v6316_v7  ;;  %6331 = vpow2.f32 %v4646_v11  ;;  %v6318_v41 = vpop.eup %6317 }
 0x315   :  { %6333 = vpow2.f32 %v4647_v10  ;;  %v6320_v5 = vpop.eup %6319  ;;  %v3075_v8 = vmul.f32 %v6318_v41, %v8146_v32 }
 0x316   :  { %6335 = vrcp.f32 %v2696_v53  ;;  %v8223_v30 = vpop.f32.mrb[72].mxu0  ;;  %v1817_v59 = vpop.f32.mrb[104].mxu1  ;;  %v3076_v16 = vmul.f32 %v6320_v5, %v8149_v52 }
 0x317   :  { %v4648_v36 = vmul.f32 -1.442695, %v1817_v59  ;;  %v8226_v21 = vpop.f32.mrb[73].mxu0  ;;  %v1819_v24 = vpop.f32.mrb[105].mxu1  ;;  %v5230_v39 = vpack.c.bf16 %v3075_v8, %v3073_v44 }
 0x318   :  { %v6322_v4 = vpop.eup %6321  ;;  %v4649_v38 = vmul.f32 -1.442695, %v1819_v24  ;;  %v8229_v17 = vpop.f32.mrb[74].mxu0  ;;  %v5390_v14 = vpack.c.bf16 %v3076_v16, %v3074_v20 }
 0x319   :  { %v1821_v12 = vpop.f32.mrb[106].mxu1  ;;  %v6324_v63 = vpop.eup %6323  ;;  %v3077_v0 = vmul.f32 %v6322_v4, %v8154_v54  ;;  %6337 = vpow2.f32 %v4648_v36  ;;  %5646 = vst [vmem:[#allocation7 + $0x78] sm:$0xff] %v5230_v39  }
 0x31a   :  { %v4650_v2 = vmul.f32 -1.442695, %v1821_v12  ;;  %v8232_v46 = vpop.f32.mrb[75].mxu0  ;;  %v1823_v32 = vpop.f32.mrb[107].mxu1  ;;  %v3078_v40 = vmul.f32 %v6324_v63, %v8157_v60  ;;  %6339 = vpow2.f32 %v4649_v38  ;;  %5677 = vst [vmem:[#allocation8 + $0x78] sm:$0xff] %v5390_v14  }
 0x31b   :  { %v6326_v42 = vpop.eup %6325  ;;  %v4651_v18 = vmul.f32 -1.442695, %v1823_v32 }
 0x31c   :  { %v6328_v52 = vpop.eup %6327  ;;  %v3079_v9 = vmul.f32 %v6326_v42, %v8160_v15  ;;  %6341 = vpow2.f32 %v4650_v2 }
 0x31d   :  { %v6330_v28 = vpop.eup %6329  ;;  %v2697_v48 = vadd.f32 1.0, %v6328_v52  ;;  %6343 = vpow2.f32 %v4651_v18 }
 0x31e   :  { %v6332_v54 = vpop.eup %6331  ;;  %v5235_v31 = vpack.c.bf16 %v3079_v9, %v3077_v0  ;;  %v2698_v50 = vadd.f32 1.0, %v6330_v28  ;;  %v8236_v37 = vpop.f32.mrb[76].mxu0 }
 0x31f   :  { %v6334_v33 = vpop.eup %6333  ;;  %6345 = vrcp.f32 %v2697_v48  ;;  %v2699_v58 = vadd.f32 1.0, %v6332_v54  ;;  %v1827_v60 = vpop.f32.mrb[108].mxu1 }
 0x320   :  { %v6336_v25 = vpop.eup %6335  ;;  %5647 = vst [vmem:[#allocation7 + $0x80] sm:$0xff] %v5235_v31   ;;  %6347 = vrcp.f32 %v2698_v50  ;;  %v2700_v55 = vadd.f32 1.0, %v6334_v33  ;;  %v4652_v51 = vmul.f32 -1.442695, %v1827_v60  ;;  %v8238_v15 = vpop.f32.mrb[77].mxu0 }
 0x321   :  { %v1829_v29 = vpop.f32.mrb[109].mxu1  ;;  %v3080_v43 = vmul.f32 %v6336_v25, %v8163_v56  ;;  %6349 = vrcp.f32 %v2699_v58  ;;  %v8241_v13 = vpop.f32.mrb[78].mxu0 }
 0x322   :  { %v4653_v34 = vmul.f32 -1.442695, %v1829_v29  ;;  %v1831_v49 = vpop.f32.mrb[110].mxu1  ;;  %6351 = vrcp.f32 %v2700_v55  ;;  %v8243_v47 = vpop.f32.mrb[79].mxu0 }
 0x323   :  { %v4654_v61 = vmul.f32 -1.442695, %v1831_v49  ;;  %v1833_v45 = vpop.f32.mrb[111].mxu1  ;;  %v5395_v23 = vpack.c.bf16 %v3080_v43, %v3078_v40  ;;  %6353 = vpow2.f32 %v4652_v51  ;;  %v6338_v26 = vpop.eup %6337 }
 0x324   :  { %v4655_v62 = vmul.f32 -1.442695, %v1833_v45  ;;  %6355 = vpow2.f32 %v4653_v34  ;;  %v6340_v6 = vpop.eup %6339  ;;  %v2701_v1 = vadd.f32 1.0, %v6338_v26 }
 0x325   :  { %5678 = vst [vmem:[#allocation8 + $0x80] sm:$0xff] %v5395_v23   ;;  %6357 = vpow2.f32 %v4654_v61  ;;  %v2702_v44 = vadd.f32 1.0, %v6340_v6 }
 0x326   :  { %v6342_v56 = vpop.eup %6341  ;;  %6359 = vpow2.f32 %v4655_v62  ;;  %v8245_v7 = vpop.f32.mrb[80].mxu0 }
 0x327   :  { %v6344_v11 = vpop.eup %6343  ;;  %6361 = vrcp.f32 %v2701_v1  ;;  %v2703_v22 = vadd.f32 1.0, %v6342_v56  ;;  %v1837_v35 = vpop.f32.mrb[112].mxu1 }
 0x328   :  { %6363 = vrcp.f32 %v2702_v44  ;;  %v2704_v20 = vadd.f32 1.0, %v6344_v11  ;;  %v4656_v10 = vmul.f32 -1.442695, %v1837_v35  ;;  %v8247_v53 = vpop.f32.mrb[81].mxu0  ;;  %v1839_v41 = vpop.f32.mrb[113].mxu1 }
 0x329   :  { %v6346_v59 = vpop.eup %6345  ;;  %6365 = vrcp.f32 %v2703_v22  ;;  %v4657_v5 = vmul.f32 -1.442695, %v1839_v41  ;;  %v8249_v8 = vpop.f32.mrb[82].mxu0 }
 0x32a   :  { %v1841_v36 = vpop.f32.mrb[114].mxu1  ;;  %v6348_v24 = vpop.eup %6347  ;;  %v3081_v4 = vmul.f32 %v6346_v59, %v8211_v27  ;;  %6367 = vrcp.f32 %v2704_v20 }
 0x32b   :  { %v4658_v16 = vmul.f32 -1.442695, %v1841_v36  ;;  %v8252_v38 = vpop.f32.mrb[83].mxu0  ;;  %v1843_v12 = vpop.f32.mrb[115].mxu1  ;;  %v3082_v39 = vmul.f32 %v6348_v24, %v8214_v3  ;;  %6369 = vpow2.f32 %v4656_v10 }
 0x32c   :  { %v6350_v63 = vpop.eup %6349  ;;  %v4659_v0 = vmul.f32 -1.442695, %v1843_v12  ;;  %6371 = vpow2.f32 %v4657_v5 }
 0x32d   :  { %v6352_v2 = vpop.eup %6351  ;;  %v3083_v32 = vmul.f32 %v6350_v63, %v8217_v57  ;;  %6373 = vpow2.f32 %v4658_v16 }
 0x32e   :  { %v6354_v42 = vpop.eup %6353  ;;  %v3084_v14 = vmul.f32 %v6352_v2, %v8220_v19  ;;  %6375 = vpow2.f32 %v4659_v0  ;;  %v8257_v54 = vpop.f32.mrb[84].mxu0 }
 0x32f   :  { %v6356_v40 = vpop.eup %6355  ;;  %v5240_v27 = vpack.c.bf16 %v3083_v32, %v3081_v4  ;;  %v2705_v18 = vadd.f32 1.0, %v6354_v42  ;;  %v1847_v31 = vpop.f32.mrb[116].mxu1 }
 0x330   :  { %v6358_v52 = vpop.eup %6357  ;;  %v5400_v9 = vpack.c.bf16 %v3084_v14, %v3082_v39  ;;  %v2706_v28 = vadd.f32 1.0, %v6356_v40  ;;  %v4660_v19 = vmul.f32 -1.442695, %v1847_v31  ;;  %v8259_v33 = vpop.f32.mrb[85].mxu0 }
 0x331   :  { %v6360_v48 = vpop.eup %6359  ;;  %5648 = vst [vmem:[#allocation7 + $0x88] sm:$0xff] %v5240_v27   ;;  %6377 = vrcp.f32 %v2705_v18  ;;  %v2707_v3 = vadd.f32 1.0, %v6358_v52  ;;  %v1849_v58 = vpop.f32.mrb[117].mxu1 }
 0x332   :  { %v6362_v57 = vpop.eup %6361  ;;  %5679 = vst [vmem:[#allocation8 + $0x88] sm:$0xff] %v5400_v9   ;;  %6379 = vrcp.f32 %v2706_v28  ;;  %v2708_v50 = vadd.f32 1.0, %v6360_v48  ;;  %v4661_v55 = vmul.f32 -1.442695, %v1849_v58  ;;  %v8262_v51 = vpop.f32.mrb[86].mxu0 }
 0x333   :  { %v6364_v60 = vpop.eup %6363  ;;  %v3085_v25 = vmul.f32 %v6362_v57, %v8223_v30  ;;  %6381 = vrcp.f32 %v2707_v3  ;;  %v1851_v29 = vpop.f32.mrb[118].mxu1 }
 0x334   :  { %v6366_v43 = vpop.eup %6365  ;;  %v3086_v34 = vmul.f32 %v6364_v60, %v8226_v21  ;;  %6383 = vrcp.f32 %v2708_v50  ;;  %v4662_v49 = vmul.f32 -1.442695, %v1851_v29  ;;  %v8265_v61 = vpop.f32.mrb[87].mxu0 }
 0x335   :  { %v1853_v45 = vpop.f32.mrb[119].mxu1  ;;  %v6368_v23 = vpop.eup %6367  ;;  %v3087_v62 = vmul.f32 %v6366_v43, %v8229_v17  ;;  %6385 = vpow2.f32 %v4660_v19 }
 0x336   :  { %v4663_v26 = vmul.f32 -1.442695, %v1853_v45  ;;  %v6370_v6 = vpop.eup %6369  ;;  %v3088_v30 = vmul.f32 %v6368_v23, %v8232_v46  ;;  %6387 = vpow2.f32 %v4661_v55  ;;  %v8269_v10 = vpop.f32.mrb[88].mxu0 }
 0x337   :  { %v6372_v1 = vpop.eup %6371  ;;  %v5245_v56 = vpack.c.bf16 %v3087_v62, %v3085_v25  ;;  %v2709_v44 = vadd.f32 1.0, %v6370_v6  ;;  %6389 = vpow2.f32 %v4662_v49  ;;  %v1857_v17 = vpop.f32.mrb[120].mxu1 }
 0x338   :  { %v6374_v11 = vpop.eup %6373  ;;  %v5405_v21 = vpack.c.bf16 %v3088_v30, %v3086_v34  ;;  %v2710_v22 = vadd.f32 1.0, %v6372_v1  ;;  %6391 = vpow2.f32 %v4663_v26  ;;  %v4664_v46 = vmul.f32 -1.442695, %v1857_v17  ;;  %v8271_v59 = vpop.f32.mrb[89].mxu0 }
 0x339   :  { %v6376_v35 = vpop.eup %6375  ;;  %5649 = vst [vmem:[#allocation7 + $0x90] sm:$0xff] %v5245_v56   ;;  %6393 = vrcp.f32 %v2709_v44  ;;  %v2711_v20 = vadd.f32 1.0, %v6374_v11  ;;  %v1859_v5 = vpop.f32.mrb[121].mxu1 }
 0x33a   :  { %5680 = vst [vmem:[#allocation8 + $0x90] sm:$0xff] %v5405_v21   ;;  %6395 = vrcp.f32 %v2710_v22  ;;  %v2712_v41 = vadd.f32 1.0, %v6376_v35  ;;  %v4665_v24 = vmul.f32 -1.442695, %v1859_v5  ;;  %v8273_v4 = vpop.f32.mrb[90].mxu0  ;;  %v1861_v16 = vpop.f32.mrb[122].mxu1 }
 0x33b   :  { %v6378_v36 = vpop.eup %6377  ;;  %6397 = vrcp.f32 %v2711_v20  ;;  %v4666_v39 = vmul.f32 -1.442695, %v1861_v16  ;;  %v8276_v0 = vpop.f32.mrb[91].mxu0 }
 0x33c   :  { %v6380_v12 = vpop.eup %6379  ;;  %v3089_v63 = vmul.f32 %v6378_v36, %v8236_v37  ;;  %6399 = vrcp.f32 %v2712_v41  ;;  %v1863_v2 = vpop.f32.mrb[123].mxu1 }
 0x33d   :  { %v6382_v32 = vpop.eup %6381  ;;  %v3090_v42 = vmul.f32 %v6380_v12, %v8238_v15  ;;  %6401 = vpow2.f32 %v4664_v46  ;;  %v4667_v14 = vmul.f32 -1.442695, %v1863_v2 }
 0x33e   :  { %v6384_v40 = vpop.eup %6383  ;;  %v3091_v27 = vmul.f32 %v6382_v32, %v8241_v13  ;;  %6403 = vpow2.f32 %v4665_v24  ;;  %v8281_v57 = vpop.f32.mrb[92].mxu0 }
 0x33f   :  { %v6386_v18 = vpop.eup %6385  ;;  %v3092_v52 = vmul.f32 %v6384_v40, %v8243_v47  ;;  %6405 = vpow2.f32 %v4666_v39  ;;  %v1867_v15 = vpop.f32.mrb[124].mxu1 }
 0x340   :  { %v6388_v9 = vpop.eup %6387  ;;  %v5250_v37 = vpack.c.bf16 %v3091_v27, %v3089_v63  ;;  %v2713_v28 = vadd.f32 1.0, %v6386_v18  ;;  %6407 = vpow2.f32 %v4667_v14  ;;  %v4668_v13 = vmul.f32 -1.442695, %v1867_v15  ;;  %v8283_v58 = vpop.f32.mrb[93].mxu0 }
 0x341   :  { %v6390_v48 = vpop.eup %6389  ;;  %v5410_v3 = vpack.c.bf16 %v3092_v52, %v3090_v42  ;;  %v2714_v31 = vadd.f32 1.0, %v6388_v9  ;;  %v1869_v60 = vpop.f32.mrb[125].mxu1 }
 0x342   :  { %v6392_v50 = vpop.eup %6391  ;;  %5650 = vst [vmem:[#allocation7 + $0x98] sm:$0xff] %v5250_v37   ;;  %6409 = vrcp.f32 %v2713_v28  ;;  %v2715_v19 = vadd.f32 1.0, %v6390_v48  ;;  %v4669_v55 = vmul.f32 -1.442695, %v1869_v60  ;;  %v8285_v29 = vpop.f32.mrb[94].mxu0 }
 0x343   :  { %v6394_v47 = vpop.eup %6393  ;;  %5681 = vst [vmem:[#allocation8 + $0x98] sm:$0xff] %v5410_v3   ;;  %6411 = vrcp.f32 %v2714_v31  ;;  %v2716_v25 = vadd.f32 1.0, %v6392_v50  ;;  %v1871_v43 = vpop.f32.mrb[126].mxu1 }
 0x344   :  { %v6396_v34 = vpop.eup %6395  ;;  %v3093_v49 = vmul.f32 %v6394_v47, %v8245_v7  ;;  %6413 = vrcp.f32 %v2715_v19  ;;  %v4670_v45 = vmul.f32 -1.442695, %v1871_v43  ;;  %v8288_v23 = vpop.f32.mrb[95].mxu0 }
 0x345   :  { %v1873_v62 = vpop.f32.mrb[127].mxu1  ;;  %v6398_v26 = vpop.eup %6397  ;;  %v3094_v6 = vmul.f32 %v6396_v34, %v8247_v53  ;;  %6415 = vrcp.f32 %v2716_v25 }
 0x346   :  { %v4671_v30 = vmul.f32 -1.442695, %v1873_v62  ;;  %v6400_v1 = vpop.eup %6399  ;;  %v3095_v56 = vmul.f32 %v6398_v26, %v8249_v8  ;;  %6417 = vpow2.f32 %v4668_v13  ;;  %v1877_v41 = vpop.f32.mrb[128].mxu1 }
 0x347   :  { %v6402_v44 = vpop.eup %6401  ;;  %v3096_v11 = vmul.f32 %v6400_v1, %v8252_v38  ;;  %6419 = vpow2.f32 %v4669_v55  ;;  %v5783_v53 = vpop.f32.mrb[96].mxu0  ;;  %v4672_v8 = vmul.f32 -1.442695, %v1877_v41 }
 0x348   :  { %v6404_v21 = vpop.eup %6403  ;;  %v5255_v7 = vpack.c.bf16 %v3095_v56, %v3093_v49  ;;  %v2717_v22 = vadd.f32 1.0, %v6402_v44  ;;  %6421 = vpow2.f32 %v4670_v45  ;;  %v1879_v36 = vpop.f32.mrb[129].mxu1  ;;  %v4834_v24 = vmul.f32 -1.442695, %v5783_v53 }
 0x349   :  { %v6406_v35 = vpop.eup %6405  ;;  %v5415_v20 = vpack.c.bf16 %v3096_v11, %v3094_v6  ;;  %v2718_v17 = vadd.f32 1.0, %v6404_v21  ;;  %6423 = vpow2.f32 %v4671_v30  ;;  %v1990_v16 = vpop.f32.mrb[97].mxu0  ;;  %v4673_v39 = vmul.f32 -1.442695, %v1879_v36 }
 0x34a   :  { %v6408_v46 = vpop.eup %6407  ;;  %5651 = vst [vmem:[#allocation7 + $0xa0] sm:$0xff] %v5255_v7   ;;  %6425 = vrcp.f32 %v2717_v22  ;;  %v2719_v5 = vadd.f32 1.0, %v6406_v35  ;;  %v1881_v12 = vpop.f32.mrb[130].mxu1  ;;  %v4832_v40 = vmul.f32 -1.442695, %v1990_v16 }
 0x34b   :  { %5682 = vst [vmem:[#allocation8 + $0xa0] sm:$0xff] %v5415_v20   ;;  %6427 = vrcp.f32 %v2718_v17  ;;  %v2720_v38 = vadd.f32 1.0, %v6408_v46  ;;  %v5784_v2 = vpop.f32.mrb[98].mxu0  ;;  %v1883_v32 = vpop.f32.mrb[131].mxu1  ;;  %v4674_v9 = vmul.f32 -1.442695, %v1881_v12 }
 0x34c   :  { %v6410_v63 = vpop.eup %6409  ;;  %6429 = vrcp.f32 %v2719_v5  ;;  %v1993_v27 = vpop.f32.mrb[99].mxu0  ;;  %v4835_v43 = vmul.f32 -1.442695, %v5784_v2  ;;  %v4675_v45 = vmul.f32 -1.442695, %v1883_v32 }
 0x34d   :  { %v6412_v42 = vpop.eup %6411  ;;  %v3097_v14 = vmul.f32 %v6410_v63, %v8257_v54  ;;  %6431 = vrcp.f32 %v2720_v38  ;;  %v4833_v30 = vmul.f32 -1.442695, %v1993_v27 }
 0x34e   :  { %v6414_v18 = vpop.eup %6413  ;;  %v3098_v52 = vmul.f32 %v6412_v42, %v8259_v33  ;;  %6433 = vpow2.f32 %v4672_v8  ;;  %v1887_v54 = vpop.f32.mrb[132].mxu1 }
 0x34f   :  { %v6416_v37 = vpop.eup %6415  ;;  %v3099_v28 = vmul.f32 %v6414_v18, %v8262_v51  ;;  %6435 = vpow2.f32 %v4834_v24  ;;  %v5787_v19 = vpop.f32.mrb[100].mxu0  ;;  %v4676_v21 = vmul.f32 -1.442695, %v1887_v54 }
 0x350   :  { %v6418_v48 = vpop.eup %6417  ;;  %v3100_v3 = vmul.f32 %v6416_v37, %v8265_v61  ;;  %6437 = vpow2.f32 %v4673_v39  ;;  %v1889_v33 = vpop.f32.mrb[133].mxu1  ;;  %v4838_v63 = vmul.f32 -1.442695, %v5787_v19 }
 0x351   :  { %v6420_v31 = vpop.eup %6419  ;;  %v5260_v15 = vpack.c.bf16 %v3099_v28, %v3097_v14  ;;  %v2721_v50 = vadd.f32 1.0, %v6418_v48  ;;  %6439 = vpow2.f32 %v4832_v40  ;;  %v2006_v25 = vpop.f32.mrb[101].mxu0  ;;  %v4677_v42 = vmul.f32 -1.442695, %v1889_v33 }
 0x352   :  { %v6422_v13 = vpop.eup %6421  ;;  %v5420_v60 = vpack.c.bf16 %v3100_v3, %v3098_v52  ;;  %v2722_v47 = vadd.f32 1.0, %v6420_v31  ;;  %6441 = vpow2.f32 %v4674_v9  ;;  %v1891_v34 = vpop.f32.mrb[134].mxu1  ;;  %v4836_v52 = vmul.f32 -1.442695, %v2006_v25 }
 0x353   :  { %v6424_v55 = vpop.eup %6423  ;;  %5652 = vst [vmem:[#allocation7 + $0xa8] sm:$0xff] %v5260_v15   ;;  %6443 = vrcp.f32 %v2721_v50  ;;  %v2723_v51 = vadd.f32 1.0, %v6422_v13  ;;  %v8297_v62 = vpop.f32.mrb[102].mxu0  ;;  %v4678_v28 = vmul.f32 -1.442695, %v1891_v34 }
 0x354   :  { %v6426_v61 = vpop.eup %6425  ;;  %5683 = vst [vmem:[#allocation8 + $0xa8] sm:$0xff] %v5420_v60   ;;  %6445 = vrcp.f32 %v2722_v47  ;;  %v2724_v49 = vadd.f32 1.0, %v6424_v55  ;;  %v8300_v1 = vpop.f32.mrb[135].mxu1 }
 0x355   :  { %v6428_v26 = vpop.eup %6427  ;;  %v3101_v6 = vmul.f32 %v6426_v61, %v8269_v10  ;;  %6447 = vrcp.f32 %v2723_v51  ;;  %v8302_v56 = vpop.f32.mrb[103].mxu0 }
 0x356   :  { %v6430_v44 = vpop.eup %6429  ;;  %v3102_v11 = vmul.f32 %v6428_v26, %v8271_v59  ;;  %6449 = vrcp.f32 %v2724_v49  ;;  %v8307_v53 = vpop.f32.mrb[136].mxu1 }
 0x357   :  { %v6432_v7 = vpop.eup %6431  ;;  %v3103_v22 = vmul.f32 %v6430_v44, %v8273_v4  ;;  %6451 = vpow2.f32 %v4835_v43  ;;  %v8309_v46 = vpop.f32.mrb[104].mxu0  ;;  %v4839_v43 = vmul.f32 -1.442695, %v8297_v62  ;;  %v4680_v62 = vmul.f32 -1.442695, %v8307_v53 }
 0x358   :  { %v6434_v35 = vpop.eup %6433  ;;  %v3104_v20 = vmul.f32 %v6432_v7, %v8276_v0  ;;  %6453 = vpow2.f32 %v4675_v45  ;;  %v8311_v36 = vpop.f32.mrb[137].mxu1  ;;  %v4679_v45 = vmul.f32 -1.442695, %v8300_v1 }
 0x359   :  { %v6436_v10 = vpop.eup %6435  ;;  %v5265_v17 = vpack.c.bf16 %v3103_v22, %v3101_v6  ;;  %v2725_v41 = vadd.f32 1.0, %v6434_v35  ;;  %6455 = vpow2.f32 %v4833_v30  ;;  %v8313_v4 = vpop.f32.mrb[105].mxu0  ;;  %v8789_v30 = vld [vmem:[#allocation15_spill] sm:$0xff]  ;;  %v8790_v22 = vld [vmem:[#allocation21_spill] sm:$0xff] }
 0x35a   :  { %v6438_v5 = vpop.eup %6437  ;;  %v5425_v59 = vpack.c.bf16 %v3104_v20, %v3102_v11  ;;  %v3975_v8 = vadd.f32 1.0, %v6436_v10  ;;  %6457 = vpow2.f32 %v4676_v21  ;;  %v8315_v24 = vpop.f32.mrb[138].mxu1  ;;  %v4837_v11 = vmul.f32 -1.442695, %v8302_v56 }
 0x35b   :  { %v6440_v38 = vpop.eup %6439  ;;  %5653 = vst [vmem:[#allocation7 + $0xb0] sm:$0xff] %v5265_v17   ;;  %6459 = vrcp.f32 %v2725_v41  ;;  %v2726_v0 = vadd.f32 1.0, %v6438_v5  ;;  %v8317_v39 = vpop.f32.mrb[106].mxu0  ;;  %v4842_v20 = vmul.f32 -1.442695, %v8309_v46  ;;  %v8791_v5 = vld [vmem:[#allocation16_spill] sm:$0xff] }
 0x35c   :  { %v6442_v16 = vpop.eup %6441  ;;  %5684 = vst [vmem:[#allocation8 + $0xb0] sm:$0xff] %v5425_v59   ;;  %6461 = vrcp.f32 %v3975_v8  ;;  %v3973_v12 = vadd.f32 1.0, %v6440_v38  ;;  %v8319_v14 = vpop.f32.mrb[139].mxu1 }
 0x35d   :  { %v6444_v2 = vpop.eup %6443  ;;  %6463 = vrcp.f32 %v2726_v0  ;;  %v2727_v32 = vadd.f32 1.0, %v6442_v16  ;;  %v8321_v40 = vpop.f32.mrb[107].mxu0 }
 0x35e   :  { %v6446_v27 = vpop.eup %6445  ;;  %v3105_v18 = vmul.f32 %v6444_v2, %v8281_v57  ;;  %6465 = vrcp.f32 %v3973_v12  ;;  %v8327_v50 = vpop.f32.mrb[140].mxu1 }
 0x35f   :  { %v6448_v9 = vpop.eup %6447  ;;  %v3106_v37 = vmul.f32 %v6446_v27, %v8283_v58  ;;  %6467 = vrcp.f32 %v2727_v32  ;;  %v8329_v54 = vpop.f32.mrb[108].mxu0  ;;  %v4681_v27 = vmul.f32 -1.442695, %v8311_v36 }
 0x360   :  { %v6450_v48 = vpop.eup %6449  ;;  %v3107_v3 = vmul.f32 %v6448_v9, %v8285_v29  ;;  %6469 = vpow2.f32 %v4838_v63  ;;  %v8331_v60 = vpop.f32.mrb[141].mxu1 }
 0x361   :  { %v6452_v31 = vpop.eup %6451  ;;  %v3108_v15 = vmul.f32 %v6450_v48, %v8288_v23  ;;  %6471 = vpow2.f32 %v4677_v42  ;;  %v8333_v58 = vpop.f32.mrb[109].mxu0 }
 0x362   :  { %v6454_v57 = vpop.eup %6453  ;;  %v5270_v19 = vpack.c.bf16 %v3107_v3, %v3105_v18  ;;  %v3976_v13 = vadd.f32 1.0, %v6452_v31  ;;  %6473 = vpow2.f32 %v4836_v52  ;;  %v8335_v25 = vpop.f32.mrb[142].mxu1  ;;  %v4682_v3 = vmul.f32 -1.442695, %v8315_v24 }
 0x363   :  { %v6456_v47 = vpop.eup %6455  ;;  %v5430_v33 = vpack.c.bf16 %v3108_v15, %v3106_v37  ;;  %v2728_v29 = vadd.f32 1.0, %v6454_v57  ;;  %6475 = vpow2.f32 %v4678_v28  ;;  %v8337_v23 = vpop.f32.mrb[110].mxu0  ;;  %v4840_v37 = vmul.f32 -1.442695, %v8313_v4  ;;  %v8792_v15 = vld [vmem:[#allocation23_spill] sm:$0xff] }
 0x364   :  { %v6458_v55 = vpop.eup %6457  ;;  %5654 = vst [vmem:[#allocation7 + $0xb8] sm:$0xff] %v5270_v19   ;;  %6477 = vrcp.f32 %v3976_v13  ;;  %v3974_v51 = vadd.f32 1.0, %v6456_v47  ;;  %v8340_v34 = vpop.f32.mrb[143].mxu1  ;;  %v4843_v19 = vmul.f32 -1.442695, %v8317_v39 }
 0x365   :  { %v6460_v61 = vpop.eup %6459  ;;  %5685 = vst [vmem:[#allocation8 + $0xb8] sm:$0xff] %v5430_v33   ;;  %6479 = vrcp.f32 %v2728_v29  ;;  %v2729_v49 = vadd.f32 1.0, %v6458_v55  ;;  %v8343_v26 = vpop.f32.mrb[111].mxu0  ;;  %v8793_v55 = vld [vmem:[#allocation17_spill] sm:$0xff] }
 0x366   :  { %v6462_v6 = vpop.eup %6461  ;;  %v3109_v44 = vmul.f32 %v6460_v61, %v8789_v30  ;;  %6481 = vrcp.f32 %v3974_v51  ;;  %v8350_v1 = vpop.f32.mrb[144].mxu1 }
 0x367   :  { %v6464_v21 = vpop.eup %6463  ;;  %6483 = vrcp.f32 %v2729_v49  ;;  %v8352_v17 = vpop.f32.mrb[112].mxu0 }
 0x368   :  { %v6466_v7 = vpop.eup %6465  ;;  %v3110_v35 = vmul.f32 %v6464_v21, %v8790_v22  ;;  %6485 = vpow2.f32 %v4839_v43  ;;  %v8355_v56 = vpop.f32.mrb[145].mxu1 }
 0x369   :  { %v6468_v10 = vpop.eup %6467  ;;  %6487 = vpow2.f32 %v4679_v45  ;;  %v8357_v8 = vpop.f32.mrb[113].mxu0 }
 0x36a   :  { %v6470_v41 = vpop.eup %6469  ;;  %v3111_v59 = vmul.f32 %v6468_v10, %v8791_v5  ;;  %6489 = vpow2.f32 %v4837_v11  ;;  %v8359_v0 = vpop.f32.mrb[146].mxu1 }
 0x36b   :  { %v6472_v53 = vpop.eup %6471  ;;  %v3979_v38 = vadd.f32 1.0, %v6470_v41  ;;  %6491 = vpow2.f32 %v4680_v62  ;;  %v8361_v63 = vpop.f32.mrb[114].mxu0  ;;  %v4841_v41 = vmul.f32 -1.442695, %v8321_v40 }
 0x36c   :  { %v6474_v46 = vpop.eup %6473  ;;  %v5275_v16 = vpack.c.bf16 %v3111_v59, %v3109_v44  ;;  %v2730_v12 = vadd.f32 1.0, %v6472_v53  ;;  %6493 = vpow2.f32 %v4842_v20  ;;  %v8363_v2 = vpop.f32.mrb[147].mxu1  ;;  %v4684_v59 = vmul.f32 -1.442695, %v8327_v50 }
 0x36d   :  { %v6476_v32 = vpop.eup %6475  ;;  %6495 = vrcp.f32 %v3979_v38  ;;  %v3977_v42 = vadd.f32 1.0, %v6474_v46  ;;  %v8366_v18 = vpop.f32.mrb[115].mxu0  ;;  %v8794_v38 = vld [vmem:[#allocation18_spill] sm:$0xff] }
 0x36e   :  { %v6478_v52 = vpop.eup %6477  ;;  %5655 = vst [vmem:[#allocation7 + $0xc0] sm:$0xff] %v5275_v16   ;;  %6497 = vrcp.f32 %v2730_v12  ;;  %v2731_v9 = vadd.f32 1.0, %v6476_v32  ;;  %v8372_v47 = vpop.f32.mrb[148].mxu1  ;;  %v4846_v16 = vmul.f32 -1.442695, %v8329_v54 }
 0x36f   :  { %v6480_v28 = vpop.eup %6479  ;;  %v5480_v48 = vpack.c.bf16 %v6478_v52, %v6462_v6  ;;  %6499 = vrcp.f32 %v3977_v42  ;;  %v8374_v33 = vpop.f32.mrb[116].mxu0  ;;  %v8795_v52 = vld [vmem:[#allocation19_spill] sm:$0xff] }
 0x370   :  { %v6482_v31 = vpop.eup %6481  ;;  %v3112_v57 = vmul.f32 %v6480_v28, %v8792_v15  ;;  %6501 = vrcp.f32 %v2731_v9  ;;  %v8377_v24 = vpop.f32.mrb[149].mxu1 }
 0x371   :  { %v6484_v36 = vpop.eup %6483  ;;  %5694 = vst [vmem:[#allocation10 + $0x8] sm:$0xff] %v5480_v48   ;;  %v5475_v13 = vpack.c.bf16 %v6482_v31, %v6466_v7  ;;  %6503 = vpow2.f32 %v4681_v27  ;;  %v8379_v43 = vpop.f32.mrb[117].mxu0 }
 0x372   :  { %v6486_v4 = vpop.eup %6485  ;;  %v5435_v29 = vpack.c.bf16 %v3112_v57, %v3110_v35  ;;  %v3113_v51 = vmul.f32 %v6484_v36, %v8793_v55  ;;  %6505 = vpow2.f32 %v4840_v37  ;;  %v8381_v49 = vpop.f32.mrb[150].mxu1  ;;  %v4683_v35 = vmul.f32 -1.442695, %v8319_v14 }
 0x373   :  { %v6488_v61 = vpop.eup %6487  ;;  %5476 = vst [vmem:[#allocation10] sm:$0xff] %v5475_v13   ;;  %v3980_v39 = vadd.f32 1.0, %v6486_v4  ;;  %6507 = vpow2.f32 %v4682_v3  ;;  %v8383_v30 = vpop.f32.mrb[118].mxu0  ;;  %v4685_v13 = vmul.f32 -1.442695, %v8331_v60 }
 0x374   :  { %v6490_v45 = vpop.eup %6489  ;;  %5686 = vst [vmem:[#allocation8 + $0xc0] sm:$0xff] %v5435_v29   ;;  %v2732_v6 = vadd.f32 1.0, %v6488_v61  ;;  %6509 = vpow2.f32 %v4843_v19  ;;  %v8385_v21 = vpop.f32.mrb[151].mxu1  ;;  %v4844_v55 = vmul.f32 -1.442695, %v8333_v58 }
 0x375   :  { %v6492_v44 = vpop.eup %6491  ;;  %6511 = vrcp.f32 %v3980_v39  ;;  %v3978_v11 = vadd.f32 1.0, %v6490_v45  ;;  %v8387_v62 = vpop.f32.mrb[119].mxu0  ;;  %v4687_v58 = vmul.f32 -1.442695, %v8340_v34 }
 0x376   :  { %v6494_v7 = vpop.eup %6493  ;;  %6513 = vrcp.f32 %v2732_v6  ;;  %v2733_v22 = vadd.f32 1.0, %v6492_v44  ;;  %v8394_v12 = vpop.f32.mrb[152].mxu1  ;;  %v8796_v6 = vld [vmem:[#allocation20_spill] sm:$0xff] }
 0x377   :  { %v6496_v20 = vpop.eup %6495  ;;  %6515 = vrcp.f32 %v3978_v11  ;;  %v3983_v10 = vadd.f32 1.0, %v6494_v7  ;;  %v8396_v32 = vpop.f32.mrb[120].mxu0  ;;  %v4847_v11 = vmul.f32 -1.442695, %v8337_v23 }
 0x378   :  { %v6498_v5 = vpop.eup %6497  ;;  %6517 = vrcp.f32 %v2733_v22  ;;  %v8398_v42 = vpop.f32.mrb[153].mxu1 }
 0x379   :  { %v6500_v53 = vpop.eup %6499  ;;  %v3114_v46 = vmul.f32 %v6498_v5, %v8794_v38  ;;  %6519 = vrcp.f32 %v3983_v10  ;;  %v8400_v27 = vpop.f32.mrb[121].mxu0  ;;  %v8797_v5 = vld [vmem:[#allocation22_spill] sm:$0xff] }
 0x37a   :  { %v6502_v14 = vpop.eup %6501  ;;  %6521 = vpow2.f32 %v4683_v35  ;;  %v8403_v50 = vpop.f32.mrb[154].mxu1 }
 0x37b   :  { %v6504_v40 = vpop.eup %6503  ;;  %v3115_v9 = vmul.f32 %v6502_v14, %v8795_v52  ;;  %6523 = vpow2.f32 %v4841_v41  ;;  %v8405_v37 = vpop.f32.mrb[122].mxu0 }
 0x37c   :  { %v6506_v28 = vpop.eup %6505  ;;  %v2734_v54 = vadd.f32 1.0, %v6504_v40  ;;  %6525 = vpow2.f32 %v4684_v59  ;;  %v8407_v48 = vpop.f32.mrb[155].mxu1 }
 0x37d   :  { %v6508_v3 = vpop.eup %6507  ;;  %v5280_v31 = vpack.c.bf16 %v3115_v9, %v3113_v51  ;;  %v3981_v15 = vadd.f32 1.0, %v6506_v28  ;;  %6527 = vpow2.f32 %v4846_v16  ;;  %v8409_v57 = vpop.f32.mrb[123].mxu0  ;;  %v4686_v51 = vmul.f32 -1.442695, %v8335_v25 }
 0x37e   :  { %v6510_v19 = vpop.eup %6509  ;;  %6529 = vrcp.f32 %v2734_v54  ;;  %v2735_v36 = vadd.f32 1.0, %v6508_v3  ;;  %v8416_v7 = vpop.f32.mrb[156].mxu1  ;;  %v4845_v54 = vmul.f32 -1.442695, %v8343_v26 }
 0x37f   :  { %v6512_v4 = vpop.eup %6511  ;;  %5656 = vst [vmem:[#allocation7 + $0xc8] sm:$0xff] %v5280_v31   ;;  %6531 = vrcp.f32 %v3981_v15  ;;  %v3984_v29 = vadd.f32 1.0, %v6510_v19  ;;  %v8418_v60 = vpop.f32.mrb[124].mxu0  ;;  %v4688_v15 = vmul.f32 -1.442695, %v8350_v1 }
 0x380   :  { %v6514_v61 = vpop.eup %6513  ;;  %v5490_v39 = vpack.c.bf16 %v6512_v4, %v6496_v20  ;;  %6533 = vrcp.f32 %v2735_v36  ;;  %v8421_v20 = vpop.f32.mrb[157].mxu1  ;;  %v8798_v36 = vld [vmem:[#allocation24_spill] sm:$0xff]  ;;  %v4850_v4 = vmul.f32 -1.442695, %v8352_v17 }
 0x381   :  { %v6516_v45 = vpop.eup %6515  ;;  %v3116_v44 = vmul.f32 %v6514_v61, %v8796_v6  ;;  %6535 = vrcp.f32 %v3984_v29  ;;  %v8423_v10 = vpop.f32.mrb[125].mxu0  ;;  %v4689_v61 = vmul.f32 -1.442695, %v8355_v56 }
 0x382   :  { %v6518_v22 = vpop.eup %6517  ;;  %5696 = vst [vmem:[#allocation10 + $0x18] sm:$0xff] %v5490_v39   ;;  %v5485_v35 = vpack.c.bf16 %v6516_v45, %v6500_v53  ;;  %6537 = vpow2.f32 %v4685_v13  ;;  %v8426_v23 = vpop.f32.mrb[158].mxu1 }
 0x383   :  { %v6520_v25 = vpop.eup %6519  ;;  %v5440_v41 = vpack.c.bf16 %v3116_v44, %v3114_v46  ;;  %v3117_v59 = vmul.f32 %v6518_v22, %v8797_v5  ;;  %6539 = vpow2.f32 %v4844_v55  ;;  %v8428_v38 = vpop.f32.mrb[126].mxu0 }
 0x384   :  { %v6522_v16 = vpop.eup %6521  ;;  %5695 = vst [vmem:[#allocation10 + $0x10] sm:$0xff] %v5485_v35   ;;  %6541 = vpow2.f32 %v4686_v51  ;;  %v8430_v34 = vpop.f32.mrb[159].mxu1  ;;  %v8799_v51 = vld [vmem:[#allocation25_spill] sm:$0xff] }
 0x385   :  { %v6524_v53 = vpop.eup %6523  ;;  %5687 = vst [vmem:[#allocation8 + $0xc8] sm:$0xff] %v5440_v41   ;;  %v2736_v14 = vadd.f32 1.0, %v6522_v16  ;;  %6543 = vpow2.f32 %v4847_v11  ;;  %v8432_v40 = vpop.f32.mrb[127].mxu0 }
 0x386   :  { %v6526_v52 = vpop.eup %6525  ;;  %v3982_v46 = vadd.f32 1.0, %v6524_v53  ;;  %6545 = vpow2.f32 %v4687_v58  ;;  %v8438_v29 = vpop.f32.mrb[128].mxu0 }
 0x387   :  { %v6528_v9 = vpop.eup %6527  ;;  %6547 = vrcp.f32 %v2736_v14  ;;  %v2737_v28 = vadd.f32 1.0, %v6526_v52  ;;  %v8441_v39 = vpop.f32.mrb[129].mxu0 }
 0x388   :  { %v6530_v3 = vpop.eup %6529  ;;  %6549 = vrcp.f32 %v3982_v46  ;;  %v3987_v31 = vadd.f32 1.0, %v6528_v9  ;;  %v8444_v6 = vpop.f32.mrb[130].mxu0 }
 0x389   :  { %v6532_v19 = vpop.eup %6531  ;;  %v3118_v13 = vmul.f32 %v6530_v3, %v8798_v36  ;;  %6551 = vrcp.f32 %v2737_v28  ;;  %v8446_v11 = vpop.f32.mrb[131].mxu0  ;;  %v8800_v28 = vld [vmem:[#allocation26_spill] sm:$0xff]  ;;  %v4851_v3 = vmul.f32 -1.442695, %v8361_v63 }
 0x38a   :  { %v6534_v55 = vpop.eup %6533  ;;  %6553 = vrcp.f32 %v3987_v31 }
 0x38b   :  { %v6536_v26 = vpop.eup %6535  ;;  %v3119_v45 = vmul.f32 %v6534_v55, %v8799_v51  ;;  %6555 = vpow2.f32 %v4845_v54 }
 0x38c   :  { %v6538_v1 = vpop.eup %6537  ;;  %v5500_v44 = vpack.c.bf16 %v6536_v26, %v6520_v25  ;;  %6557 = vpow2.f32 %v4688_v15  ;;  %v4848_v25 = vmul.f32 -1.442695, %v8357_v8  ;;  %v4691_v8 = vmul.f32 -1.442695, %v8363_v2 }
 0x38d   :  { %v6540_v17 = vpop.eup %6539  ;;  %v5285_v22 = vpack.c.bf16 %v3119_v45, %v3117_v59  ;;  %v2738_v35 = vadd.f32 1.0, %v6538_v1  ;;  %6559 = vpow2.f32 %v4850_v4  ;;  %v4690_v59 = vmul.f32 -1.442695, %v8359_v0  ;;  %v8801_v0 = vld [vmem:[#allocation27_spill] sm:$0xff] }
 0x38e   :  { %v6542_v58 = vpop.eup %6541  ;;  %5698 = vst [vmem:[#allocation10 + $0x28] sm:$0xff] %v5500_v44   ;;  %v3985_v56 = vadd.f32 1.0, %v6540_v17  ;;  %6561 = vpow2.f32 %v4689_v61  ;;  %v8450_v46 = vpop.f32.mrb[132].mxu0 }
 0x38f   :  { %v6544_v41 = vpop.eup %6543  ;;  %5657 = vst [vmem:[#allocation7 + $0xd0] sm:$0xff] %v5285_v22   ;;  %6563 = vrcp.f32 %v2738_v35  ;;  %v2739_v5 = vadd.f32 1.0, %v6542_v58  ;;  %v8454_v31 = vpop.f32.mrb[133].mxu0  ;;  %v4692_v58 = vmul.f32 -1.442695, %v8372_v47 }
 0x390   :  { %v6546_v16 = vpop.eup %6545  ;;  %6565 = vrcp.f32 %v3985_v56  ;;  %v3988_v53 = vadd.f32 1.0, %v6544_v41  ;;  %v8457_v4 = vpop.f32.mrb[134].mxu0  ;;  %v4852_v47 = vmul.f32 -1.442695, %v8379_v43 }
 0x391   :  { %v6548_v14 = vpop.eup %6547  ;;  %6567 = vrcp.f32 %v2739_v5  ;;  %v2740_v52 = vadd.f32 1.0, %v6546_v16  ;;  %v8460_v51 = vpop.f32.mrb[135].mxu0  ;;  %v8802_v5 = vld [vmem:[#allocation28_spill] sm:$0xff] }
 0x392   :  { %v6550_v9 = vpop.eup %6549  ;;  %v3120_v54 = vmul.f32 %v6548_v14, %v8800_v28  ;;  %6569 = vrcp.f32 %v3988_v53  ;;  %v4854_v53 = vmul.f32 -1.442695, %v8374_v33 }
 0x393   :  { %v6552_v15 = vpop.eup %6551  ;;  %v5495_v36 = vpack.c.bf16 %v6550_v9, %v6532_v19  ;;  %6571 = vrcp.f32 %v2740_v52  ;;  %v4693_v52 = vmul.f32 -1.442695, %v8377_v24  ;;  %v8803_v9 = vld [vmem:[#allocation31_spill] sm:$0xff] }
 0x394   :  { %v6554_v55 = vpop.eup %6553  ;;  %v5445_v61 = vpack.c.bf16 %v3120_v54, %v3118_v13  ;;  %v3121_v26 = vmul.f32 %v6552_v15, %v8801_v0  ;;  %6573 = vpow2.f32 %v4848_v25  ;;  %v4849_v13 = vmul.f32 -1.442695, %v8366_v18 }
 0x395   :  { %v6556_v45 = vpop.eup %6555  ;;  %5697 = vst [vmem:[#allocation10 + $0x20] sm:$0xff] %v5495_v36   ;;  %6575 = vpow2.f32 %v4690_v59 }
 0x396   :  { %v6558_v63 = vpop.eup %6557  ;;  %5688 = vst [vmem:[#allocation8 + $0xd0] sm:$0xff] %v5445_v61   ;;  %v3986_v1 = vadd.f32 1.0, %v6556_v45  ;;  %6577 = vpow2.f32 %v4851_v3  ;;  %v8464_v56 = vpop.f32.mrb[136].mxu0 }
 0x397   :  { %v6560_v19 = vpop.eup %6559  ;;  %v2741_v44 = vadd.f32 1.0, %v6558_v63  ;;  %6579 = vpow2.f32 %v4691_v8  ;;  %v8468_v25 = vpop.f32.mrb[137].mxu0  ;;  %v8804_v8 = vld [vmem:[#allocation29_spill] sm:$0xff] }
 0x398   :  { %v6562_v2 = vpop.eup %6561  ;;  %6581 = vrcp.f32 %v3986_v1  ;;  %v3991_v17 = vadd.f32 1.0, %v6560_v19  ;;  %v8471_v18 = vpop.f32.mrb[138].mxu0 }
 0x399   :  { %v6564_v22 = vpop.eup %6563  ;;  %6583 = vrcp.f32 %v2741_v44  ;;  %v2742_v35 = vadd.f32 1.0, %v6562_v2  ;;  %v8475_v54 = vpop.f32.mrb[139].mxu0 }
 0x39a   :  { %v6566_v41 = vpop.eup %6565  ;;  %v3122_v16 = vmul.f32 %v6564_v22, %v8802_v5  ;;  %6585 = vrcp.f32 %v3991_v17  ;;  %v4855_v17 = vmul.f32 -1.442695, %v8383_v30 }
 0x39b   :  { %v6568_v14 = vpop.eup %6567  ;;  %6587 = vrcp.f32 %v2742_v35 }
 0x39c   :  { %v6570_v59 = vpop.eup %6569  ;;  %v3123_v28 = vmul.f32 %v6568_v14, %v8803_v9  ;;  %6589 = vpow2.f32 %v4849_v13  ;;  %v4853_v14 = vmul.f32 -1.442695, %v8387_v62  ;;  %v8806_v9 = vld [vmem:[#allocation35_spill] sm:$0xff] }
 0x39d   :  { %v6572_v3 = vpop.eup %6571  ;;  %v5510_v15 = vpack.c.bf16 %v6570_v59, %v6554_v55  ;;  %6591 = vpow2.f32 %v4692_v58  ;;  %v4694_v55 = vmul.f32 -1.442695, %v8381_v49  ;;  %v4695_v58 = vmul.f32 -1.442695, %v8385_v21 }
 0x39e   :  { %v6574_v33 = vpop.eup %6573  ;;  %v5290_v36 = vpack.c.bf16 %v3123_v28, %v3121_v26  ;;  %v3124_v61 = vmul.f32 %v6572_v3, %v8804_v8  ;;  %6593 = vpow2.f32 %v4854_v53  ;;  %v8479_v44 = vpop.f32.mrb[140].mxu0  ;;  %v8805_v53 = vld [vmem:[#allocation30_spill] sm:$0xff] }
 0x39f   :  { %v6576_v0 = vpop.eup %6575  ;;  %5700 = vst [vmem:[#allocation10 + $0x38] sm:$0xff] %v5510_v15   ;;  %v3989_v24 = vadd.f32 1.0, %v6574_v33  ;;  %6595 = vpow2.f32 %v4693_v52  ;;  %v8482_v13 = vpop.f32.mrb[141].mxu0 }
 0x3a0   :  { %v6578_v45 = vpop.eup %6577  ;;  %5658 = vst [vmem:[#allocation7 + $0xd8] sm:$0xff] %v5290_v36   ;;  %v5450_v63 = vpack.c.bf16 %v3124_v61, %v3122_v16  ;;  %v2743_v1 = vadd.f32 1.0, %v6576_v0  ;;  %6597 = vpow2.f32 %v4852_v47  ;;  %v8485_v5 = vpop.f32.mrb[142].mxu0  ;;  %v4696_v61 = vmul.f32 -1.442695, %v8394_v12 }
 0x3a1   :  { %v6580_v43 = vpop.eup %6579  ;;  %6599 = vrcp.f32 %v3989_v24  ;;  %v3992_v19 = vadd.f32 1.0, %v6578_v45  ;;  %v8489_v52 = vpop.f32.mrb[143].mxu0  ;;  %v4856_v12 = vmul.f32 -1.442695, %v8400_v27 }
 0x3a2   :  { %v6582_v26 = vpop.eup %6581  ;;  %5689 = vst [vmem:[#allocation8 + $0xd8] sm:$0xff] %v5450_v63   ;;  %6601 = vrcp.f32 %v2743_v1  ;;  %v2744_v2 = vadd.f32 1.0, %v6580_v43  ;;  %v4858_v63 = vmul.f32 -1.442695, %v8396_v32  ;;  %v8808_v32 = vld [vmem:[#allocation37_spill] sm:$0xff] }
 0x3a3   :  { %v6584_v22 = vpop.eup %6583  ;;  %v5505_v35 = vpack.c.bf16 %v6582_v26, %v6566_v41  ;;  %6603 = vrcp.f32 %v3992_v19  ;;  %v4697_v19 = vmul.f32 -1.442695, %v8398_v42 }
 0x3a4   :  { %v6586_v16 = vpop.eup %6585  ;;  %v3125_v49 = vmul.f32 %v6584_v22, %v8805_v53  ;;  %6605 = vrcp.f32 %v2744_v2  ;;  %v8807_v2 = vld [vmem:[#allocation36_spill] sm:$0xff] }
 0x3a5   :  { %v6588_v59 = vpop.eup %6587  ;;  %5699 = vst [vmem:[#allocation10 + $0x30] sm:$0xff] %v5505_v35   ;;  %6607 = vpow2.f32 %v4694_v55 }
 0x3a6   :  { %v6590_v30 = vpop.eup %6589  ;;  %v3126_v28 = vmul.f32 %v6588_v59, %v8806_v9  ;;  %6609 = vpow2.f32 %v4855_v17  ;;  %v8492_v36 = vpop.f32.mrb[144].mxu0 }
 0x3a7   :  { %v6592_v41 = vpop.eup %6591  ;;  %v3990_v47 = vadd.f32 1.0, %v6590_v30  ;;  %6611 = vpow2.f32 %v4695_v58  ;;  %v8495_v0 = vpop.f32.mrb[145].mxu0 }
 0x3a8   :  { %v6594_v21 = vpop.eup %6593  ;;  %v2745_v3 = vadd.f32 1.0, %v6592_v41  ;;  %6613 = vpow2.f32 %v4853_v14  ;;  %v8498_v1 = vpop.f32.mrb[146].mxu0 }
 0x3a9   :  { %v6596_v15 = vpop.eup %6595  ;;  %6615 = vrcp.f32 %v3990_v47  ;;  %v3995_v33 = vadd.f32 1.0, %v6594_v21  ;;  %v8501_v55 = vpop.f32.mrb[147].mxu0  ;;  %v4698_v21 = vmul.f32 -1.442695, %v8403_v50 }
 0x3aa   :  { %v6598_v62 = vpop.eup %6597  ;;  %6617 = vrcp.f32 %v2745_v3  ;;  %v2746_v8 = vadd.f32 1.0, %v6596_v15 }
 0x3ab   :  { %v6600_v24 = vpop.eup %6599  ;;  %6619 = vrcp.f32 %v3995_v33  ;;  %v3993_v45 = vadd.f32 1.0, %v6598_v62  ;;  %v4859_v33 = vmul.f32 -1.442695, %v8405_v37  ;;  %v4700_v37 = vmul.f32 -1.442695, %v8416_v7 }
 0x3ac   :  { %v6602_v43 = vpop.eup %6601  ;;  %6621 = vrcp.f32 %v2746_v8  ;;  %v4862_v7 = vmul.f32 -1.442695, %v8418_v60  ;;  %v4702_v60 = vmul.f32 -1.442695, %v8426_v23 }
 0x3ad   :  { %v6604_v26 = vpop.eup %6603  ;;  %v3127_v17 = vmul.f32 %v6602_v43, %v8807_v2  ;;  %6623 = vrcp.f32 %v3993_v45  ;;  %v8809_v43 = vld [vmem:[#allocation39_spill] sm:$0xff] }
 0x3ae   :  { %v6606_v22 = vpop.eup %6605  ;;  %v5520_v35 = vpack.c.bf16 %v6604_v26, %v6586_v16  ;;  %6625 = vpow2.f32 %v4696_v61  ;;  %v8506_v47 = vpop.f32.mrb[148].mxu0  ;;  %v4699_v61 = vmul.f32 -1.442695, %v8407_v48 }
 0x3af   :  { %v6608_v58 = vpop.eup %6607  ;;  %v5295_v53 = vpack.c.bf16 %v3127_v17, %v3125_v49  ;;  %v3128_v14 = vmul.f32 %v6606_v22, %v8808_v32  ;;  %6627 = vpow2.f32 %v4858_v63  ;;  %v8509_v49 = vpop.f32.mrb[149].mxu0  ;;  %v8810_v17 = vld [vmem:[#allocation40_spill] sm:$0xff] }
 0x3b0   :  { %v6610_v59 = vpop.eup %6609  ;;  %5702 = vst [vmem:[#allocation10 + $0x48] sm:$0xff] %v5520_v35   ;;  %v2747_v30 = vadd.f32 1.0, %v6608_v58  ;;  %6629 = vpow2.f32 %v4697_v19  ;;  %v8512_v62 = vpop.f32.mrb[150].mxu0  ;;  %v4857_v19 = vmul.f32 -1.442695, %v8409_v57 }
 0x3b1   :  { %v6612_v42 = vpop.eup %6611  ;;  %5659 = vst [vmem:[#allocation7 + $0xe0] sm:$0xff] %v5295_v53   ;;  %v5455_v9 = vpack.c.bf16 %v3128_v14, %v3126_v28  ;;  %v3996_v41 = vadd.f32 1.0, %v6610_v59  ;;  %6631 = vpow2.f32 %v4856_v12  ;;  %v8515_v45 = vpop.f32.mrb[151].mxu0 }
 0x3b2   :  { %v6614_v27 = vpop.eup %6613  ;;  %6633 = vrcp.f32 %v2747_v30  ;;  %v2748_v16 = vadd.f32 1.0, %v6612_v42 }
 0x3b3   :  { %v6616_v3 = vpop.eup %6615  ;;  %5690 = vst [vmem:[#allocation8 + $0xe0] sm:$0xff] %v5455_v9   ;;  %6635 = vrcp.f32 %v3996_v41  ;;  %v3994_v15 = vadd.f32 1.0, %v6614_v27  ;;  %v4701_v9 = vmul.f32 -1.442695, %v8421_v20 }
 0x3b4   :  { %v6618_v28 = vpop.eup %6617  ;;  %v5515_v8 = vpack.c.bf16 %v6616_v3, %v6600_v24  ;;  %6637 = vrcp.f32 %v2748_v16  ;;  %v8811_v16 = vld [vmem:[#allocation41_spill] sm:$0xff]  ;;  %v4860_v3 = vmul.f32 -1.442695, %v8423_v10 }
 0x3b5   :  { %v6620_v63 = vpop.eup %6619  ;;  %v3129_v50 = vmul.f32 %v6618_v28, %v8809_v43  ;;  %6639 = vrcp.f32 %v3994_v15 }
 0x3b6   :  { %v6622_v26 = vpop.eup %6621  ;;  %5701 = vst [vmem:[#allocation10 + $0x40] sm:$0xff] %v5515_v8   ;;  %6641 = vpow2.f32 %v4698_v21  ;;  %v8521_v35 = vpop.f32.mrb[152].mxu0 }
 0x3b7   :  { %v6624_v2 = vpop.eup %6623  ;;  %v3130_v12 = vmul.f32 %v6622_v26, %v8810_v17  ;;  %6643 = vpow2.f32 %v4859_v33  ;;  %v8523_v57 = vpop.f32.mrb[153].mxu0 }
 0x3b8   :  { %v6626_v24 = vpop.eup %6625  ;;  %6645 = vpow2.f32 %v4699_v61  ;;  %v8526_v59 = vpop.f32.mrb[154].mxu0  ;;  %v8812_v61 = vld [vmem:[#allocation42_spill] sm:$0xff] }
 0x3b9   :  { %v6628_v48 = vpop.eup %6627  ;;  %v2749_v22 = vadd.f32 1.0, %v6626_v24  ;;  %6647 = vpow2.f32 %v4857_v19  ;;  %v8529_v41 = vpop.f32.mrb[155].mxu0 }
 0x3ba   :  { %v6630_v58 = vpop.eup %6629  ;;  %v3999_v53 = vadd.f32 1.0, %v6628_v48  ;;  %6649 = vpow2.f32 %v4700_v37 }
 0x3bb   :  { %v6632_v32 = vpop.eup %6631  ;;  %6651 = vrcp.f32 %v2749_v22  ;;  %v2750_v14 = vadd.f32 1.0, %v6630_v58 }
 0x3bc   :  { %v6634_v30 = vpop.eup %6633  ;;  %6653 = vrcp.f32 %v3999_v53  ;;  %v3997_v42 = vadd.f32 1.0, %v6632_v32 }
 0x3bd   :  { %v6636_v27 = vpop.eup %6635  ;;  %v3131_v21 = vmul.f32 %v6634_v30, %v8811_v16  ;;  %6655 = vrcp.f32 %v2750_v14 }
 0x3be   :  { %v6638_v15 = vpop.eup %6637  ;;  %v5530_v33 = vpack.c.bf16 %v6636_v27, %v6620_v63  ;;  %6657 = vrcp.f32 %v3997_v42  ;;  %v8535_v10 = vpop.f32.mrb[156].mxu0  ;;  %v8813_v42 = vld [vmem:[#allocation43_spill] sm:$0xff]  ;;  %v4861_v27 = vmul.f32 -1.442695, %v8432_v40  ;;  %v4864_v40 = vmul.f32 -1.442695, %v8441_v39 }
 0x3bf   :  { %v6640_v28 = vpop.eup %6639  ;;  %v5300_v8 = vpack.c.bf16 %v3131_v21, %v3129_v50  ;;  %v3132_v43 = vmul.f32 %v6638_v15, %v8812_v61  ;;  %6659 = vpow2.f32 %v4862_v7  ;;  %v8537_v23 = vpop.f32.mrb[157].mxu0  ;;  %v4703_v7 = vmul.f32 -1.442695, %v8430_v34  ;;  %v8814_v15 = vld [vmem:[#allocation44_spill] sm:$0xff] }
 0x3c0   :  { %v6642_v19 = vpop.eup %6641  ;;  %5704 = vst [vmem:[#allocation10 + $0x58] sm:$0xff] %v5530_v33   ;;  %v5525_v20 = vpack.c.bf16 %v6640_v28, %v6624_v2  ;;  %6661 = vpow2.f32 %v4701_v9  ;;  %v8539_v22 = vpop.f32.mrb[158].mxu0  ;;  %v4866_v21 = vmul.f32 -1.442695, %v8438_v29 }
 0x3c1   :  { %v6644_v26 = vpop.eup %6643  ;;  %5660 = vst [vmem:[#allocation7 + $0xe8] sm:$0xff] %v5300_v8   ;;  %v5460_v37 = vpack.c.bf16 %v3132_v43, %v3130_v12  ;;  %v2751_v17 = vadd.f32 1.0, %v6642_v19  ;;  %6663 = vpow2.f32 %v4860_v3  ;;  %v4863_v12 = vmul.f32 -1.442695, %v8428_v38  ;;  %v8542_v53 = vpop.f32.mrb[159].mxu0 }
 0x3c2   :  { %v6646_v63 = vpop.eup %6645  ;;  %5703 = vst [vmem:[#allocation10 + $0x50] sm:$0xff] %v5525_v20   ;;  %v4000_v24 = vadd.f32 1.0, %v6644_v26  ;;  %6665 = vpow2.f32 %v4702_v60  ;;  %v4867_v20 = vmul.f32 -1.442695, %v8444_v6 }
 0x3c3   :  { %v6648_v50 = vpop.eup %6647  ;;  %5691 = vst [vmem:[#allocation8 + $0xe8] sm:$0xff] %v5460_v37   ;;  %6667 = vrcp.f32 %v2751_v17  ;;  %v2752_v48 = vadd.f32 1.0, %v6646_v63  ;;  %v8815_v37 = vld [vmem:[#allocation45_spill] sm:$0xff]  ;;  %v4865_v63 = vmul.f32 -1.442695, %v8446_v11  ;;  %v8817_v11 = vld [vmem:[#allocation48_spill] sm:$0xff] }
 0x3c4   :  { %v6650_v2 = vpop.eup %6649  ;;  %6669 = vrcp.f32 %v4000_v24  ;;  %v3998_v58 = vadd.f32 1.0, %v6648_v50 }
 0x3c5   :  { %v6652_v32 = vpop.eup %6651  ;;  %6671 = vrcp.f32 %v2752_v48  ;;  %v2753_v14 = vadd.f32 1.0, %v6650_v2  ;;  %v4870_v48 = vmul.f32 -1.442695, %v8450_v46 }
 0x3c6   :  { %v6654_v30 = vpop.eup %6653  ;;  %v3133_v9 = vmul.f32 %v6652_v32, %v8813_v42  ;;  %6673 = vrcp.f32 %v3998_v58  ;;  %v4868_v32 = vmul.f32 -1.442695, %v8454_v31 }
 0x3c7   :  { %v6656_v16 = vpop.eup %6655  ;;  %6675 = vrcp.f32 %v2753_v14 }
 0x3c8   :  { %v6658_v3 = vpop.eup %6657  ;;  %v3134_v38 = vmul.f32 %v6656_v16, %v8814_v15  ;;  %6677 = vpow2.f32 %v4863_v12  ;;  %v8816_v12 = vld [vmem:[#allocation46_spill] sm:$0xff] }
 0x3c9   :  { %v6660_v33 = vpop.eup %6659  ;;  %6679 = vpow2.f32 %v4703_v7 }
 0x3ca   :  { %v6662_v60 = vpop.eup %6661  ;;  %v4003_v28 = vadd.f32 1.0, %v6660_v33  ;;  %6681 = vpow2.f32 %v4861_v27  ;;  %v4869_v33 = vmul.f32 -1.442695, %v8460_v51 }
 0x3cb   :  { %v6664_v34 = vpop.eup %6663  ;;  %v2754_v8 = vadd.f32 1.0, %v6662_v60  ;;  %6683 = vpow2.f32 %v4866_v21 }
 0x3cc   :  { %v6666_v61 = vpop.eup %6665  ;;  %6685 = vrcp.f32 %v4003_v28  ;;  %v4001_v43 = vadd.f32 1.0, %v6664_v34  ;;  %v4874_v28 = vmul.f32 -1.442695, %v8464_v56 }
 0x3cd   :  { %v6668_v19 = vpop.eup %6667  ;;  %6687 = vrcp.f32 %v2754_v8  ;;  %v2755_v29 = vadd.f32 1.0, %v6666_v61  ;;  %v8818_v8 = vld [vmem:[#allocation49_spill] sm:$0xff] }
 0x3ce   :  { %v6670_v26 = vpop.eup %6669  ;;  %v3135_v17 = vmul.f32 %v6668_v19, %v8815_v37  ;;  %6689 = vrcp.f32 %v4001_v43  ;;  %v4872_v43 = vmul.f32 -1.442695, %v8468_v25  ;;  %v8819_v19 = vld [vmem:[#allocation50_spill] sm:$0xff] }
 0x3cf   :  { %v6672_v24 = vpop.eup %6671  ;;  %v5540_v50 = vpack.c.bf16 %v6670_v26, %v6654_v30  ;;  %6691 = vrcp.f32 %v2755_v29 }
 0x3d0   :  { %v6674_v2 = vpop.eup %6673  ;;  %v5305_v58 = vpack.c.bf16 %v3135_v17, %v3133_v9  ;;  %v3136_v39 = vmul.f32 %v6672_v24, %v8816_v12  ;;  %6693 = vpow2.f32 %v4864_v40 }
 0x3d1   :  { %v6676_v14 = vpop.eup %6675  ;;  %5706 = vst [vmem:[#allocation10 + $0x68] sm:$0xff] %v5540_v50   ;;  %v5535_v6 = vpack.c.bf16 %v6674_v2, %v6658_v3  ;;  %6695 = vpow2.f32 %v4867_v20  ;;  %v4871_v3 = vmul.f32 -1.442695, %v8457_v4  ;;  %v4875_v50 = vmul.f32 -1.442695, %v8471_v18 }
 0x3d2   :  { %v6678_v7 = vpop.eup %6677  ;;  %5661 = vst [vmem:[#allocation7 + $0xf0] sm:$0xff] %v5305_v58   ;;  %v5465_v42 = vpack.c.bf16 %v3136_v39, %v3134_v38  ;;  %v3137_v27 = vmul.f32 %v6676_v14, %v8817_v11  ;;  %6697 = vpow2.f32 %v4865_v63  ;;  %v4873_v58 = vmul.f32 -1.442695, %v8475_v54 }
 0x3d3   :  { %v6680_v30 = vpop.eup %6679  ;;  %5705 = vst [vmem:[#allocation10 + $0x60] sm:$0xff] %v5535_v6   ;;  %v4004_v46 = vadd.f32 1.0, %v6678_v7  ;;  %6699 = vpow2.f32 %v4870_v48 }
 0x3d4   :  { %v6682_v9 = vpop.eup %6681  ;;  %5692 = vst [vmem:[#allocation8 + $0xf0] sm:$0xff] %v5465_v42   ;;  %v2756_v16 = vadd.f32 1.0, %v6680_v30  ;;  %6701 = vpow2.f32 %v4868_v32 }
 0x3d5   :  { %v6684_v21 = vpop.eup %6683  ;;  %6703 = vrcp.f32 %v4004_v46  ;;  %v4002_v31 = vadd.f32 1.0, %v6682_v9 }
 0x3d6   :  { %v8558_v15 = vpop.eup %6685  ;;  %6705 = vrcp.f32 %v2756_v16  ;;  %v4007_v38 = vadd.f32 1.0, %v6684_v21 }
 0x3d7   :  { %v6688_v60 = vpop.eup %6687  ;;  %6707 = vrcp.f32 %v4002_v31 }
 0x3d8   :  { %v8562_v34 = vpop.eup %6689  ;;  %v8565_v61 = vmul.f32 %v6688_v60, %v8818_v8  ;;  %6709 = vrcp.f32 %v4007_v38 }
 0x3d9   :  { %v6692_v40 = vpop.eup %6691  ;;  %6711 = vpow2.f32 %v4871_v3 }
 0x3da   :  { %v6694_v4 = vpop.eup %6693  ;;  %v3139_v29 = vmul.f32 %v6692_v40, %v8819_v19  ;;  %6713 = vpow2.f32 %v4869_v33 }
 0x3db   :  { %v6696_v51 = vpop.eup %6695  ;;  %v4005_v20 = vadd.f32 1.0, %v6694_v4  ;;  %6715 = vpow2.f32 %v4874_v28 }
 0x3dc   :  { %v6698_v56 = vpop.eup %6697  ;;  %v5310_v26 = vpack.c.bf16 %v3139_v29, %v3137_v27  ;;  %v4008_v37 = vadd.f32 1.0, %v6696_v51  ;;  %6717 = vpow2.f32 %v4872_v43 }
 0x3dd   :  { %v6700_v25 = vpop.eup %6699  ;;  %6719 = vrcp.f32 %v4005_v20  ;;  %v4006_v17 = vadd.f32 1.0, %v6698_v56 }
 0x3de   :  { %v6702_v63 = vpop.eup %6701  ;;  %5662 = vst [vmem:[#allocation7 + $0xf8] sm:$0xff] %v5310_v26   ;;  %6721 = vrcp.f32 %v4008_v37  ;;  %v4011_v24 = vadd.f32 1.0, %v6700_v25 }
 0x3df   :  { %v6704_v48 = vpop.eup %6703  ;;  %6723 = vrcp.f32 %v4006_v17  ;;  %v4009_v2 = vadd.f32 1.0, %v6702_v63 }
 0x3e0   :  { %6887 = shalt.err (!%p6884_p6)
}
 0x3e1   :  { %s6888_s10 = scalar_lea.hbm %s8651_s4, 4096 }
 0x3e2   :  { %p6889_p7 = scmp.ne.s32.totalorder %s8651_s4, %s6888_s10  ;;  %p6892_p8 = scmp.lt.u32.totalorder %s6888_s10, %s8651_s4 }
 0x3e4   :  { %p6894_p9 = pnand %p6892_p8, %p6889_p7 }
 0x3e6   :  { %6897 = shalt.err (!%p6894_p9)
}
 0x3e7   :  { %s6958_s15 = smov 64   ;;  %s6959_s16 = smov 4   ;;  %v6706_v18 = vpop.eup %6705  ;;  %v5550_v54 = vpack.c.bf16 %v6704_v48, %v8558_v15  ;;  %6725 = vrcp.f32 %v4011_v24  ;;  %v4878_v12 = vmul.f32 -1.442695, %v8479_v44  ;;  %v8820_v32 = vld [vmem:[#allocation51_spill] sm:$0xff] }
 0x3e8   :  { %4496 = dma.vmem_to_hbm [thread:$0]  %s8569_s2, 4096, %s8651_s4, [#allocation4], %s6958_s15, %s6958_s15, %s6959_s16   ;;  %v6708_v39 = vpop.eup %6707  ;;  %v3140_v14 = vmul.f32 %v6706_v18, %v8820_v32  ;;  %6727 = vrcp.f32 %v4009_v2  ;;  %v4876_v6 = vmul.f32 -1.442695, %v8482_v13  ;;  %v4879_v21 = vmul.f32 -1.442695, %v8485_v5 }
 0x3e9   :  { %s6960_s19 = smov [#allocation8]   ;;  %v6710_v7 = vpop.eup %6709  ;;  %5708 = vst [vmem:[#allocation10 + $0x78] sm:$0xff] %v5550_v54   ;;  %v5545_v42 = vpack.c.bf16 %v6708_v39, %v8562_v34  ;;  %6729 = vpow2.f32 %v4875_v50 }
 0x3ea   :  { %s4502_s20 = sshll.u32 %s6960_s19, 4  ;;  %v6712_v11 = vpop.eup %6711  ;;  %v5470_v27 = vpack.c.bf16 %v3140_v14, %v8565_v61  ;;  %6731 = vpow2.f32 %v4873_v58  ;;  %s4503_s20 = int_to_ptr.vmem [resolvable:$true] %s4502_s20 }
 0x3eb   :  { %v6714_v30 = vpop.eup %6713  ;;  %5707 = vst [vmem:[#allocation10 + $0x70] sm:$0xff] %v5545_v42   ;;  %v4012_v44 = vadd.f32 1.0, %v6712_v11  ;;  %6733 = vpow2.f32 %v4878_v12  ;;  %s6898_s4 = scalar_lea.vmem %s4503_s20, 4096  ;;  %p6903_p11 = scmp.lt.s32.totalorder %s4503_s20, %s4503_s20 }
 0x3ec   :  { %v6716_v46 = vpop.eup %6715  ;;  %5693 = vst [vmem:[#allocation8 + $0xf8] sm:$0xff] %v5470_v27   ;;  %v4010_v9 = vadd.f32 1.0, %v6714_v30  ;;  %6735 = vpow2.f32 %v4876_v6  ;;  %p6899_p10 = scmp.ne.s32.totalorder %s4503_s20, %s6898_s4  ;;  %p6904_p12 = scmp.lt.s32.totalorder %s6898_s4, %s6898_s4 }
 0x3ed   :  { %v6718_v16 = vpop.eup %6717  ;;  %6737 = vrcp.f32 %v4012_v44  ;;  %v4015_v13 = vadd.f32 1.0, %v6716_v46 }
 0x3ee   :  { %p6905_p13 = por %p6904_p12, %p6903_p11 }
 0x3f0   :  { %p6906_p0 = pnand %p6905_p13, %p6899_p10 }
 0x3f2   :  { %6909 = shalt.err (!%p6906_p0)
}
 0x3f3   :  { %s6910_s22 = scalar_lea.hbm %s8652_s5, 4096 }
 0x3f4   :  { %p6911_p1 = scmp.ne.s32.totalorder %s8652_s5, %s6910_s22  ;;  %p6914_p2 = scmp.lt.u32.totalorder %s6910_s22, %s8652_s5 }
 0x3f6   :  { %p6916_p3 = pnand %p6914_p2, %p6911_p1 }
 0x3f8   :  { %6919 = shalt.err (!%p6916_p3)
}
 0x3f9   :  { %4508 = dma.vmem_to_hbm [thread:$0]  %s4503_s20, 4096, %s8652_s5, [#allocation9], %s6958_s15, %s6958_s15, %s6959_s16   ;;  %v6720_v5 = vpop.eup %6719  ;;  %6739 = vrcp.f32 %v4010_v9  ;;  %v4013_v31 = vadd.f32 1.0, %v6718_v16  ;;  %v4877_v3 = vmul.f32 -1.442695, %v8489_v52 }
 0x3fa   :  { %v6722_v15 = vpop.eup %6721  ;;  %6741 = vrcp.f32 %v4015_v13  ;;  %v4882_v38 = vmul.f32 -1.442695, %v8492_v36  ;;  %v4880_v28 = vmul.f32 -1.442695, %v8495_v0  ;;  %v4883_v61 = vmul.f32 -1.442695, %v8498_v1 }
 0x3fb   :  { %v6724_v33 = vpop.eup %6723  ;;  %v5560_v60 = vpack.c.bf16 %v6722_v15, %v6710_v7  ;;  %6743 = vrcp.f32 %v4013_v31  ;;  %v4881_v51 = vmul.f32 -1.442695, %v8501_v55  ;;  %v4886_v56 = vmul.f32 -1.442695, %v8506_v47  ;;  %s6961_s5 = smov [#allocation10]  }
 0x3fc   :  { %v6726_v34 = vpop.eup %6725  ;;  %v5555_v8 = vpack.c.bf16 %v6724_v33, %v6720_v5  ;;  %6745 = vpow2.f32 %v4879_v21  ;;  %v4884_v25 = vmul.f32 -1.442695, %v8509_v49  ;;  %v4887_v24 = vmul.f32 -1.442695, %v8512_v62  ;;  %s4514_s28 = sshll.u32 %s6961_s5, 4  ;;  %s4515_s28 = int_to_ptr.vmem [resolvable:$true] %s4514_s28 }
 0x3fd   :  { %v6728_v43 = vpop.eup %6727  ;;  %5710 = vst [vmem:[#allocation10 + $0x88] sm:$0xff] %v5560_v60   ;;  %6747 = vpow2.f32 %v4877_v3  ;;  %v4885_v62 = vmul.f32 -1.442695, %v8515_v45  ;;  %v4890_v14 = vmul.f32 -1.442695, %v8521_v35  ;;  %s6920_s29 = scalar_lea.vmem %s4515_s28, 4096  ;;  %p6925_p5 = scmp.lt.s32.totalorder %s4515_s28, %s4515_s28 }
 0x3fe   :  { %v6730_v40 = vpop.eup %6729  ;;  %5709 = vst [vmem:[#allocation10 + $0x80] sm:$0xff] %v5555_v8   ;;  %6749 = vpow2.f32 %v4882_v38  ;;  %v4888_v42 = vmul.f32 -1.442695, %v8523_v57  ;;  %v4891_v30 = vmul.f32 -1.442695, %v8526_v59  ;;  %p6921_p4 = scmp.ne.s32.totalorder %s4515_s28, %s6920_s29  ;;  %p6926_p6 = scmp.lt.s32.totalorder %s6920_s29, %s6920_s29 }
 0x3ff   :  { %v6732_v52 = vpop.eup %6731  ;;  %v4016_v4 = vadd.f32 1.0, %v6730_v40  ;;  %6751 = vpow2.f32 %v4880_v28  ;;  %v4889_v21 = vmul.f32 -1.442695, %v8529_v41  ;;  %v4894_v31 = vmul.f32 -1.442695, %v8535_v10 }
 0x400   :  { %v6734_v36 = vpop.eup %6733  ;;  %v4014_v19 = vadd.f32 1.0, %v6732_v52  ;;  %6753 = vpow2.f32 %v4883_v61  ;;  %v4892_v38 = vmul.f32 -1.442695, %v8537_v23  ;;  %v4895_v28 = vmul.f32 -1.442695, %v8539_v22  ;;  %p6927_p7 = por %p6926_p6, %p6925_p5 }
 0x401   :  { %v6736_v29 = vpop.eup %6735  ;;  %6755 = vrcp.f32 %v4016_v4  ;;  %v4019_v0 = vadd.f32 1.0, %v6734_v36  ;;  %v4893_v41 = vmul.f32 -1.442695, %v8542_v53 }
 0x402   :  { %v6738_v20 = vpop.eup %6737  ;;  %6757 = vrcp.f32 %v4014_v19  ;;  %v4017_v1 = vadd.f32 1.0, %v6736_v29  ;;  %p6928_p8 = pnand %p6927_p7, %p6921_p4 }
 0x403   :  { %v6740_v26 = vpop.eup %6739  ;;  %v5570_v37 = vpack.c.bf16 %v6738_v20, %v6726_v34  ;;  %6759 = vrcp.f32 %v4019_v0 }
 0x404   :  { %v6742_v17 = vpop.eup %6741  ;;  %v5565_v63 = vpack.c.bf16 %v6740_v26, %v6728_v43  ;;  %6761 = vrcp.f32 %v4017_v1 }
 0x405   :  { %v6744_v50 = vpop.eup %6743  ;;  %5712 = vst [vmem:[#allocation10 + $0x98] sm:$0xff] %v5570_v37   ;;  %6763 = vpow2.f32 %v4881_v51 }
 0x406   :  { %v6746_v48 = vpop.eup %6745  ;;  %5711 = vst [vmem:[#allocation10 + $0x90] sm:$0xff] %v5565_v63   ;;  %6765 = vpow2.f32 %v4886_v56 }
 0x407   :  { %v6748_v55 = vpop.eup %6747  ;;  %v4020_v2 = vadd.f32 1.0, %v6746_v48  ;;  %6767 = vpow2.f32 %v4884_v25 }
 0x408   :  { %v6750_v47 = vpop.eup %6749  ;;  %v4018_v58 = vadd.f32 1.0, %v6748_v55  ;;  %6769 = vpow2.f32 %v4887_v24 }
 0x409   :  { %v6752_v18 = vpop.eup %6751  ;;  %6771 = vrcp.f32 %v4020_v2  ;;  %v4023_v49 = vadd.f32 1.0, %v6750_v47 }
 0x40a   :  { %v6754_v54 = vpop.eup %6753  ;;  %6773 = vrcp.f32 %v4018_v58  ;;  %v4021_v12 = vadd.f32 1.0, %v6752_v18 }
 0x40b   :  { %v6756_v39 = vpop.eup %6755  ;;  %6775 = vrcp.f32 %v4023_v49  ;;  %v4024_v32 = vadd.f32 1.0, %v6754_v54 }
 0x40c   :  { %v6758_v6 = vpop.eup %6757  ;;  %v5580_v7 = vpack.c.bf16 %v6756_v39, %v6742_v17  ;;  %6777 = vrcp.f32 %v4021_v12 }
 0x40d   :  { %v6760_v11 = vpop.eup %6759  ;;  %v5575_v27 = vpack.c.bf16 %v6758_v6, %v6744_v50  ;;  %6779 = vrcp.f32 %v4024_v32 }
 0x40e   :  { %v6762_v44 = vpop.eup %6761  ;;  %5714 = vst [vmem:[#allocation10 + $0xa8] sm:$0xff] %v5580_v7   ;;  %6781 = vpow2.f32 %v4885_v62 }
 0x40f   :  { %v6764_v46 = vpop.eup %6763  ;;  %5713 = vst [vmem:[#allocation10 + $0xa0] sm:$0xff] %v5575_v27   ;;  %6783 = vpow2.f32 %v4890_v14 }
 0x410   :  { %v6766_v45 = vpop.eup %6765  ;;  %v4022_v9 = vadd.f32 1.0, %v6764_v46  ;;  %6785 = vpow2.f32 %v4888_v42 }
 0x411   :  { %v6768_v35 = vpop.eup %6767  ;;  %v4027_v16 = vadd.f32 1.0, %v6766_v45  ;;  %6787 = vpow2.f32 %v4891_v30 }
 0x412   :  { %v6770_v13 = vpop.eup %6769  ;;  %6789 = vrcp.f32 %v4022_v9  ;;  %v4025_v57 = vadd.f32 1.0, %v6768_v35 }
 0x413   :  { %v6772_v5 = vpop.eup %6771  ;;  %6791 = vrcp.f32 %v4027_v16  ;;  %v4028_v59 = vadd.f32 1.0, %v6770_v13 }
 0x414   :  { %v6774_v3 = vpop.eup %6773  ;;  %v5590_v15 = vpack.c.bf16 %v6772_v5, %v6760_v11  ;;  %6793 = vrcp.f32 %v4025_v57 }
 0x415   :  { %v6776_v33 = vpop.eup %6775  ;;  %v5585_v60 = vpack.c.bf16 %v6774_v3, %v6762_v44  ;;  %6795 = vrcp.f32 %v4028_v59 }
 0x416   :  { %v6778_v34 = vpop.eup %6777  ;;  %5716 = vst [vmem:[#allocation10 + $0xb8] sm:$0xff] %v5590_v15   ;;  %6797 = vpow2.f32 %v4889_v21 }
 0x417   :  { %v6780_v8 = vpop.eup %6779  ;;  %5715 = vst [vmem:[#allocation10 + $0xb0] sm:$0xff] %v5585_v60   ;;  %6799 = vpow2.f32 %v4894_v31 }
 0x418   :  { %v6782_v61 = vpop.eup %6781  ;;  %v5600_v10 = vpack.c.bf16 %v6780_v8, %v6776_v33  ;;  %6801 = vpow2.f32 %v4892_v38 }
 0x419   :  { %v6784_v43 = vpop.eup %6783  ;;  %v4026_v40 = vadd.f32 1.0, %v6782_v61  ;;  %6803 = vpow2.f32 %v4895_v28 }
 0x41a   :  { %v6786_v23 = vpop.eup %6785  ;;  %5718 = vst [vmem:[#allocation10 + $0xc8] sm:$0xff] %v5600_v10   ;;  %v4031_v52 = vadd.f32 1.0, %v6784_v43  ;;  %6805 = vpow2.f32 %v4893_v41 }
 0x41b   :  { %v6788_v4 = vpop.eup %6787  ;;  %6807 = vrcp.f32 %v4026_v40  ;;  %v4029_v0 = vadd.f32 1.0, %v6786_v23 }
 0x41c   :  { %v6790_v22 = vpop.eup %6789  ;;  %v4032_v36 = vadd.f32 1.0, %v6788_v4  ;;  %6809 = vrcp.f32 %v4031_v52 }
 0x41d   :  { %v6792_v19 = vpop.eup %6791  ;;  %v5595_v29 = vpack.c.bf16 %v6790_v22, %v6778_v34 }
 0x41e   :  { %v6794_v53 = vpop.eup %6793  ;;  %6811 = vrcp.f32 %v4032_v36 }
 0x41f   :  { %v6796_v51 = vpop.eup %6795  ;;  %5717 = vst [vmem:[#allocation10 + $0xc0] sm:$0xff] %v5595_v29   ;;  %6813 = vrcp.f32 %v4029_v0 }
 0x420   :  { %v6798_v20 = vpop.eup %6797  ;;  %v5610_v1 = vpack.c.bf16 %v6796_v51, %v6792_v19 }
 0x421   :  { %v6800_v56 = vpop.eup %6799  ;;  %v4030_v26 = vadd.f32 1.0, %v6798_v20 }
 0x422   :  { %v6802_v37 = vpop.eup %6801  ;;  %5720 = vst [vmem:[#allocation10 + $0xd8] sm:$0xff] %v5610_v1   ;;  %v4035_v25 = vadd.f32 1.0, %v6800_v56 }
 0x423   :  { %v6804_v17 = vpop.eup %6803  ;;  %6815 = vrcp.f32 %v4030_v26  ;;  %v4033_v63 = vadd.f32 1.0, %v6802_v37 }
 0x424   :  { %v6806_v24 = vpop.eup %6805  ;;  %6817 = vrcp.f32 %v4035_v25  ;;  %v4036_v50 = vadd.f32 1.0, %v6804_v17 }
 0x425   :  { %v6808_v48 = vpop.eup %6807  ;;  %6819 = vrcp.f32 %v4033_v63  ;;  %v4034_v55 = vadd.f32 1.0, %v6806_v24 }
 0x426   :  { %v5605_v2 = vpack.c.bf16 %v6808_v48, %v6794_v53  ;;  %6821 = vrcp.f32 %v4036_v50  ;;  %v6810_v47 = vpop.eup %6809 }
 0x427   :  { %6823 = vrcp.f32 %v4034_v55 }
 0x428   :  { %v6812_v58 = vpop.eup %6811  ;;  %5719 = vst [vmem:[#allocation10 + $0xd0] sm:$0xff] %v5605_v2  }
 0x429   :  { %v5620_v18 = vpack.c.bf16 %v6812_v58, %v6810_v47  ;;  %v6814_v49 = vpop.eup %6813 }
 0x42b   :  { %5722 = vst [vmem:[#allocation10 + $0xe8] sm:$0xff] %v5620_v18  }
 0x42d   :  { %v6816_v54 = vpop.eup %6815 }
 0x42e   :  { %v6818_v12 = vpop.eup %6817  ;;  %v5615_v62 = vpack.c.bf16 %v6816_v54, %v6814_v49 }
 0x42f   :  { %v6820_v39 = vpop.eup %6819 }
 0x430   :  { %v6822_v32 = vpop.eup %6821  ;;  %5721 = vst [vmem:[#allocation10 + $0xe0] sm:$0xff] %v5615_v62  }
 0x431   :  { %v6824_v14 = vpop.eup %6823  ;;  %v5630_v6 = vpack.c.bf16 %v6822_v32, %v6818_v12 }
 0x432   :  { %v5625_v7 = vpack.c.bf16 %v6824_v14, %v6820_v39 }
 0x433   :  { %5724 = vst [vmem:[#allocation10 + $0xf8] sm:$0xff] %v5630_v6  }
 0x434   :  { %5723 = vst [vmem:[#allocation10 + $0xf0] sm:$0xff] %v5625_v7  }
 0x435   :  { %6931 = shalt.err (!%p6928_p8)
}
 0x436   :  { %s6932_s2 = scalar_lea.hbm %s8653_s6, 4096 }
 0x437   :  { %p6933_p9 = scmp.ne.s32.totalorder %s8653_s6, %s6932_s2  ;;  %p6936_p10 = scmp.lt.u32.totalorder %s6932_s2, %s8653_s6 }
 0x439   :  { %p6938_p11 = pnand %p6936_p10, %p6933_p9 }
 0x43b   :  { %6941 = shalt.err (!%p6938_p11)
}
 0x43c   :  { %4520 = dma.vmem_to_hbm [thread:$0]  %s4515_s28, 4096, %s8653_s6, [#allocation9], %s6958_s15, %s6958_s15, %s6959_s16  }
 0x43d   :  { %6946 = dma.done.wait [#allocation4], 4096  }
 0x43e   :  { %6947 = vsyncadd [#allocation4], 4294963200 }
 0x43f   :  { %6948 = dma.done.wait [#allocation9], 8192  }
 0x440   :  { %6949 = vsyncadd [#allocation9], 4294959104 }
 0x441   :  { %4530 = vsyncpa [#allocation3], 1 }
 0x442   :  { %4531 = vsyncpa [#allocation6], 1 }
 0x443   :  { %4532 = vsyncpa [#allocation4], 1 }
 0x444   :  { %4533 = vsyncpa [#allocation9], 1 }

</bundles_post_ra>
